<compile_context>
chip_gen: v7x
topology: tpu7x:2x2x1
jax: 0.10.0
libtpu: 0.0.40
codegen_flags: <defaults>
</compile_context>

<pallas_src>
import functools

import numpy as np
import jax
import jax.numpy as jnp
from jax.experimental import pallas as pl
from jax.experimental.pallas import tpu as pltpu

# ----------------------------- configuration ------------------------------
NUM_FREQ = 4          # NeRF encoding frequencies (2^0 .. 2^(NUM_FREQ-1))
INCLUDE_INPUT = True  # include raw xyz in the encoding
IN_DIM = 3
PE_COLS = IN_DIM * NUM_FREQ                                 # 12 sin (and 12 cos) cols
ENC_DIM = (IN_DIM if INCLUDE_INPUT else 0) + 2 * PE_COLS    # 27
GEO_FEATURE_DIM = 32  # small stand-in for config.geo_feature_dim (=256 in prod)
OUT_DIM = 1 + GEO_FEATURE_DIM                               # 33
HIDDEN = 64           # MLP hidden width

TILE_N_MAX = 2048     # points per grid step (sweep 1024-4096; fits v7x scoped VMEM)
LANE = 128

assert INCLUDE_INPUT, "kernel assumes the raw xyz is part of the encoding"


def _round_up(v, m):
    return (v + m - 1) // m * m


# ------------------------------- kernel -----------------------------------
def surface_field_kernel(x_ref, fpe_ref, ph_ref, w0x_ref, w0sc_ref, b0_ref,
                         w1_ref, b1_ref, w2_ref, b2_ref, out_ref):
    """One tile of points: lane-dense NeRF PE -> 3-layer MLP -> lane-padded output."""
    x = x_ref[...]                                              # (T, 3) f32

    # Lane-dense NeRF encoding: one tiny MXU matmul builds all 24 phase columns,
    # one EUP sin() yields [sin | cos] (cos folded in as sin(t + pi/2)).
    phases = jnp.dot(x, fpe_ref[...],
                     preferred_element_type=jnp.float32) + ph_ref[...]
    trig = jnp.sin(phases)                                      # (T, 24)

    # First layer: concat([x, sin, cos]) @ W0 expressed as two matmuls over
    # row-reordered W0 slices -> no lane-axis concatenate.
    h = (jnp.dot(x.astype(jnp.bfloat16), w0x_ref[...],
                 preferred_element_type=jnp.float32)
         + jnp.dot(trig.astype(jnp.bfloat16), w0sc_ref[...],
                   preferred_element_type=jnp.float32)
         + b0_ref[...])
    h = jnp.maximum(h, 0.0)

    h = jnp.dot(h.astype(jnp.bfloat16), w1_ref[...],
                preferred_element_type=jnp.float32) + b1_ref[...]
    h = jnp.maximum(h, 0.0)

    out = jnp.dot(h.astype(jnp.bfloat16), w2_ref[...],
                  preferred_element_type=jnp.float32) + b2_ref[...]
    out_ref[...] = out.astype(out_ref.dtype)                    # (T, OUT_PAD)


# --------------------------- parameter plumbing ----------------------------
def _pe_constants():
    """Constant (3, 24) phase matrix (2^k*pi scales) and (1, 24) phase offsets."""
    f = np.zeros((IN_DIM, 2 * PE_COLS), np.float32)
    for k in range(NUM_FREQ):
        s = (2.0 ** k) * np.pi
        for d in range(IN_DIM):
            f[d, k * IN_DIM + d] = s                  # sin columns
            f[d, PE_COLS + k * IN_DIM + d] = s        # cos columns (via +pi/2 phase)
    ph = np.concatenate(
        [np.zeros((1, PE_COLS), np.float32),
         np.full((1, PE_COLS), np.pi / 2.0, np.float32)], axis=1)
    return jnp.asarray(f), jnp.asarray(ph)


def _reorder_w0(w0):
    """Split/reorder W0 rows from [x, sin0, cos0, sin1, cos1, ...] layout into
    the [x | all-sin | all-cos] layout the kernel consumes."""
    w0x = w0[:IN_DIM]
    sin_rows, cos_rows = [], []
    for k in range(NUM_FREQ):
        base = IN_DIM + 2 * IN_DIM * k
        sin_rows.append(w0[base:base + IN_DIM])
        cos_rows.append(w0[base + IN_DIM:base + 2 * IN_DIM])
    w0sc = jnp.concatenate(sin_rows + cos_rows, axis=0)          # (24, HIDDEN)
    return w0x, w0sc


# ------------------------------- wrapper -----------------------------------
@functools.partial(jax.jit, static_argnames=("density_only", "tile_n"))
def _surface_field_impl(x, w0, b0, w1, b1, w2, b2, *, density_only=False,
                        tile_n=None):
    n = x.shape[0]
    x = x.astype(jnp.float32)

    if tile_n is None:
        tile_n = min(TILE_N_MAX, _round_up(max(n, 8), 8))
    assert tile_n % 8 == 0, "tile_n must be sublane-aligned (multiple of 8)"
    n_pad = _round_up(n, tile_n)
    if n_pad != n:
        x = jnp.pad(x, ((0, n_pad - n), (0, 0)))

    # Parameter prep (constant-folded under jit).
    fpe, ph = _pe_constants()
    w0x, w0sc = _reorder_w0(w0)

    out_cols = 1 if density_only else OUT_DIM
    out_pad = _round_up(out_cols, LANE)
    w2p = jnp.pad(w2[:, :out_cols], ((0, 0), (0, out_pad - out_cols)))
    b2p = jnp.pad(b2[:, :out_cols], ((0, 0), (0, out_pad - out_cols)))

    w0x_b = w0x.astype(jnp.bfloat16)
    w0sc_b = w0sc.astype(jnp.bfloat16)
    w1_b = w1.astype(jnp.bfloat16)
    w2_b = w2p.astype(jnp.bfloat16)
    b0_f = b0.astype(jnp.float32)
    b1_f = b1.astype(jnp.float32)
    b2_f = b2p.astype(jnp.float32)

    full = lambda a: pl.BlockSpec(a.shape, lambda i: (0,) * a.ndim)

    out = pl.pallas_call(
        surface_field_kernel,
        out_shape=jax.ShapeDtypeStruct((n_pad, out_pad), jnp.float32),
        grid_spec=pltpu.PrefetchScalarGridSpec(
            num_scalar_prefetch=0,
            grid=(n_pad // tile_n,),
            in_specs=[
                pl.BlockSpec((tile_n, IN_DIM), lambda i: (i, 0)),   # points
                full(fpe), full(ph),
                full(w0x_b), full(w0sc_b), full(b0_f),
                full(w1_b), full(b1_f),
                full(w2_b), full(b2_f),
            ],
            out_specs=pl.BlockSpec((tile_n, out_pad), lambda i: (i, 0)),
        ),
        compiler_params=pltpu.CompilerParams(
            dimension_semantics=("parallel",)),
    )(x, fpe, ph, w0x_b, w0sc_b, b0_f, w1_b, b1_f, w2_b, b2_f)

    return out[:n, :out_cols]


def surface_field_forward(x, w0, b0, w1, b1, w2, b2, tile_n=None):
    """x: (N, 3) float32 -> (N, 1 + GEO_FEATURE_DIM) float32."""
    return _surface_field_impl(x, w0, b0, w1, b1, w2, b2,
                               density_only=False, tile_n=tile_n)


def surface_field_single_output(x, w0, b0, w1, b1, w2, b2, tile_n=None):
    """SurfaceField.single_output: density channel only (W2 restricted to col 0)."""
    return _surface_field_impl(x, w0, b0, w1, b1, w2, b2,
                               density_only=True, tile_n=tile_n)


# ------------------------- pure-JAX reference ------------------------------
def _reference(x, w0, b0, w1, b1, w2, b2):
    feats = [x] if INCLUDE_INPUT else []
    for k in range(NUM_FREQ):
        freq = (2.0 ** k) * jnp.pi
        feats.append(jnp.sin(x * freq))
        feats.append(jnp.cos(x * freq))
    enc = jnp.concatenate(feats, axis=-1)
    h = jnp.maximum(enc @ w0 + b0, 0.0)
    h = jnp.maximum(h @ w1 + b1, 0.0)
    return h @ w2 + b2


# ---------------------------------------------------------------------------
if __name__ == "__main__":
    # TODO(synk): base-class forward() is abstract; this realises the canonical
    # PE->MLP surface field implied by the config (geo_feature_dim shrunk for test).
    key = jax.random.PRNGKey(0)
    k_x, k0, k1, k2 = jax.random.split(key, 4)

    N = 200   # deliberately not a multiple of 8/128: exercises the padding path
    x = jax.random.uniform(k_x, (N, IN_DIM), jnp.float32, minval=-1.0, maxval=1.0)

    w0 = jax.random.normal(k0, (ENC_DIM, HIDDEN), jnp.float32) * (2.0 / ENC_DIM) ** 0.5
    b0 = jnp.zeros((1, HIDDEN), jnp.float32)
    w1 = jax.random.normal(k1, (HIDDEN, HIDDEN), jnp.float32) * (2.0 / HIDDEN) ** 0.5
    b1 = jnp.zeros((1, HIDDEN), jnp.float32)
    w2 = jax.random.normal(k2, (HIDDEN, OUT_DIM), jnp.float32) * (2.0 / HIDDEN) ** 0.5
    b2 = jnp.zeros((1, OUT_DIM), jnp.float32)

    ref = _reference(x, w0, b0, w1, b1, w2, b2)

    # Full forward, single-tile grid (auto tile size).
    out = jax.block_until_ready(surface_field_forward(x, w0, b0, w1, b1, w2, b2))
    assert out.shape == (N, OUT_DIM)
    # bf16 matmul operands vs f32 reference -> loose tolerance.
    assert jnp.allclose(out, ref, atol=5e-2, rtol=5e-2), "mismatch vs reference"

    # Multi-step grid (tile_n=64 -> 4 grid steps) must match the single-tile run.
    out_multi = jax.block_until_ready(
        surface_field_forward(x, w0, b0, w1, b1, w2, b2, tile_n=64))
    assert jnp.allclose(out_multi, out, atol=1e-5, rtol=1e-5), "tiling mismatch"

    # Density-only path (single_output).
    dens = jax.block_until_ready(
        surface_field_single_output(x, w0, b0, w1, b1, w2, b2))
    assert dens.shape == (N, 1)
    assert jnp.allclose(dens, ref[:, :1], atol=5e-2, rtol=5e-2), "density mismatch"

    print("KERNEL_OK")
</pallas_src>

<mosaic_0001>
module attributes {stable_mosaic.version = 11 : i64} {
  func.func @surface_field_kernel(%arg0: i32, %arg1: memref<200x3xf32, #tpu.memory_space<vmem>>, %arg2: memref<3x24xf32, #tpu.memory_space<vmem>>, %arg3: memref<1x24xf32, #tpu.memory_space<vmem>>, %arg4: memref<3x64xbf16, #tpu.memory_space<vmem>>, %arg5: memref<24x64xbf16, #tpu.memory_space<vmem>>, %arg6: memref<1x64xf32, #tpu.memory_space<vmem>>, %arg7: memref<64x64xbf16, #tpu.memory_space<vmem>>, %arg8: memref<1x64xf32, #tpu.memory_space<vmem>>, %arg9: memref<64x128xbf16, #tpu.memory_space<vmem>>, %arg10: memref<1x128xf32, #tpu.memory_space<vmem>>, %arg11: memref<200x128xf32, #tpu.memory_space<vmem>>) attributes {dimension_semantics = [#tpu.dimension_semantics<parallel>], iteration_bounds = array<i64: 1>, scalar_prefetch = 0 : i64, scratch_operands = 0 : i64, tpu.core_type = #tpu.core_type<tc>, window_params = [{transform_indices = @transform_0, window_bounds = array<i64: 200, 3>}, {pipeline_mode = #tpu.pipeline_mode<synchronous>, transform_indices = @transform_1, window_bounds = array<i64: 3, 24>}, {pipeline_mode = #tpu.pipeline_mode<synchronous>, transform_indices = @transform_2, window_bounds = array<i64: 1, 24>}, {pipeline_mode = #tpu.pipeline_mode<synchronous>, transform_indices = @transform_3, window_bounds = array<i64: 3, 64>}, {pipeline_mode = #tpu.pipeline_mode<synchronous>, transform_indices = @transform_4, window_bounds = array<i64: 24, 64>}, {pipeline_mode = #tpu.pipeline_mode<synchronous>, transform_indices = @transform_5, window_bounds = array<i64: 1, 64>}, {pipeline_mode = #tpu.pipeline_mode<synchronous>, transform_indices = @transform_6, window_bounds = array<i64: 64, 64>}, {pipeline_mode = #tpu.pipeline_mode<synchronous>, transform_indices = @transform_7, window_bounds = array<i64: 1, 64>}, {pipeline_mode = #tpu.pipeline_mode<synchronous>, transform_indices = @transform_8, window_bounds = array<i64: 64, 128>}, {pipeline_mode = #tpu.pipeline_mode<synchronous>, transform_indices = @transform_9, window_bounds = array<i64: 1, 128>}, {transform_indices = @transform_10, window_bounds = array<i64: 200, 128>}]} {
    %c0 = arith.constant 0 : index
    %c0_0 = arith.constant 0 : index
    %0 = vector.load %arg1[%c0, %c0_0] : memref<200x3xf32, #tpu.memory_space<vmem>>, vector<200x3xf32>
    %c0_1 = arith.constant 0 : index
    %c0_2 = arith.constant 0 : index
    %1 = vector.load %arg2[%c0_1, %c0_2] : memref<3x24xf32, #tpu.memory_space<vmem>>, vector<3x24xf32>
    %cst = arith.constant dense<0.000000e+00> : vector<200x24xf32>
    %2 = tpu.matmul %0, %1, %cst {dimension_numbers = #tpu.dot_dimension_numbers<[1], [0], [0], [1], [0, 0, 1, 1], [], []>} : vector<200x3xf32>, vector<3x24xf32>, vector<200x24xf32> -> vector<200x24xf32>
    %c0_3 = arith.constant 0 : index
    %c0_4 = arith.constant 0 : index
    %3 = vector.load %arg3[%c0_3, %c0_4] : memref<1x24xf32, #tpu.memory_space<vmem>>, vector<1x24xf32>
    %4 = vector.broadcast %3 : vector<1x24xf32> to vector<200x24xf32>
    %5 = arith.addf %2, %4 : vector<200x24xf32>
    %6 = math.sin %5 : vector<200x24xf32>
    %7 = arith.truncf %0 : vector<200x3xf32> to vector<200x3xbf16>
    %c0_5 = arith.constant 0 : index
    %c0_6 = arith.constant 0 : index
    %8 = vector.load %arg4[%c0_5, %c0_6] : memref<3x64xbf16, #tpu.memory_space<vmem>>, vector<3x64xbf16>
    %cst_7 = arith.constant dense<0.000000e+00> : vector<200x64xf32>
    %9 = tpu.matmul %7, %8, %cst_7 {dimension_numbers = #tpu.dot_dimension_numbers<[1], [0], [0], [1], [0, 0, 1, 1], [], []>} : vector<200x3xbf16>, vector<3x64xbf16>, vector<200x64xf32> -> vector<200x64xf32>
    %10 = arith.truncf %6 : vector<200x24xf32> to vector<200x24xbf16>
    %c0_8 = arith.constant 0 : index
    %c0_9 = arith.constant 0 : index
    %11 = vector.load %arg5[%c0_8, %c0_9] : memref<24x64xbf16, #tpu.memory_space<vmem>>, vector<24x64xbf16>
    %cst_10 = arith.constant dense<0.000000e+00> : vector<200x64xf32>
    %12 = tpu.matmul %10, %11, %cst_10 {dimension_numbers = #tpu.dot_dimension_numbers<[1], [0], [0], [1], [0, 0, 1, 1], [], []>} : vector<200x24xbf16>, vector<24x64xbf16>, vector<200x64xf32> -> vector<200x64xf32>
    %13 = arith.addf %9, %12 : vector<200x64xf32>
    %c0_11 = arith.constant 0 : index
    %c0_12 = arith.constant 0 : index
    %14 = vector.load %arg6[%c0_11, %c0_12] : memref<1x64xf32, #tpu.memory_space<vmem>>, vector<1x64xf32>
    %15 = vector.broadcast %14 : vector<1x64xf32> to vector<200x64xf32>
    %16 = arith.addf %13, %15 : vector<200x64xf32>
    %cst_13 = arith.constant 0.000000e+00 : f32
    %17 = vector.broadcast %cst_13 : f32 to vector<200x64xf32>
    %18 = arith.maximumf %16, %17 : vector<200x64xf32>
    %19 = arith.truncf %18 : vector<200x64xf32> to vector<200x64xbf16>
    %c0_14 = arith.constant 0 : index
    %c0_15 = arith.constant 0 : index
    %20 = vector.load %arg7[%c0_14, %c0_15] : memref<64x64xbf16, #tpu.memory_space<vmem>>, vector<64x64xbf16>
    %cst_16 = arith.constant dense<0.000000e+00> : vector<200x64xf32>
    %21 = tpu.matmul %19, %20, %cst_16 {dimension_numbers = #tpu.dot_dimension_numbers<[1], [0], [0], [1], [0, 0, 1, 1], [], []>} : vector<200x64xbf16>, vector<64x64xbf16>, vector<200x64xf32> -> vector<200x64xf32>
    %c0_17 = arith.constant 0 : index
    %c0_18 = arith.constant 0 : index
    %22 = vector.load %arg8[%c0_17, %c0_18] : memref<1x64xf32, #tpu.memory_space<vmem>>, vector<1x64xf32>
    %23 = vector.broadcast %22 : vector<1x64xf32> to vector<200x64xf32>
    %24 = arith.addf %21, %23 : vector<200x64xf32>
    %cst_19 = arith.constant 0.000000e+00 : f32
    %25 = vector.broadcast %cst_19 : f32 to vector<200x64xf32>
    %26 = arith.maximumf %24, %25 : vector<200x64xf32>
    %27 = arith.truncf %26 : vector<200x64xf32> to vector<200x64xbf16>
    %c0_20 = arith.constant 0 : index
    %c0_21 = arith.constant 0 : index
    %28 = vector.load %arg9[%c0_20, %c0_21] : memref<64x128xbf16, #tpu.memory_space<vmem>>, vector<64x128xbf16>
    %cst_22 = arith.constant dense<0.000000e+00> : vector<200x128xf32>
    %29 = tpu.matmul %27, %28, %cst_22 {dimension_numbers = #tpu.dot_dimension_numbers<[1], [0], [0], [1], [0, 0, 1, 1], [], []>} : vector<200x64xbf16>, vector<64x128xbf16>, vector<200x128xf32> -> vector<200x128xf32>
    %c0_23 = arith.constant 0 : index
    %c0_24 = arith.constant 0 : index
    %30 = vector.load %arg10[%c0_23, %c0_24] : memref<1x128xf32, #tpu.memory_space<vmem>>, vector<1x128xf32>
    %31 = vector.broadcast %30 : vector<1x128xf32> to vector<200x128xf32>
    %32 = arith.addf %29, %31 : vector<200x128xf32>
    %c0_25 = arith.constant 0 : index
    %c0_26 = arith.constant 0 : index
    %33 = vector.load %arg11[%c0_25, %c0_26] : memref<200x128xf32, #tpu.memory_space<vmem>>, vector<200x128xf32>
    tpu.vector_store %arg11[%c0_25, %c0_26], %32 {strides = array<i32>} : memref<200x128xf32, #tpu.memory_space<vmem>>, vector<200x128xf32>,
    return
  }
  func.func @transform_0(%arg0: i32) -> (i32, i32) {
    %c0_i32 = arith.constant 0 : i32
    %c0_i32_0 = arith.constant 0 : i32
    return %arg0, %c0_i32 : i32, i32
  }
  func.func @transform_1(%arg0: i32) -> (i32, i32) {
    %c0_i32 = arith.constant 0 : i32
    %c0_i32_0 = arith.constant 0 : i32
    %c0_i32_1 = arith.constant 0 : i32
    return %c0_i32, %c0_i32_0 : i32, i32
  }
  func.func @transform_2(%arg0: i32) -> (i32, i32) {
    %c0_i32 = arith.constant 0 : i32
    %c0_i32_0 = arith.constant 0 : i32
    %c0_i32_1 = arith.constant 0 : i32
    return %c0_i32, %c0_i32_0 : i32, i32
  }
  func.func @transform_3(%arg0: i32) -> (i32, i32) {
    %c0_i32 = arith.constant 0 : i32
    %c0_i32_0 = arith.constant 0 : i32
    %c0_i32_1 = arith.constant 0 : i32
    return %c0_i32, %c0_i32_0 : i32, i32
  }
  func.func @transform_4(%arg0: i32) -> (i32, i32) {
    %c0_i32 = arith.constant 0 : i32
    %c0_i32_0 = arith.constant 0 : i32
    %c0_i32_1 = arith.constant 0 : i32
    return %c0_i32, %c0_i32_0 : i32, i32
  }
  func.func @transform_5(%arg0: i32) -> (i32, i32) {
    %c0_i32 = arith.constant 0 : i32
    %c0_i32_0 = arith.constant 0 : i32
    %c0_i32_1 = arith.constant 0 : i32
    return %c0_i32, %c0_i32_0 : i32, i32
  }
  func.func @transform_6(%arg0: i32) -> (i32, i32) {
    %c0_i32 = arith.constant 0 : i32
    %c0_i32_0 = arith.constant 0 : i32
    %c0_i32_1 = arith.constant 0 : i32
    return %c0_i32, %c0_i32_0 : i32, i32
  }
  func.func @transform_7(%arg0: i32) -> (i32, i32) {
    %c0_i32 = arith.constant 0 : i32
    %c0_i32_0 = arith.constant 0 : i32
    %c0_i32_1 = arith.constant 0 : i32
    return %c0_i32, %c0_i32_0 : i32, i32
  }
  func.func @transform_8(%arg0: i32) -> (i32, i32) {
    %c0_i32 = arith.constant 0 : i32
    %c0_i32_0 = arith.constant 0 : i32
    %c0_i32_1 = arith.constant 0 : i32
    return %c0_i32, %c0_i32_0 : i32, i32
  }
  func.func @transform_9(%arg0: i32) -> (i32, i32) {
    %c0_i32 = arith.constant 0 : i32
    %c0_i32_0 = arith.constant 0 : i32
    %c0_i32_1 = arith.constant 0 : i32
    return %c0_i32, %c0_i32_0 : i32, i32
  }
  func.func @transform_10(%arg0: i32) -> (i32, i32) {
    %c0_i32 = arith.constant 0 : i32
    %c0_i32_0 = arith.constant 0 : i32
    return %arg0, %c0_i32 : i32, i32
  }
}

</mosaic_0001>

<bundles_post_ra>
// kernel: _surface_field_impl.1
= control target key start
LH: loop header
LB: loop body
LE: loop exit
PB: predicated region body
PF: predicated region fallthrough
CT: control target
= control target key end

     0   :  { %vm145_vm0 = vcmask 1042432   ;;  %v8456_v0 = vmov 0.0   ;;  %vm69_vm1 = vcmask 23552   ;;  %vm4719_vm2 = vmmov 0   ;;  %s8445_s1 = inlined_call_operand.vmem [shape: f32[3,24], index: 1, kind: input, shape index: {}]   ;;  %s8446_s0 = inlined_call_operand.vmem [shape: f32[200,3], index: 0, kind: input, shape index: {}]   ;;  %s8447_s2 = inlined_call_operand.vmem [shape: f32[1,24], index: 2, kind: input, shape index: {}]   ;;  %s8448_s4 = inlined_call_operand.vmem [shape: bf16[24,64], index: 4, kind: input, shape index: {}]   ;;  %s8449_s3 = inlined_call_operand.vmem [shape: bf16[3,64], index: 3, kind: input, shape index: {}]   ;;  %s8450_s6 = inlined_call_operand.vmem [shape: bf16[64,64], index: 6, kind: input, shape index: {}]   ;;  %s8451_s5 = inlined_call_operand.vmem [shape: f32[1,64], index: 5, kind: input, shape index: {}]   ;;  %s8452_s8 = inlined_call_operand.vmem [shape: bf16[64,128], index: 8, kind: input, shape index: {}]   ;;  %s8453_s7 = inlined_call_operand.vmem [shape: f32[1,64], index: 7, kind: input, shape index: {}]   ;;  %s8454_s9 = inlined_call_operand.vmem [shape: f32[1,128], index: 9, kind: input, shape index: {}]   ;;  %s8455_s10 = inlined_call_operand.vmem [shape: f32[200,128], index: 10, kind: output, shape index: {}]  }
   0x1   :  { %4187 = vmatprep.subr.mxu0 %v8456_v0  ;;  %4494 = vmatprep.subr.mxu1 %v8456_v0  ;;  %v61_v1 = vld [vmem:[%s8445_s1] sm:$0x7]  ;;  %v4795_v3 = vld [vmem:[%s8446_s0 + $0x68] sm:$0xff]  ;;  %v4805_v5 = vld [vmem:[%s8446_s0 + $0x70] sm:$0xff]  ;;  %v8459_v29 = vmov 2131351028  }
   0x2   :  { %v4790_v2 = vld [vmem:[%s8446_s0] sm:$0xff]  ;;  %8579 = vst [vmem:[#allocation3_spill] sm:$0xff] %v4795_v3  ;;  %4188 = vmatpush3.msk.msra.mxu0 %vm145_vm0, %v61_v1  ;;  %4495 = vmatpush3.msk.msra.mxu1 %vm145_vm0, %v61_v1  ;;  %v4800_v4 = vld [vmem:[%s8446_s0 + $0x8] sm:$0xff]  ;;  %8581 = vst [vmem:[#allocation5_spill] sm:$0xff] %v4805_v5  ;;  %v8468_v35 = vmov 1326507024  }
   0x3   :  { %8578 = vst [vmem:[#allocation2_spill] sm:$0xff] %v4790_v2  ;;  %8580 = vst [vmem:[#allocation4_spill] sm:$0xff] %v4800_v4  ;;  %v4810_v6 = vld [vmem:[%s8446_s0 + $0x10] sm:$0xff]  ;;  %4189 = vmatprep.mubr.msk.f32.mxu0 %vm4719_vm2, %v8456_v0  ;;  %4228 = vmatprep.mubr.msk.f32.mxu1 %vm4719_vm2, %v8456_v0  ;;  %v4821_v8 = vld [vmem:[%s8446_s0 + $0x78] sm:$0xff] }
   0x4   :  { %8582 = vst [vmem:[#allocation6_spill] sm:$0xff] %v4810_v6  ;;  %8583 = vst [vmem:[#allocation7_spill] sm:$0xff] %v4821_v8  ;;  %v4826_v9 = vld [vmem:[%s8446_s0 + $0x18] sm:$0xff]  ;;  %v4831_v10 = vld [vmem:[%s8446_s0 + $0x80] sm:$0xff]  ;;  %4190 = vmatmul.mubr.msk.f32.vlgmr.msra.gmra.mrb[0].mxu0 %vm69_vm1, %v4790_v2  ;;  %4229 = vmatmul.mubr.msk.f32.vlgmr.msra.gmra.mrb[0].mxu1 %vm69_vm1, %v4795_v3 }
   0x5   :  { %8584 = vst [vmem:[#allocation8_spill] sm:$0xff] %v4826_v9  ;;  %8585 = vst [vmem:[#allocation9_spill] sm:$0xff] %v4831_v10  ;;  %v4844_v13 = vld [vmem:[%s8446_s0 + $0x20] sm:$0xff]  ;;  %v4849_v14 = vld [vmem:[%s8446_s0 + $0x88] sm:$0xff]  ;;  %4192 = vmatprep.mubr.msk.f32.mxu0 %vm4719_vm2, %v8456_v0  ;;  %4231 = vmatprep.mubr.msk.f32.mxu1 %vm4719_vm2, %v8456_v0 }
   0x6   :  { %8586 = vst [vmem:[#allocation10_spill] sm:$0xff] %v4844_v13  ;;  %8587 = vst [vmem:[#allocation11_spill] sm:$0xff] %v4849_v14  ;;  %v4854_v15 = vld [vmem:[%s8446_s0 + $0x28] sm:$0xff]  ;;  %v4867_v18 = vld [vmem:[%s8446_s0 + $0x90] sm:$0xff]  ;;  %4320 = vmatprep.subr.bf16.mxu0 %v8456_v0  ;;  %4264 = vmatprep.subr.bf16.mxu1 %v8456_v0 }
   0x7   :  { %8588 = vst [vmem:[#allocation12_spill] sm:$0xff] %v4854_v15  ;;  %8589 = vst [vmem:[#allocation13_spill] sm:$0xff] %v4867_v18  ;;  %v4872_v19 = vld [vmem:[%s8446_s0 + $0x30] sm:$0xff]  ;;  %v4877_v20 = vld [vmem:[%s8446_s0 + $0x98] sm:$0xff] }
   0x8   :  { %8590 = vst [vmem:[#allocation14_spill] sm:$0xff] %v4872_v19  ;;  %8591 = vst [vmem:[#allocation15_spill] sm:$0xff] %v4877_v20  ;;  %v4884_v22 = vld [vmem:[%s8446_s0 + $0x38] sm:$0xff]  ;;  %v4889_v23 = vld [vmem:[%s8446_s0 + $0xa0] sm:$0xff]  ;;  %4193 = vmatmul.mubr.msk.f32.gmra.mrb[2].mxu0 %vm69_vm1, %v4800_v4  ;;  %4232 = vmatmul.mubr.msk.f32.gmra.mrb[2].mxu1 %vm69_vm1, %v4805_v5 }
   0x9   :  { %8592 = vst [vmem:[#allocation16_spill] sm:$0xff] %v4884_v22  ;;  %8593 = vst [vmem:[#allocation17_spill] sm:$0xff] %v4889_v23  ;;  %v4894_v24 = vld [vmem:[%s8446_s0 + $0x40] sm:$0xff]  ;;  %v4903_v26 = vld [vmem:[%s8446_s0 + $0xa8] sm:$0xff]  ;;  %4195 = vmatprep.mubr.msk.f32.mxu0 %vm4719_vm2, %v8456_v0  ;;  %4234 = vmatprep.mubr.msk.f32.mxu1 %vm4719_vm2, %v8456_v0 }
   0xa   :  { %8594 = vst [vmem:[#allocation18_spill] sm:$0xff] %v4894_v24  ;;  %8595 = vst [vmem:[#allocation19_spill] sm:$0xff] %v4903_v26  ;;  %v4908_v27 = vld [vmem:[%s8446_s0 + $0x48] sm:$0xff]  ;;  %v4913_v28 = vld [vmem:[%s8446_s0 + $0xb0] sm:$0xff] }
   0xb   :  { %8596 = vst [vmem:[#allocation20_spill] sm:$0xff] %v4908_v27  ;;  %8597 = vst [vmem:[#allocation21_spill] sm:$0xff] %v4913_v28  ;;  %v4926_v31 = vld [vmem:[%s8446_s0 + $0x50] sm:$0xff]  ;;  %v4931_v32 = vld [vmem:[%s8446_s0 + $0xb8] sm:$0xff] }
   0xc   :  { %8598 = vst [vmem:[#allocation22_spill] sm:$0xff] %v4926_v31  ;;  %8599 = vst [vmem:[#allocation23_spill] sm:$0xff] %v4931_v32  ;;  %v4936_v33 = vld [vmem:[%s8446_s0 + $0x58] sm:$0xff]  ;;  %v4949_v36 = vld [vmem:[%s8446_s0 + $0x60] sm:$0xff]  ;;  %4196 = vmatmul.mubr.msk.f32.gmra.mrb[4].mxu0 %vm69_vm1, %v4810_v6  ;;  %4235 = vmatmul.mubr.msk.f32.gmra.mrb[4].mxu1 %vm69_vm1, %v4821_v8 }
   0xd   :  { %8600 = vst [vmem:[#allocation24_spill] sm:$0xff] %v4936_v33  ;;  %8601 = vst [vmem:[#allocation25_spill] sm:$0xff] %v4949_v36  ;;  %4198 = vmatprep.mubr.msk.f32.mxu0 %vm4719_vm2, %v8456_v0  ;;  %4237 = vmatprep.mubr.msk.f32.mxu1 %vm4719_vm2, %v8456_v0  ;;  %v5028_v38 = vld [vmem:[%s8446_s0 + $0xc0] sm:$0xff] }
   0xe   :  { %8602 = vst [vmem:[#allocation26_spill] sm:$0xff] %v5028_v38  ;;  %v5045_v39 = vld [vmem:[%s8447_s2] ss:$0 sm:$0xff] }
  0x10   :  { %4199 = vmatmul.mubr.msk.f32.gmra.mrb[6].mxu0 %vm69_vm1, %v4826_v9  ;;  %4238 = vmatmul.mubr.msk.f32.gmra.mrb[6].mxu1 %vm69_vm1, %v4831_v10 }
  0x11   :  { %4201 = vmatprep.mubr.msk.f32.mxu0 %vm4719_vm2, %v8456_v0  ;;  %4240 = vmatprep.mubr.msk.f32.mxu1 %vm4719_vm2, %v8456_v0 }
  0x14   :  { %4202 = vmatmul.mubr.msk.f32.gmra.mrb[8].mxu0 %vm69_vm1, %v4844_v13  ;;  %4241 = vmatmul.mubr.msk.f32.gmra.mrb[8].mxu1 %vm69_vm1, %v4849_v14 }
  0x15   :  { %4204 = vmatprep.mubr.msk.f32.mxu0 %vm4719_vm2, %v8456_v0  ;;  %4243 = vmatprep.mubr.msk.f32.mxu1 %vm4719_vm2, %v8456_v0 }
  0x18   :  { %4205 = vmatmul.mubr.msk.f32.gmra.mrb[10].mxu0 %vm69_vm1, %v4854_v15  ;;  %4244 = vmatmul.mubr.msk.f32.gmra.mrb[10].mxu1 %vm69_vm1, %v4867_v18 }
  0x19   :  { %4207 = vmatprep.mubr.msk.f32.mxu0 %vm4719_vm2, %v8456_v0  ;;  %4246 = vmatprep.mubr.msk.f32.mxu1 %vm4719_vm2, %v8456_v0 }
  0x1c   :  { %4208 = vmatmul.mubr.msk.f32.gmra.mrb[12].mxu0 %vm69_vm1, %v4872_v19  ;;  %4247 = vmatmul.mubr.msk.f32.gmra.mrb[12].mxu1 %vm69_vm1, %v4877_v20 }
  0x1d   :  { %4210 = vmatprep.mubr.msk.f32.mxu0 %vm4719_vm2, %v8456_v0  ;;  %4249 = vmatprep.mubr.msk.f32.mxu1 %vm4719_vm2, %v8456_v0 }
  0x20   :  { %4211 = vmatmul.mubr.msk.f32.gmra.mrb[14].mxu0 %vm69_vm1, %v4884_v22  ;;  %4250 = vmatmul.mubr.msk.f32.gmra.mrb[14].mxu1 %vm69_vm1, %v4889_v23 }
  0x21   :  { %4213 = vmatprep.mubr.msk.f32.mxu0 %vm4719_vm2, %v8456_v0  ;;  %4252 = vmatprep.mubr.msk.f32.mxu1 %vm4719_vm2, %v8456_v0 }
  0x24   :  { %4214 = vmatmul.mubr.msk.f32.gmra.mrb[16].mxu0 %vm69_vm1, %v4894_v24  ;;  %4253 = vmatmul.mubr.msk.f32.gmra.mrb[16].mxu1 %vm69_vm1, %v4903_v26 }
  0x25   :  { %4216 = vmatprep.mubr.msk.f32.mxu0 %vm4719_vm2, %v8456_v0  ;;  %4255 = vmatprep.mubr.msk.f32.mxu1 %vm4719_vm2, %v8456_v0 }
  0x28   :  { %4217 = vmatmul.mubr.msk.f32.gmra.mrb[18].mxu0 %vm69_vm1, %v4908_v27  ;;  %4256 = vmatmul.mubr.msk.f32.gmra.mrb[18].mxu1 %vm69_vm1, %v4913_v28 }
  0x29   :  { %4219 = vmatprep.mubr.msk.f32.mxu0 %vm4719_vm2, %v8456_v0  ;;  %4258 = vmatprep.mubr.msk.f32.mxu1 %vm4719_vm2, %v8456_v0 }
  0x2c   :  { %4220 = vmatmul.mubr.msk.f32.gmra.mrb[20].mxu0 %vm69_vm1, %v4926_v31  ;;  %4259 = vmatmul.mubr.msk.f32.gmra.mrb[20].mxu1 %vm69_vm1, %v4931_v32 }
  0x2d   :  { %4222 = vmatprep.mubr.msk.f32.mxu0 %vm4719_vm2, %v8456_v0  ;;  %4261 = vmatprep.mubr.msk.f32.mxu1 %vm4719_vm2, %v8456_v0 }
  0x30   :  { %4223 = vmatmul.mubr.msk.f32.gmra.mrb[22].mxu0 %vm69_vm1, %v4936_v33  ;;  %4262 = vmatmul.mubr.msk.f32.gmra.mrb[22].mxu1 %vm69_vm1, %v5028_v38 }
  0x31   :  { %4225 = vmatprep.mubr.msk.f32.mxu0 %vm4719_vm2, %v8456_v0  ;;  %4268 = vmatprep.mubr.msk.bf16.mxu1 %vm4719_vm2, %v8456_v0 }
  0x34   :  { %4226 = vmatmul.mubr.msk.f32.gmra.mrb[24].mxu0 %vm69_vm1, %v4949_v36 }
  0x35   :  { %4322 = vmatprep.mubr.msk.bf16.mxu0 %vm4719_vm2, %v8456_v0 }
  0xd7   :  { %v215_v40 = vpop.f32.mrb[0].mxu0  ;;  %v280_v41 = vpop.f32.mrb[0].mxu1 }
  0xd8   :  { %v5048_v42 = vadd.f32 %v5045_v39, %v215_v40  ;;  %v5051_v43 = vadd.f32 %v5045_v39, %v280_v41  ;;  %v4191_v44 = vpop.f32.mrb[1].mxu0  ;;  %v4230_v45 = vpop.f32.mrb[1].mxu1 }
  0xda   :  { %8603 = vst [vmem:[#allocation27_spill] sm:$0xff] %v5051_v43  ;;  %v8458_v46 = vand.u32 2147483647, %v5048_v42  ;;  %v342_v47 = vand.u32 2139095040, %v5048_v42  ;;  %v1694_v48 = vand.u32 2139095040, %v5051_v43 }
  0xdb   :  { %v220_v49 = vpop.f32.mrb[2].mxu0  ;;  %v5056_v50 = vpop.f32.mrb[2].mxu1 }
  0xdc   :  { %v343_v51 = vshrl.u32 %v342_v47, 23  ;;  %v4194_v52 = vpop.f32.mrb[3].mxu0  ;;  %v1695_v53 = vshrl.u32 %v1694_v48, 23  ;;  %v4233_v54 = vpop.f32.mrb[3].mxu1  ;;  %v346_v56 = vand.u32 8388607, %v8458_v46  ;;  %v5065_v1 = vadd.f32 %v5045_v39, %v220_v49 }
  0xdd   :  { %v8471_v49 = vmov 683565275  }
  0xde   :  { %v3933_v55 = vadd.s32 4294967169, %v343_v51  ;;  %v3985_v57 = vadd.s32 4294967169, %v1695_v53  ;;  %v347_v63 = vor.u32 8388608, %v346_v56 }
  0xdf   :  { %v5060_v58 = vpop.f32.mrb[4].mxu0  ;;  %v5062_v59 = vpop.f32.mrb[4].mxu1 }
  0xe0   :  { %v349_v60 = vadd.s32 1, %v3933_v55  ;;  %v1701_v61 = vadd.s32 1, %v3985_v57  ;;  %v4197_v62 = vpop.f32.mrb[5].mxu0  ;;  %v4236_v40 = vpop.f32.mrb[5].mxu1  ;;  %v5071_v53 = vshll.u32 %v347_v63, 8  ;;  %v446_v55 = vand.u32 2139095040, %v5065_v1 }
  0xe2   :  { %vm350_vm3 = vcmp.gt.s32.totalorder %v349_v60, 0  ;;  %vm1702_vm4 = vcmp.gt.s32.totalorder %v1701_v61, 0  ;;  %v447_v12 = vshrl.u32 %v446_v55, 23 }
  0xe3   :  { %v351_v41 = vsel %vm350_vm3, %v349_v60, 0  ;;  %v5067_v44 = vpop.f32.mrb[6].mxu0  ;;  %v5069_v47 = vpop.f32.mrb[6].mxu1  ;;  %v8461_v60 = vmov 2475754826   ;;  %v1703_v40 = vsel %vm1702_vm4, %v1701_v61, 0 }
  0xe4   :  { %v353_v45 = vand.u32 31, %v351_v41  ;;  %v4200_v48 = vpop.f32.mrb[7].mxu0  ;;  %v4239_v51 = vpop.f32.mrb[7].mxu1  ;;  %v352_v56 = vshrl.u32 %v351_v41, 5  ;;  %v8466_v41 = vmov 920167782  }
  0xe5   :  { %v8463_v51 = vmov 2102212464  }
  0xe6   :  { %v354_v52 = vsub.s32 32, %v353_v45  ;;  %v356_v57 = vshll.u32 %v8471_v49, %v353_v45  ;;  %v359_v62 = vshll.u32 %v8461_v60, %v353_v45  ;;  %v362_v63 = vshll.u32 %v8459_v29, %v353_v45 }
  0xe7   :  { %v365_v16 = vshll.u32 %v8463_v51, %v353_v45  ;;  %v368_v37 = vshll.u32 %v8466_v41, %v353_v45  ;;  %vm371_vm5 = vcmp.lt.s32.totalorder %v352_v56, 1  ;;  %vm374_vm6 = vcmp.lt.s32.totalorder %v352_v56, 4  ;;  %v5185_v31 = vpop.f32.mrb[8].mxu1 }
  0xe8   :  { %v357_v34 = vshrl.u32 %v8461_v60, %v354_v52  ;;  %v360_v48 = vshrl.u32 %v8459_v29, %v354_v52  ;;  %v363_v21 = vshrl.u32 %v8463_v51, %v354_v52  ;;  %v366_v11 = vshrl.u32 %v8466_v41, %v354_v52 }
  0xe9   :  { %v369_v61 = vshrl.u32 %v8468_v35, %v354_v52  ;;  %v1705_v51 = vand.u32 31, %v1703_v40  ;;  %v355_v54 = vshrl.u32 %v8471_v49, %v354_v52  ;;  %vm373_vm7 = vcmp.lt.s32.totalorder %v352_v56, 3 }
  0xea   :  { %v358_v30 = vor.u32 %v357_v34, %v356_v57  ;;  %v361_v25 = vor.u32 %v360_v48, %v359_v62  ;;  %v364_v17 = vor.u32 %v363_v21, %v362_v63  ;;  %v367_v7 = vor.u32 %v366_v11, %v365_v16  ;;  %v5086_v57 = vpop.f32.mrb[8].mxu0 }
  0xeb   :  { %v370_v0 = vor.u32 %v369_v61, %v368_v37  ;;  %vm372_vm8 = vcmp.lt.s32.totalorder %v352_v56, 2  ;;  %v3937_v34 = vadd.s32 4294967169, %v447_v12  ;;  %v4203_v55 = vpop.f32.mrb[9].mxu0  ;;  %v8604_v12 = vand.u32 2147483647, %v5051_v43 }
  0xec   :  { %v376_v46 = vsel %vm374_vm6, %v364_v17, 2102212464  ;;  %v379_v29 = vsel %vm371_vm5, %v358_v30, %v361_v25  ;;  %v383_v60 = vsel %vm371_vm5, %v361_v25, %v364_v17  ;;  %v380_v28 = vsel %vm374_vm6, %v367_v7, 920167782 }
  0xed   :  { %v384_v45 = vsel %vm374_vm6, %v370_v0, 1326507024  ;;  %v381_v41 = vsel %vm373_vm7, %v364_v17, %v380_v28  ;;  %v375_v21 = vsel %vm371_vm5, %v355_v54, %v358_v30  ;;  %v377_v11 = vsel %vm373_vm7, %v361_v25, %v376_v46 }
  0xee   :  { %v385_v35 = vsel %vm373_vm7, %v367_v7, %v384_v45  ;;  %v382_v16 = vsel %vm372_vm8, %v379_v29, %v381_v41  ;;  %v1706_v0 = vsub.s32 32, %v1705_v51  ;;  %v8470_v17 = vand.u32 2147483647, %v5065_v1 }
  0xef   :  { %v386_v37 = vsel %vm372_vm8, %v383_v60, %v385_v35  ;;  %v5093_v52 = vmul.u32.u64.low %v5071_v53, %v382_v16  ;;  %v5094_v63 = vmul.u32.u64.high %v5071_v53, %v382_v16, %v5093_v52  ;;  %v378_v7 = vsel %vm372_vm8, %v375_v21, %v377_v11 }
  0xf0   :  { %v5089_v62 = vmul.u32.u64.low %v5071_v53, %v386_v37  ;;  %v5090_v48 = vmul.u32.u64.high %v5071_v53, %v386_v37, %v5089_v62  ;;  %v1698_v28 = vand.u32 8388607, %v8604_v12  ;;  %v453_v29 = vadd.s32 1, %v3937_v34 }
  0xf1   :  { %v397_v25 = vadd.s32 1, %v5094_v63  ;;  %v5103_v30 = vadd.f32 %v5045_v39, %v5056_v50  ;;  %v394_v35 = vmul.u32 %v5071_v53, %v378_v7  ;;  %v8606_v46 = vmov 2102212464  }
  0xf2   :  { %vm396_vm9 = vc.u32 %v5090_v48, %v5093_v52  ;;  %v1717_v54 = vshll.u32 %v8606_v46, %v1705_v51  ;;  %v8607_v56 = vmov 920167782   ;;  %v450_v41 = vand.u32 8388607, %v8470_v17 }
  0xf3   :  { %8605 = vst [vmem:[#allocation28_spill] sm:$0xff] %v5103_v30  ;;  %v1718_v60 = vshrl.u32 %v8607_v56, %v1706_v0  ;;  %v398_v61 = vsel %vm396_vm9, %v397_v25, %v5094_v63  ;;  %v5111_v45 = vshrl.u32 %v1703_v40, 5  ;;  %v1708_v21 = vshll.u32 %v8471_v49, %v1705_v51 }
  0xf4   :  { %v8608_v34 = vmov 2475754826   ;;  %v399_v16 = vadd.s32 %v398_v61, %v394_v35  ;;  %v1720_v53 = vshll.u32 %v8607_v56, %v1705_v51  ;;  %v8609_v37 = vmov 1326507024  }
  0xf5   :  { %v1711_v11 = vshll.u32 %v8608_v34, %v1705_v51  ;;  %v1709_v50 = vshrl.u32 %v8608_v34, %v1706_v0  ;;  %v1721_v55 = vshrl.u32 %v8609_v37, %v1706_v0  ;;  %v8610_v62 = vmov 2131351028  }
  0xf6   :  { %v1712_v7 = vshrl.u32 %v8610_v62, %v1706_v0  ;;  %v1714_v12 = vshll.u32 %v8610_v62, %v1705_v51  ;;  %v1715_v17 = vshrl.u32 %v8606_v46, %v1706_v0  ;;  %vm454_vm10 = vcmp.gt.s32.totalorder %v453_v29, 0 }
  0xf7   :  { %v400_v40 = vadd.s32 536870912, %v399_v16  ;;  %v1719_v63 = vor.u32 %v1718_v60, %v1717_v54  ;;  %v1699_v25 = vor.u32 8388608, %v1698_v28  ;;  %vm1726_vm11 = vcmp.lt.s32.totalorder %v5111_v45, 4 }
  0xf8   :  { %v455_v49 = vsel %vm454_vm10, %v453_v29, 0  ;;  %v1722_v61 = vor.u32 %v1721_v55, %v1720_v53  ;;  %v451_v32 = vor.u32 8388608, %v450_v41  ;;  %v1710_v26 = vor.u32 %v1709_v50, %v1708_v21 }
  0xf9   :  { %v5122_v35 = vshrl.u32 %v400_v40, 30  ;;  %v457_v23 = vand.u32 31, %v455_v49  ;;  %v5124_v18 = vor.u32 %v1712_v7, %v1711_v11  ;;  %v1716_v20 = vor.u32 %v1715_v17, %v1714_v12 }
  0xfa   :  { %v1798_v51 = vand.u32 2139095040, %v5103_v30  ;;  %vm1723_vm12 = vcmp.lt.s32.totalorder %v5111_v45, 1  ;;  %vm1725_vm13 = vcmp.lt.s32.totalorder %v5111_v45, 3  ;;  %v1732_v28 = vsel %vm1726_vm11, %v1719_v63, 920167782 }
  0xfb   :  { %v402_v10 = vshll.u32 %v5122_v35, 30  ;;  %v5132_v29 = vsub.s32 32, %v457_v23  ;;  %v8611_v60 = vmov 683565275   ;;  %v1736_v17 = vsel %vm1726_vm11, %v1722_v61, 1326507024 }
  0xfc   :  { %v1707_v41 = vshrl.u32 %v8611_v60, %v1706_v0  ;;  %vm1724_vm14 = vcmp.lt.s32.totalorder %v5111_v45, 2  ;;  %v1731_v21 = vsel %vm1723_vm12, %v1710_v26, %v5124_v18  ;;  %v1733_v11 = vsel %vm1725_vm13, %v1716_v20, %v1732_v28 }
  0xfd   :  { %v5134_v54 = vsub.s32 %v399_v16, %v402_v10  ;;  %v5145_v50 = vshll.u32 %v1699_v25, 8  ;;  %v395_v53 = vadd.s32 %v5093_v52, %v5090_v48  ;;  %v5149_v16 = vshll.u32 %v451_v32, 8 }
  0xfe   :  { %v1799_v0 = vshrl.u32 %v1798_v51, 23  ;;  %v1735_v55 = vsel %vm1723_vm12, %v5124_v18, %v1716_v20  ;;  %v1737_v7 = vsel %vm1725_vm13, %v1719_v63, %v1736_v17  ;;  %v461_v12 = vshrl.u32 %v8608_v34, %v5132_v29 }
  0xff   :  { %v405_v10 = vsub.s32 0, %v5134_v54  ;;  %v464_v40 = vshrl.u32 %v8610_v62, %v5132_v29  ;;  %v1727_v32 = vsel %vm1723_vm12, %v1707_v41, %v1710_v26  ;;  %v1734_v52 = vsel %vm1724_vm14, %v1731_v21, %v1733_v11 }
 0x100   :  { %v470_v25 = vshrl.u32 %v8607_v56, %v5132_v29  ;;  %v460_v61 = vshll.u32 %v8611_v60, %v457_v23  ;;  %v463_v63 = vshll.u32 %v8608_v34, %v457_v23  ;;  %v467_v51 = vshrl.u32 %v8606_v46, %v5132_v29 }
 0x101   :  { %v3934_v48 = vmin.u32 %v405_v10, %v5134_v54  ;;  %v473_v28 = vshrl.u32 %v8609_v37, %v5132_v29  ;;  %v1738_v26 = vsel %vm1724_vm14, %v1735_v55, %v1737_v7  ;;  %v5175_v41 = vshrl.u32 %v455_v49, 5 }
 0x102   :  { %v469_v21 = vshll.u32 %v8606_v46, %v457_v23  ;;  %v462_v11 = vor.u32 %v461_v12, %v460_v61  ;;  %v465_v10 = vor.u32 %v464_v40, %v463_v63  ;;  %v466_v14 = vshll.u32 %v8610_v62, %v457_v23  ;;  %v4242_v40 = vpop.f32.mrb[9].mxu1 }
 0x103   :  { %v407_v17 = vclz %v3934_v48  ;;  %v472_v5 = vshll.u32 %v8607_v56, %v457_v23  ;;  %v5181_v36 = vmul.u32.u64.low %v5145_v50, %v1734_v52  ;;  %v5182_v3 = vmul.u32.u64.high %v5145_v50, %v1734_v52, %v5181_v36 }
 0x104   :  { %v471_v48 = vor.u32 %v470_v25, %v469_v21  ;;  %v5188_v49 = vmul.u32.u64.low %v5145_v50, %v1738_v26  ;;  %v5189_v55 = vmul.u32.u64.high %v5145_v50, %v1738_v26, %v5188_v49  ;;  %v468_v7 = vor.u32 %v467_v51, %v466_v14 }
 0x105   :  { %v3935_v8 = vadd.s32 4294967294, %v407_v17  ;;  %v474_v12 = vor.u32 %v473_v28, %v472_v5  ;;  %v1728_v23 = vsel %vm1726_vm11, %v1716_v20, 2102212464  ;;  %vm475_vm0 = vcmp.lt.s32.totalorder %v5175_v41, 1 }
 0x106   :  { %v3989_v61 = vadd.s32 4294967169, %v1799_v0  ;;  %vm476_vm3 = vcmp.lt.s32.totalorder %v5175_v41, 2  ;;  %vm478_vm4 = vcmp.lt.s32.totalorder %v5175_v41, 4  ;;  %v483_v25 = vsel %vm475_vm0, %v462_v11, %v465_v10 }
 0x107   :  { %vm3936_vm15 = vcmp.lt.s32.totalorder %v3935_v8, 0  ;;  %vm477_vm5 = vcmp.lt.s32.totalorder %v5175_v41, 3  ;;  %v484_v5 = vsel %vm478_vm4, %v471_v48, 920167782  ;;  %v488_v0 = vsel %vm478_vm4, %v474_v12, 1326507024 }
 0x108   :  { %v410_v52 = vsel %vm3936_vm15, 0, %v3935_v8  ;;  %v485_v20 = vsel %vm477_vm5, %v468_v7, %v484_v5  ;;  %v487_v8 = vsel %vm475_vm0, %v465_v10, %v468_v7  ;;  %v489_v21 = vsel %vm477_vm5, %v471_v48, %v488_v0 }
 0x109   :  { %v411_v63 = vsub.s32 32, %v410_v52  ;;  %v415_v17 = vsub.s32 4294967266, %v410_v52  ;;  %v412_v14 = vshll.u32 %v5134_v54, %v410_v52  ;;  %v486_v26 = vsel %vm476_vm3, %v483_v25, %v485_v20 }
 0x10a   :  { %v1729_v54 = vsel %vm1725_vm13, %v5124_v18, %v1728_v23  ;;  %v490_v49 = vsel %vm476_vm3, %v487_v8, %v489_v21  ;;  %v5218_v40 = vmul.u32.u64.low %v5149_v16, %v486_v26  ;;  %v5219_v52 = vmul.u32.u64.high %v5149_v16, %v486_v26, %v5218_v40 }
 0x10b   :  { %v413_v51 = vshrl.u32 %v395_v53, %v411_v63  ;;  %v416_v28 = vadd.s32 127, %v415_v17  ;;  %v5223_v63 = vmul.u32.u64.low %v5149_v16, %v490_v49  ;;  %v5224_v25 = vmul.u32.u64.high %v5149_v16, %v490_v49, %v5223_v63 }
 0x10c   :  { %v1805_v17 = vadd.s32 1, %v3989_v61  ;;  %v1730_v5 = vsel %vm1724_vm14, %v1727_v32, %v1729_v54  ;;  %v1749_v18 = vadd.s32 1, %v5182_v3  ;;  %v480_v23 = vsel %vm478_vm4, %v468_v7, 2102212464 }
 0x10d   :  { %v414_v53 = vor.u32 %v413_v51, %v412_v14  ;;  %v417_v12 = vshll.u32 %v416_v28, 23  ;;  %v425_v20 = vsub.s32 4, %v5122_v35  ;;  %vm1748_vm6 = vc.u32 %v5189_v55, %v5181_v36 }
 0x10e   :  { %v459_v14 = vshrl.u32 %v8611_v60, %v5132_v29  ;;  %vm1806_vm7 = vcmp.gt.s32.totalorder %v1805_v17, 0  ;;  %vm341_vm8 = vcmp.lt.s32.totalorder %v5048_v42, 0  ;;  %v1746_v45 = vmul.u32 %v5145_v50, %v1730_v5  ;;  %v5256_v5 = vpop.f32.mrb[10].mxu0 }
 0x10f   :  { %v418_v48 = vor.u32 4788187, %v417_v12  ;;  %v421_v61 = vcvt.s32.f32 %v414_v53  ;;  %v481_v7 = vsel %vm477_vm5, %v465_v10, %v480_v23  ;;  %v1750_v51 = vsel %vm1748_vm6, %v1749_v18, %v5182_v3  ;;  %v4206_v18 = vpop.f32.mrb[11].mxu0 }
 0x110   :  { %v479_v32 = vsel %vm475_vm0, %v459_v14, %v462_v11  ;;  %v501_v28 = vadd.s32 1, %v5219_v52  ;;  %v1807_v26 = vsel %vm1806_vm7, %v1805_v17, 0  ;;  %v426_v29 = vsel %vm341_vm8, %v425_v20, %v5122_v35 }
 0x111   :  { %v419_v8 = vand.u32 2147483647, %v418_v48  ;;  %vm500_vm9 = vc.u32 %v5224_v25, %v5218_v40  ;;  %v482_v50 = vsel %vm476_vm3, %v479_v32, %v481_v7  ;;  %v1809_v54 = vand.u32 31, %v1807_v26 }
 0x112   :  { %v8612_v11 = vand.u32 2147483647, %v5048_v42  ;;  %v1751_v10 = vadd.s32 %v1750_v51, %v1746_v45  ;;  %v502_v3 = vsel %vm500_vm9, %v501_v28, %v5219_v52  ;;  %v498_v35 = vmul.u32 %v5149_v16, %v482_v50 }
 0x113   :  { %v422_v0 = vmul.f32 %v421_v61, %v419_v8  ;;  %v5254_v63 = vsub.s32 32, %v1809_v54  ;;  %v8485_v23 = vand.u32 2147483647, %v5103_v30  ;;  %v1821_v20 = vshll.u32 %v8606_v46, %v1809_v54 }
 0x114   :  { %vm340_vm10 = vcmp.le.f32.partialorder %v8612_v11, 0.7853982  ;;  %v1752_v41 = vadd.s32 536870912, %v1751_v10  ;;  %v503_v48 = vadd.s32 %v502_v3, %v498_v35  ;;  %v5264_v16 = vadd.f32 %v5045_v39, %v5060_v58 }
 0x115   :  { %v423_v21 = vxor.u32 2147483648, %v422_v0  ;;  %v428_v53 = vsel %vm340_vm10, 0, %v426_v29  ;;  %v1822_v52 = vshrl.u32 %v8607_v56, %v5254_v63  ;;  %v5268_v45 = vshrl.u32 %v1807_v26, 5 }
 0x116   :  { %v432_v17 = vadd.s32 3, %v428_v53  ;;  %8613 = vst [vmem:[#allocation29_spill] sm:$0xff] %v5264_v16  ;;  %v5266_v8 = vshrl.u32 %v1752_v41, 30  ;;  %v504_v61 = vadd.s32 536870912, %v503_v48  ;;  %v1812_v32 = vshll.u32 %v8611_v60, %v1809_v54 }
 0x117   :  { %v424_v49 = vsel %vm341_vm8, %v423_v21, %v422_v0  ;;  %v1815_v7 = vshll.u32 %v8608_v34, %v1809_v54  ;;  %v1824_v0 = vshll.u32 %v8607_v56, %v1809_v54  ;;  %v1825_v51 = vshrl.u32 %v8609_v37, %v5254_v63 }
 0x118   :  { %v427_v12 = vsel %vm340_vm10, %v5048_v42, %v424_v49  ;;  %v433_v14 = vand.u32 3, %v432_v17  ;;  %v1813_v28 = vshrl.u32 %v8608_v34, %v5254_v63  ;;  %v1816_v58 = vshrl.u32 %v8610_v62, %v5254_v63 }
 0x119   :  { %4615 = vcosq.f32 %v427_v12  ;;  %v1818_v29 = vshll.u32 %v8610_v62, %v1809_v54  ;;  %v1819_v26 = vshrl.u32 %v8606_v46, %v5254_v63  ;;  %v1823_v21 = vor.u32 %v1822_v52, %v1821_v20 }
 0x11a   :  { %4617 = vsinq.f32 %v427_v12  ;;  %vm438_vm11 = vcmp.eq.s32.totalorder %v433_v14, 2  ;;  %v1802_v50 = vand.u32 8388607, %v8485_v23  ;;  %vm1830_vm12 = vcmp.lt.s32.totalorder %v5268_v45, 4 }
 0x11b   :  { %v1754_v49 = vshll.u32 %v5266_v8, 30  ;;  %v5286_v53 = vshrl.u32 %v504_v61, 30  ;;  %v1826_v3 = vor.u32 %v1825_v51, %v1824_v0  ;;  %v550_v12 = vand.u32 2139095040, %v5264_v16 }
 0x11c   :  { %v1814_v17 = vor.u32 %v1813_v28, %v1812_v32  ;;  %v1817_v41 = vor.u32 %v1816_v58, %v1815_v7  ;;  %v1820_v18 = vor.u32 %v1819_v26, %v1818_v29  ;;  %vm1827_vm13 = vcmp.lt.s32.totalorder %v5268_v45, 1 }
 0x11d   :  { %vm1829_vm14 = vcmp.lt.s32.totalorder %v5268_v45, 3  ;;  %v1836_v52 = vsel %vm1830_vm12, %v1823_v21, 920167782  ;;  %vm431_vm15 = vweird.f32 %v5048_v42  ;;  %vm435_vm0 = vcmp.eq.s32.totalorder %v433_v14, 0 }
 0x11e   :  { %v1803_v0 = vor.u32 8388608, %v1802_v50  ;;  %vm434_vm3 = vcmp.lt.s32.totalorder %v433_v14, 2  ;;  %v1840_v32 = vsel %vm1830_vm12, %v1826_v3, 1326507024  ;;  %v5299_v7 = vadd.f32 %v5045_v39, %v5062_v59 }
 0x11f   :  { %vm1828_vm4 = vcmp.lt.s32.totalorder %v5268_v45, 2  ;;  %v1835_v58 = vsel %vm1827_vm13, %v1814_v17, %v1817_v41  ;;  %v1837_v42 = vsel %vm1829_vm14, %v1820_v18, %v1836_v52  ;;  %v5308_v14 = vsub.s32 %v1751_v10, %v1754_v49 }
 0x120   :  { %8614 = vst [vmem:[#allocation30_spill] sm:$0xff] %v5299_v7  ;;  %v506_v26 = vshll.u32 %v5286_v53, 30  ;;  %v551_v50 = vshrl.u32 %v550_v12, 23  ;;  %v1839_v59 = vsel %vm1827_vm13, %v1817_v41, %v1820_v18  ;;  %v1843_v3 = vshll.u32 %v1803_v0, 8 }
 0x121   :  { %v1757_v52 = vsub.s32 0, %v5308_v14  ;;  %v1832_v0 = vsel %vm1830_vm12, %v1820_v18, 2102212464  ;;  %v8616_v24 = vand.u32 2147483647, %v5264_v16 }
 0x122   :  { %v5319_v10 = vsub.s32 %v503_v48, %v506_v26  ;;  %v1833_v18 = vsel %vm1829_vm14, %v1817_v41, %v1832_v0 }
 0x123   :  { %v4616_v11 = vpop.eup %4615  ;;  %v3986_v26 = vmin.u32 %v1757_v52, %v5308_v14  ;;  %v554_v27 = vand.u32 8388607, %v8616_v24 }
 0x124   :  { %v4618_v35 = vpop.eup %4617  ;;  %v439_v54 = vxor.u32 2147483648, %v4616_v11 }
 0x125   :  { %v436_v20 = vxor.u32 2147483648, %v4618_v35 }
 0x126   :  { %v440_v61 = vsel %vm438_vm11, %v439_v54, %v4618_v35  ;;  %v1838_v35 = vsel %vm1828_vm4, %v1835_v58, %v1837_v42  ;;  %v3941_v54 = vadd.s32 4294967169, %v551_v50  ;;  %v5334_v42 = vpop.f32.mrb[10].mxu1  ;;  %v509_v50 = vsub.s32 0, %v5319_v10 }
 0x127   :  { %v437_v51 = vsel %vm435_vm0, %v4616_v11, %v436_v20  ;;  %v1841_v11 = vsel %vm1829_vm14, %v1823_v21, %v1840_v32  ;;  %v1902_v20 = vand.u32 2139095040, %v5299_v7  ;;  %v1811_v21 = vshrl.u32 %v8611_v60, %v5254_v63 }
 0x128   :  { %v441_v28 = vsel %vm434_vm3, %v437_v51, %v440_v61  ;;  %v1842_v49 = vsel %vm1828_vm4, %v1839_v59, %v1841_v11  ;;  %v557_v12 = vadd.s32 1, %v3941_v54  ;;  %v4245_v11 = vpop.f32.mrb[11].mxu1 }
 0x129   :  { %v5306_v29 = vsel %vm431_vm15, nan, %v441_v28  ;;  %v5323_v61 = vmul.u32.u64.low %v1843_v3, %v1838_v35  ;;  %v5324_v51 = vmul.u32.u64.high %v1843_v3, %v1838_v35, %v5323_v61  ;;  %v1903_v58 = vshrl.u32 %v1902_v20, 23 }
 0x12a   :  { %8615 = vst [vmem:[#allocation31_spill] sm:$0xff] %v5306_v29  ;;  %vm558_vm5 = vcmp.gt.s32.totalorder %v557_v12, 0  ;;  %v5331_v32 = vmul.u32.u64.low %v1843_v3, %v1842_v49  ;;  %v5332_v28 = vmul.u32.u64.high %v1843_v3, %v1842_v49, %v5331_v32  ;;  %v1831_v63 = vsel %vm1827_vm13, %v1811_v21, %v1814_v17 }
 0x12b   :  { %v559_v48 = vsel %vm558_vm5, %v557_v12, 0  ;;  %v3993_v54 = vadd.s32 4294967169, %v1903_v58  ;;  %v1759_v49 = vclz %v3986_v26  ;;  %v3938_v20 = vmin.u32 %v509_v50, %v5319_v10 }
 0x12c   :  { %v561_v59 = vand.u32 31, %v559_v48  ;;  %v1834_v52 = vsel %vm1828_vm4, %v1831_v63, %v1833_v18  ;;  %v1853_v32 = vadd.s32 1, %v5324_v51  ;;  %v5349_v11 = vshrl.u32 %v559_v48, 5 }
 0x12d   :  { %vm1852_vm6 = vc.u32 %v5332_v28, %v5323_v61  ;;  %v1909_v26 = vadd.s32 1, %v3993_v54  ;;  %v511_v12 = vclz %v3938_v20  ;;  %v1850_v33 = vmul.u32 %v1843_v3, %v1834_v52 }
 0x12e   :  { %v5342_v35 = vsub.s32 32, %v561_v59  ;;  %v573_v0 = vshll.u32 %v8606_v46, %v561_v59  ;;  %v564_v45 = vshll.u32 %v8611_v60, %v561_v59  ;;  %v567_v48 = vshll.u32 %v8608_v34, %v561_v59 }
 0x12f   :  { %v570_v50 = vshll.u32 %v8610_v62, %v561_v59  ;;  %v576_v18 = vshll.u32 %v8607_v56, %v561_v59  ;;  %vm582_vm7 = vcmp.lt.s32.totalorder %v5349_v11, 4  ;;  %v1854_v54 = vsel %vm1852_vm6, %v1853_v32, %v5324_v51 }
 0x130   :  { %v565_v17 = vshrl.u32 %v8608_v34, %v5342_v35  ;;  %v568_v41 = vshrl.u32 %v8610_v62, %v5342_v35  ;;  %v571_v21 = vshrl.u32 %v8606_v46, %v5342_v35  ;;  %v574_v58 = vshrl.u32 %v8607_v56, %v5342_v35 }
 0x131   :  { %v577_v23 = vshrl.u32 %v8609_v37, %v5342_v35  ;;  %vm1910_vm8 = vcmp.gt.s32.totalorder %v1909_v26, 0  ;;  %v3987_v20 = vadd.s32 4294967294, %v1759_v49  ;;  %v3939_v24 = vadd.s32 4294967294, %v511_v12 }
 0x132   :  { %v575_v63 = vor.u32 %v574_v58, %v573_v0  ;;  %v566_v19 = vor.u32 %v565_v17, %v564_v45  ;;  %v569_v22 = vor.u32 %v568_v41, %v567_v48  ;;  %v572_v13 = vor.u32 %v571_v21, %v570_v50  ;;  %v5401_v48 = vpop.f32.mrb[12].mxu0 }
 0x133   :  { %v578_v15 = vor.u32 %v577_v23, %v576_v18  ;;  %vm579_vm9 = vcmp.lt.s32.totalorder %v5349_v11, 1  ;;  %vm581_vm10 = vcmp.lt.s32.totalorder %v5349_v11, 3  ;;  %v1855_v23 = vadd.s32 %v1854_v54, %v1850_v33  ;;  %8618 = vst [vmem:[#allocation33_spill] sm:$0xff] %v5401_v48  ;;  %v4209_v54 = vpop.f32.mrb[13].mxu0 }
 0x134   :  { %v588_v59 = vsel %vm582_vm7, %v575_v63, 920167782  ;;  %v555_v52 = vor.u32 8388608, %v554_v27  ;;  %v587_v17 = vsel %vm579_vm9, %v566_v19, %v569_v22  ;;  %v591_v32 = vsel %vm579_vm9, %v569_v22, %v572_v13 }
 0x135   :  { %v592_v3 = vsel %vm582_vm7, %v578_v15, 1326507024  ;;  %v589_v51 = vsel %vm581_vm10, %v572_v13, %v588_v59  ;;  %v1911_v49 = vsel %vm1910_vm8, %v1909_v26, 0  ;;  %vm580_vm11 = vcmp.lt.s32.totalorder %v5349_v11, 2 }
 0x136   :  { %v593_v15 = vsel %vm581_vm10, %v575_v63, %v592_v3  ;;  %v1913_v12 = vand.u32 31, %v1911_v49  ;;  %vm3988_vm12 = vcmp.lt.s32.totalorder %v3987_v20, 0  ;;  %vm3940_vm13 = vcmp.lt.s32.totalorder %v3939_v24, 0 }
 0x137   :  { %v590_v27 = vsel %vm580_vm11, %v587_v17, %v589_v51  ;;  %v1856_v33 = vadd.s32 536870912, %v1855_v23  ;;  %v594_v41 = vsel %vm580_vm11, %v591_v32, %v593_v15  ;;  %v5394_v21 = vshll.u32 %v555_v52, 8 }
 0x138   :  { %v8493_v0 = vand.u32 2147483647, %v5299_v7  ;;  %v1914_v58 = vsub.s32 32, %v1913_v12  ;;  %v5399_v45 = vadd.f32 %v5045_v39, %v5067_v44  ;;  %v5405_v26 = vadd.s32 %v5181_v36, %v5189_v55 }
 0x139   :  { %v5407_v50 = vsel %vm3988_vm12, 0, %v3987_v20  ;;  %v5410_v63 = vmul.u32.u64.low %v5394_v21, %v590_v27  ;;  %v5411_v18 = vmul.u32.u64.high %v5394_v21, %v590_v27, %v5410_v63  ;;  %v5416_v59 = vadd.s32 %v5218_v40, %v5224_v25 }
 0x13a   :  { %8617 = vst [vmem:[#allocation32_spill] sm:$0xff] %v5399_v45  ;;  %v5418_v44 = vsel %vm3940_vm13, 0, %v3939_v24  ;;  %v5421_v3 = vmul.u32.u64.low %v5394_v21, %v594_v41  ;;  %v5422_v52 = vmul.u32.u64.high %v5394_v21, %v594_v41, %v5421_v3  ;;  %v5424_v36 = vshrl.u32 %v1856_v33, 30 }
 0x13b   :  { %v563_v55 = vshrl.u32 %v8611_v60, %v5342_v35  ;;  %v584_v20 = vsel %vm582_vm7, %v572_v13, 2102212464  ;;  %v1906_v17 = vand.u32 8388607, %v8493_v0  ;;  %v1767_v40 = vsub.s32 4294967266, %v5407_v50 }
 0x13c   :  { %v1916_v25 = vshll.u32 %v8611_v60, %v1913_v12  ;;  %v1917_v24 = vshrl.u32 %v8608_v34, %v1914_v58  ;;  %v1919_v51 = vshll.u32 %v8608_v34, %v1913_v12  ;;  %v519_v32 = vsub.s32 4294967266, %v5418_v44 }
 0x13d   :  { %v583_v15 = vsel %vm579_vm9, %v563_v55, %v566_v19  ;;  %v5439_v35 = vshrl.u32 %v1911_v49, 5  ;;  %v1920_v13 = vshrl.u32 %v8610_v62, %v1914_v58  ;;  %v585_v27 = vsel %vm581_vm10, %v569_v22, %v584_v20 }
 0x13e   :  { %v1922_v33 = vshll.u32 %v8610_v62, %v1913_v12  ;;  %v1923_v41 = vshrl.u32 %v8606_v46, %v1914_v58  ;;  %v1925_v54 = vshll.u32 %v8606_v46, %v1913_v12  ;;  %v1858_v3 = vshll.u32 %v5424_v36, 30 }
 0x13f   :  { %v1907_v0 = vor.u32 8388608, %v1906_v17  ;;  %v1926_v6 = vshrl.u32 %v8607_v56, %v1914_v58  ;;  %v1928_v19 = vshll.u32 %v8607_v56, %v1913_v12  ;;  %v1918_v49 = vor.u32 %v1917_v24, %v1916_v25 }
 0x140   :  { %v1921_v55 = vor.u32 %v1920_v13, %v1919_v51  ;;  %v1929_v9 = vshrl.u32 %v8609_v37, %v1914_v58  ;;  %v654_v2 = vand.u32 2139095040, %v5399_v45  ;;  %v586_v22 = vsel %vm580_vm11, %v583_v15, %v585_v27 }
 0x141   :  { %v605_v20 = vadd.s32 1, %v5411_v18  ;;  %v1927_v4 = vor.u32 %v1926_v6, %v1925_v54  ;;  %vm1931_vm14 = vcmp.lt.s32.totalorder %v5439_v35, 1  ;;  %vm604_vm15 = vc.u32 %v5422_v52, %v5410_v63 }
 0x142   :  { %v1924_v17 = vor.u32 %v1923_v41, %v1922_v33  ;;  %v1930_v48 = vor.u32 %v1929_v9, %v1928_v19  ;;  %vm1934_vm0 = vcmp.lt.s32.totalorder %v5439_v35, 4  ;;  %v1763_v12 = vsub.s32 32, %v5407_v50 }
 0x143   :  { %v1768_v25 = vadd.s32 127, %v1767_v40  ;;  %v5460_v24 = vsub.s32 %v1855_v23, %v1858_v3  ;;  %vm1933_vm3 = vcmp.lt.s32.totalorder %v5439_v35, 3  ;;  %v515_v11 = vsub.s32 32, %v5418_v44 }
 0x144   :  { %vm1932_vm4 = vcmp.lt.s32.totalorder %v5439_v35, 2  ;;  %v1939_v6 = vsel %vm1931_vm14, %v1918_v49, %v1921_v55  ;;  %v5467_v51 = vshll.u32 %v1907_v0, 8  ;;  %v520_v15 = vadd.s32 127, %v519_v32 }
 0x145   :  { %v602_v9 = vmul.u32 %v5394_v21, %v586_v22  ;;  %v606_v13 = vsel %vm604_vm15, %v605_v20, %v5411_v18  ;;  %v1940_v23 = vsel %vm1934_vm0, %v1927_v4, 920167782  ;;  %v1943_v27 = vsel %vm1931_vm14, %v1921_v55, %v1924_v17 }
 0x146   :  { %v1941_v40 = vsel %vm1933_vm3, %v1924_v17, %v1940_v23  ;;  %v1944_v33 = vsel %vm1934_vm0, %v1930_v48, 1326507024  ;;  %v655_v41 = vshrl.u32 %v654_v2, 23  ;;  %v1861_v0 = vsub.s32 0, %v5460_v24 }
 0x147   :  { %v1915_v32 = vshrl.u32 %v8611_v60, %v1914_v58  ;;  %v1942_v21 = vsel %vm1932_vm4, %v1939_v6, %v1941_v40  ;;  %v1945_v18 = vsel %vm1933_vm3, %v1927_v4, %v1944_v33  ;;  %v5485_v54 = vadd.s32 %v606_v13, %v602_v9 }
 0x148   :  { %v1946_v3 = vsel %vm1932_vm4, %v1943_v27, %v1945_v18  ;;  %v5490_v19 = vmul.u32.u64.low %v5467_v51, %v1942_v21  ;;  %v5491_v22 = vmul.u32.u64.high %v5467_v51, %v1942_v21, %v5490_v19  ;;  %v521_v2 = vshll.u32 %v520_v15, 23 }
 0x149   :  { %v1936_v58 = vsel %vm1934_vm0, %v1924_v17, 2102212464  ;;  %v5497_v48 = vmul.u32.u64.low %v5467_v51, %v1946_v3  ;;  %v5498_v20 = vmul.u32.u64.high %v5467_v51, %v1946_v3, %v5497_v48  ;;  %v3945_v6 = vadd.s32 4294967169, %v655_v41  ;;  %v5521_v41 = vpop.f32.mrb[12].mxu1 }
 0x14a   :  { %v1764_v4 = vshll.u32 %v5308_v14, %v5407_v50  ;;  %v517_v9 = vshrl.u32 %v5416_v59, %v515_v11  ;;  %v3990_v13 = vmin.u32 %v1861_v0, %v5460_v24  ;;  %v5506_v23 = vadd.f32 %v5045_v39, %v5069_v47  ;;  %8620 = vst [vmem:[#allocation35_spill] sm:$0xff] %v5521_v41 }
 0x14b   :  { %v608_v15 = vadd.s32 536870912, %v5485_v54  ;;  %v1935_v17 = vsel %vm1931_vm14, %v1915_v32, %v1918_v49  ;;  %v1937_v40 = vsel %vm1933_vm3, %v1921_v55, %v1936_v58  ;;  %v661_v27 = vadd.s32 1, %v3945_v6 }
 0x14c   :  { %8619 = vst [vmem:[#allocation34_spill] sm:$0xff] %v5506_v23  ;;  %v1765_v33 = vshrl.u32 %v5405_v26, %v1763_v12  ;;  %v1769_v14 = vshll.u32 %v1768_v25, 23  ;;  %v516_v50 = vshll.u32 %v5319_v10, %v5418_v44  ;;  %v522_v59 = vor.u32 4788187, %v521_v2  ;;  %v4248_v12 = vpop.f32.mrb[13].mxu1 }
 0x14d   :  { %vm1693_vm5 = vcmp.lt.s32.totalorder %v5051_v43, 0  ;;  %v1777_v39 = vsub.s32 4, %v5266_v8  ;;  %vm662_vm6 = vcmp.gt.s32.totalorder %v661_v27, 0  ;;  %v1863_v11 = vclz %v3990_v13 }
 0x14e   :  { %v518_v47 = vor.u32 %v517_v9, %v516_v50  ;;  %v1938_v49 = vsel %vm1932_vm4, %v1935_v17, %v1937_v40  ;;  %v1957_v55 = vadd.s32 1, %v5491_v22  ;;  %v5523_v26 = vshrl.u32 %v608_v15, 30 }
 0x14f   :  { %vm1956_vm7 = vc.u32 %v5498_v20, %v5490_v19  ;;  %v663_v10 = vsel %vm662_vm6, %v661_v27, 0  ;;  %v2006_v44 = vand.u32 2139095040, %v5506_v23  ;;  %v1766_v25 = vor.u32 %v1765_v33, %v1764_v4 }
 0x150   :  { %v1770_v0 = vor.u32 4788187, %v1769_v14  ;;  %v523_v32 = vand.u32 2147483647, %v522_v59  ;;  %v529_v21 = vsub.s32 4, %v5286_v53  ;;  %vm445_vm8 = vcmp.lt.s32.totalorder %v5065_v1, 0 }
 0x151   :  { %v1954_v18 = vmul.u32 %v5467_v51, %v1938_v49  ;;  %v665_v3 = vand.u32 31, %v663_v10  ;;  %v525_v2 = vcvt.s32.f32 %v518_v47  ;;  %v3991_v58 = vadd.s32 4294967294, %v1863_v11 }
 0x152   :  { %v1958_v48 = vsel %vm1956_vm7, %v1957_v55, %v5491_v22  ;;  %v8498_v6 = vand.u32 2147483647, %v5399_v45  ;;  %v8621_v4 = vand.u32 2147483647, %v5051_v43  ;;  %v5544_v13 = vsel %vm1693_vm5, %v1777_v39, %v5266_v8 }
 0x153   :  { %v610_v51 = vshll.u32 %v5523_v26, 30  ;;  %v5547_v15 = vsub.s32 32, %v665_v3  ;;  %v2007_v17 = vshrl.u32 %v2006_v44, 23  ;;  %v1771_v40 = vand.u32 2147483647, %v1770_v0 }
 0x154   :  { %vm5537_vm9 = vcmp.le.f32.partialorder %v8621_v4, 0.7853982  ;;  %v1773_v22 = vcvt.s32.f32 %v1766_v25  ;;  %v526_v27 = vmul.f32 %v525_v2, %v523_v32  ;;  %v530_v33 = vsel %vm445_vm8, %v529_v21, %v5286_v53 }
 0x155   :  { %v5552_v14 = vadd.s32 %v1958_v48, %v1954_v18  ;;  %v669_v50 = vshrl.u32 %v8608_v34, %v5547_v15  ;;  %v672_v8 = vshrl.u32 %v8610_v62, %v5547_v15  ;;  %v675_v59 = vshrl.u32 %v8606_v46, %v5547_v15 }
 0x156   :  { %v8624_v39 = vand.u32 2147483647, %v5065_v1  ;;  %vm3992_vm11 = vcmp.lt.s32.totalorder %v3991_v58, 0  ;;  %v658_v53 = vand.u32 8388607, %v8498_v6  ;;  %v668_v11 = vshll.u32 %v8611_v60, %v665_v3 }
 0x157   :  { %v671_v49 = vshll.u32 %v8608_v34, %v665_v3  ;;  %v5571_v55 = vsub.s32 %v5485_v54, %v610_v51  ;;  %v5573_v44 = vshrl.u32 %v663_v10, 5  ;;  %v674_v12 = vshll.u32 %v8610_v62, %v665_v3 }
 0x158   :  { %vm5562_vm10 = vcmp.le.f32.partialorder %v8624_v39, 0.7853982  ;;  %v3997_v25 = vadd.s32 4294967169, %v2007_v17  ;;  %v670_v0 = vor.u32 %v669_v50, %v668_v11  ;;  %v677_v21 = vshll.u32 %v8606_v46, %v665_v3 }
 0x159   :  { %v673_v32 = vor.u32 %v672_v8, %v671_v49  ;;  %v678_v18 = vshrl.u32 %v8607_v56, %v5547_v15  ;;  %v1960_v2 = vadd.s32 536870912, %v5552_v14  ;;  %v676_v48 = vor.u32 %v675_v59, %v674_v12 }
 0x15a   :  { %v680_v4 = vshll.u32 %v8607_v56, %v665_v3  ;;  %v681_v54 = vshrl.u32 %v8609_v37, %v5547_v15  ;;  %v1774_v10 = vmul.f32 %v1773_v22, %v1771_v40  ;;  %v527_v51 = vxor.u32 2147483648, %v526_v27 }
 0x15b   :  { %v5584_v39 = vsel %vm3992_vm11, 0, %v3991_v58  ;;  %v679_v17 = vor.u32 %v678_v18, %v677_v21  ;;  %v659_v50 = vor.u32 8388608, %v658_v53  ;;  %vm683_vm12 = vcmp.lt.s32.totalorder %v5573_v44, 1 }
 0x15c   :  { %v682_v8 = vor.u32 %v681_v54, %v680_v4  ;;  %vm686_vm13 = vcmp.lt.s32.totalorder %v5573_v44, 4  ;;  %vm685_vm14 = vcmp.lt.s32.totalorder %v5573_v44, 3  ;;  %v691_v3 = vsel %vm683_vm12, %v670_v0, %v673_v32 }
 0x15d   :  { %v692_v59 = vsel %vm686_vm13, %v679_v17, 920167782  ;;  %v2013_v40 = vadd.s32 1, %v3997_v25  ;;  %v613_v22 = vsub.s32 0, %v5571_v55  ;;  %v5594_v58 = vshrl.u32 %v1960_v2, 30 }
 0x15e   :  { %v693_v53 = vsel %vm685_vm14, %v676_v48, %v692_v59  ;;  %v695_v11 = vsel %vm683_vm12, %v673_v32, %v676_v48  ;;  %v1780_v49 = vsel %vm5537_vm9, 0, %v5544_v13  ;;  %v528_v12 = vsel %vm445_vm8, %v527_v51, %v526_v27 }
 0x15f   :  { %vm684_vm15 = vcmp.lt.s32.totalorder %v5573_v44, 2  ;;  %v696_v25 = vsel %vm686_vm13, %v682_v8, 1326507024  ;;  %v1775_v21 = vxor.u32 2147483648, %v1774_v10  ;;  %v532_v18 = vsel %vm5562_vm10, 0, %v530_v33 }
 0x160   :  { %v694_v2 = vsel %vm684_vm15, %v691_v3, %v693_v53  ;;  %v697_v4 = vsel %vm685_vm14, %v679_v17, %v696_v25  ;;  %v1871_v13 = vsub.s32 4294967266, %v5584_v39  ;;  %v5617_v54 = vshll.u32 %v659_v50, 8 }
 0x161   :  { %v698_v27 = vsel %vm684_vm15, %v695_v11, %v697_v4  ;;  %vm2014_vm0 = vcmp.gt.s32.totalorder %v2013_v40, 0  ;;  %v531_v51 = vsel %vm5562_vm10, %v5065_v1, %v528_v12  ;;  %v3942_v33 = vmin.u32 %v613_v22, %v5571_v55 }
 0x162   :  { %v1962_v8 = vshll.u32 %v5594_v58, 30  ;;  %v2015_v3 = vsel %vm2014_vm0, %v2013_v40, 0  ;;  %vm1797_vm3 = vcmp.lt.s32.totalorder %v5103_v30, 0  ;;  %v1776_v47 = vsel %vm1693_vm5, %v1775_v21, %v1774_v10  ;;  %v5654_v21 = vpop.f32.mrb[14].mxu0 }
 0x163   :  { %v5626_v17 = vmul.u32.u64.low %v5617_v54, %v698_v27  ;;  %v5627_v59 = vmul.u32.u64.high %v5617_v54, %v698_v27, %v5626_v17  ;;  %v5630_v53 = vmul.u32.u64.low %v5617_v54, %v694_v2  ;;  %v5631_v50 = vmul.u32.u64.high %v5617_v54, %v694_v2, %v5630_v53  ;;  %8628 = vst [vmem:[#allocation37_spill] sm:$0xff] %v5654_v21 }
 0x164   :  { %v536_v11 = vadd.s32 3, %v532_v18  ;;  %v688_v22 = vsel %vm686_vm13, %v676_v48, 2102212464  ;;  %v2017_v12 = vand.u32 31, %v2015_v3  ;;  %v1851_v40 = vadd.s32 %v5323_v61, %v5332_v28 }
 0x165   :  { %v1867_v25 = vsub.s32 32, %v5584_v39  ;;  %v1872_v4 = vadd.s32 127, %v1871_v13  ;;  %v667_v27 = vshrl.u32 %v8611_v60, %v5547_v15  ;;  %v5643_v2 = vadd.s32 3, %v1780_v49  ;;  %v4212_v13 = vpop.f32.mrb[15].mxu0 }
 0x166   :  { %4619 = vcosq.f32 %v531_v51  ;;  %v615_v17 = vclz %v3942_v33  ;;  %v5646_v10 = vsub.s32 %v5552_v14, %v1962_v8  ;;  %v689_v61 = vsel %vm685_vm14, %v673_v32, %v688_v22  ;;  %v5673_v32 = vld [vmem:[%s8447_s2] ss:$0 sm:$0xff] }
 0x167   :  { %8627 = vst [vmem:[#allocation36_spill] sm:$0xff] %v5643_v2  ;;  %4621 = vsinq.f32 %v531_v51  ;;  %v687_v48 = vsel %vm683_vm12, %v667_v27, %v670_v0  ;;  %v5652_v28 = vsub.s32 32, %v2017_v12  ;;  %v5659_v15 = vsel %vm5537_vm9, %v5051_v43, %v1776_v47 }
 0x168   :  { %v5661_v49 = vand.u32 3, %v536_v11  ;;  %v8629_v14 = vand.u32 2147483647, %v5103_v30  ;;  %v1881_v0 = vsub.s32 4, %v5424_v36  ;;  %v5677_v9 = vadd.f32 %v5673_v32, %v5086_v57 }
 0x169   :  { %v1868_v51 = vshll.u32 %v5460_v24, %v5584_v39  ;;  %v1869_v33 = vshrl.u32 %v1851_v40, %v1867_v25  ;;  %v1873_v8 = vshll.u32 %v1872_v4, 23  ;;  %v3943_v11 = vadd.s32 4294967294, %v615_v17 }
 0x16a   :  { %vm5665_vm4 = vcmp.le.f32.partialorder %v8629_v14, 0.7853982  ;;  %8632 = vst [vmem:[#allocation38_spill] sm:$0xff] %v5677_v9  ;;  %v1965_v22 = vsub.s32 0, %v5646_v10  ;;  %v690_v27 = vsel %vm684_vm15, %v687_v48, %v689_v61  ;;  %v2029_v14 = vshll.u32 %v8606_v46, %v2017_v12 }
 0x16b   :  { %vm708_vm5 = vc.u32 %v5627_v59, %v5630_v53  ;;  %v709_v57 = vadd.s32 1, %v5631_v50  ;;  %v5689_v13 = vshrl.u32 %v2015_v3, 5  ;;  %v2030_v24 = vshrl.u32 %v8607_v56, %v5652_v28 }
 0x16c   :  { %v2020_v39 = vshll.u32 %v8611_v60, %v2017_v12  ;;  %v2021_v40 = vshrl.u32 %v8608_v34, %v5652_v28  ;;  %v2023_v44 = vshll.u32 %v8608_v34, %v2017_v12  ;;  %v2024_v25 = vshrl.u32 %v8610_v62, %v5652_v28 }
 0x16d   :  { %v2026_v4 = vshll.u32 %v8610_v62, %v2017_v12  ;;  %v2027_v17 = vshrl.u32 %v8606_v46, %v5652_v28  ;;  %v2032_v3 = vshll.u32 %v8607_v56, %v2017_v12  ;;  %v2033_v48 = vshrl.u32 %v8609_v37, %v5652_v28 }
 0x16e   :  { %4623 = vcosq.f32 %v5659_v15  ;;  %v1870_v61 = vor.u32 %v1869_v33, %v1868_v51  ;;  %v1882_v35 = vsel %vm1797_vm3, %v1881_v0, %v5424_v36  ;;  %v2031_v6 = vor.u32 %v2030_v24, %v2029_v14 }
 0x16f   :  { %v1874_v47 = vor.u32 4788187, %v1873_v8  ;;  %v710_v43 = vsel %vm708_vm5, %v709_v57, %v5631_v50  ;;  %v8633_v2 = vand.u32 2147483647, %v5506_v23  ;;  %vm2038_vm6 = vcmp.lt.s32.totalorder %v5689_v13, 4 }
 0x170   :  { %v4620_v38 = vpop.eup %4619  ;;  %vm539_vm7 = vcmp.eq.s32.totalorder %v5661_v49, 0  ;;  %vm3944_vm8 = vcmp.lt.s32.totalorder %v3943_v11, 0  ;;  %v3994_v51 = vmin.u32 %v1965_v22, %v5646_v10  ;;  %v706_v36 = vmul.u32 %v5617_v54, %v690_v27 }
 0x171   :  { %v2010_v12 = vand.u32 8388607, %v8633_v2  ;;  %v758_v0 = vand.u32 2139095040, %v5677_v9  ;;  %v4622_v33 = vpop.eup %4621  ;;  %v5720_v8 = vor.u32 %v2021_v40, %v2020_v39  ;;  %v5722_v14 = vor.u32 %v2024_v25, %v2023_v44 }
 0x172   :  { %v2028_v50 = vor.u32 %v2027_v17, %v2026_v4  ;;  %v2034_v57 = vor.u32 %v2033_v48, %v2032_v3  ;;  %v5724_v2 = vadd.s32 %v710_v43, %v706_v36  ;;  %vm2035_vm9 = vcmp.lt.s32.totalorder %v5689_v13, 1 }
 0x173   :  { %vm2037_vm10 = vcmp.lt.s32.totalorder %v5689_v13, 3  ;;  %v2044_v22 = vsel %vm2038_vm6, %v2031_v6, 920167782  ;;  %vm538_vm11 = vcmp.lt.s32.totalorder %v5661_v49, 2  ;;  %v543_v54 = vxor.u32 2147483648, %v4620_v38 }
 0x174   :  { %v1884_v27 = vsel %vm5665_vm4, 0, %v1882_v35  ;;  %v618_v24 = vsel %vm3944_vm8, 0, %v3943_v11  ;;  %v2011_v39 = vor.u32 8388608, %v2010_v12  ;;  %v540_v40 = vxor.u32 2147483648, %v4622_v33 }
 0x175   :  { %v1875_v44 = vand.u32 2147483647, %v1874_v47  ;;  %v1877_v43 = vcvt.s32.f32 %v1870_v61  ;;  %vm2036_vm12 = vcmp.lt.s32.totalorder %v5689_v13, 2  ;;  %v2043_v25 = vsel %vm2035_vm9, %v5720_v8, %v5722_v14 }
 0x176   :  { %v2045_v4 = vsel %vm2037_vm10, %v2028_v50, %v2044_v22  ;;  %v2048_v17 = vsel %vm2038_vm6, %v2034_v57, 1326507024  ;;  %v759_v35 = vshrl.u32 %v758_v0, 23  ;;  %vm535_vm13 = vweird.f32 %v5065_v1 }
 0x177   :  { %vm542_vm14 = vcmp.eq.s32.totalorder %v5661_v49, 2  ;;  %v623_v47 = vsub.s32 4294967266, %v618_v24  ;;  %v1967_v11 = vclz %v3994_v51  ;;  %v712_v3 = vadd.s32 536870912, %v5724_v2 }
 0x178   :  { %4625 = vsinq.f32 %v5659_v15  ;;  %v5747_v48 = vadd.s32 3, %v1884_v27  ;;  %v5749_v61 = vshll.u32 %v2011_v39, 8  ;;  %v3949_v12 = vadd.s32 4294967169, %v759_v35  ;;  %v5751_v36 = vpop.eup %4623  ;;  %v5762_v35 = vpop.f32.mrb[14].mxu1 }
 0x179   :  { %8635 = vst [vmem:[#allocation40_spill] sm:$0xff] %v5751_v36  ;;  %v1878_v22 = vmul.f32 %v1877_v43, %v1875_v44  ;;  %v2046_v0 = vsel %vm2036_vm12, %v2043_v25, %v2045_v4  ;;  %v2047_v57 = vsel %vm2035_vm9, %v5722_v14, %v2028_v50  ;;  %v2049_v51 = vsel %vm2037_vm10, %v2031_v6, %v2048_v17  ;;  %v4251_v36 = vpop.f32.mrb[15].mxu1 }
 0x17a   :  { %8634 = vst [vmem:[#allocation39_spill] sm:$0xff] %v5747_v48  ;;  %v541_v15 = vsel %vm539_vm7, %v4620_v38, %v540_v40  ;;  %v544_v27 = vsel %vm542_vm14, %v543_v54, %v4622_v33  ;;  %v619_v39 = vsub.s32 32, %v618_v24  ;;  %v765_v48 = vadd.s32 1, %v3949_v12  ;;  %8636 = vst [vmem:[#allocation41_spill] sm:$0xff] %v5762_v35 }
 0x17b   :  { %v603_v44 = vadd.s32 %v5410_v63, %v5422_v52  ;;  %v624_v43 = vadd.s32 127, %v623_v47  ;;  %v3995_v25 = vadd.s32 4294967294, %v1967_v11  ;;  %v5766_v4 = vshrl.u32 %v712_v3, 30 }
 0x17c   :  { %v2050_v21 = vsel %vm2036_vm12, %v2047_v57, %v2049_v51  ;;  %v5771_v6 = vmul.u32.u64.low %v5749_v61, %v2046_v0  ;;  %v5772_v17 = vmul.u32.u64.high %v5749_v61, %v2046_v0, %v5771_v6  ;;  %vm766_vm15 = vcmp.gt.s32.totalorder %v765_v48, 0 }
 0x17d   :  { %v545_v38 = vsel %vm538_vm11, %v541_v15, %v544_v27  ;;  %v1879_v33 = vxor.u32 2147483648, %v1878_v22  ;;  %v2019_v63 = vshrl.u32 %v8611_v60, %v5652_v28  ;;  %v5781_v52 = vadd.f32 %v5673_v32, %v5185_v31 }
 0x17e   :  { %v621_v54 = vshrl.u32 %v603_v44, %v619_v39  ;;  %v2040_v40 = vsel %vm2038_vm6, %v2028_v50, 2102212464  ;;  %v8503_v47 = vand.u32 2147483647, %v5677_v9  ;;  %v767_v11 = vsel %vm766_vm15, %v765_v48, 0 }
 0x17f   :  { %8637 = vst [vmem:[#allocation42_spill] sm:$0xff] %v5781_v52  ;;  %v625_v3 = vshll.u32 %v624_v43, 23  ;;  %v714_v12 = vshll.u32 %v5766_v4, 30  ;;  %v5788_v49 = vmul.u32.u64.low %v5749_v61, %v2050_v21  ;;  %v5789_v36 = vmul.u32.u64.high %v5749_v61, %v2050_v21, %v5788_v49 }
 0x180   :  { %v5793_v28 = vsel %vm535_vm13, nan, %v545_v38  ;;  %v620_v31 = vshll.u32 %v5571_v55, %v618_v24  ;;  %vm3996_vm0 = vcmp.lt.s32.totalorder %v3995_v25, 0  ;;  %v769_v0 = vand.u32 31, %v767_v11 }
 0x181   :  { %8638 = vst [vmem:[#allocation43_spill] sm:$0xff] %v5793_v28  ;;  %v633_v50 = vsub.s32 4, %v5523_v26  ;;  %v2039_v48 = vsel %vm2035_vm9, %v2019_v63, %v5720_v8  ;;  %v2041_v57 = vsel %vm2037_vm10, %v5722_v14, %v2040_v40  ;;  %v2110_v21 = vand.u32 2139095040, %v5781_v52 }
 0x182   :  { %v5804_v51 = vpop.eup %4625  ;;  %v1880_v1 = vsel %vm1797_vm3, %v1879_v33, %v1878_v22  ;;  %v622_v55 = vor.u32 %v621_v54, %v620_v31  ;;  %v1955_v24 = vadd.s32 %v5490_v19, %v5498_v20  ;;  %v5810_v15 = vsub.s32 32, %v769_v0 }
 0x183   :  { %8639 = vst [vmem:[#allocation44_spill] sm:$0xff] %v5804_v51  ;;  %v626_v27 = vor.u32 4788187, %v625_v3  ;;  %v5812_v39 = vsel %vm3996_vm0, 0, %v3995_v25  ;;  %v5815_v8 = vsub.s32 %v5724_v2, %v714_v12  ;;  %v762_v14 = vand.u32 8388607, %v8503_v47 }
 0x184   :  { %v2042_v44 = vsel %vm2036_vm12, %v2039_v48, %v2041_v57  ;;  %v2061_v22 = vadd.s32 1, %v5772_v17  ;;  %v773_v43 = vshrl.u32 %v8608_v34, %v5810_v15  ;;  %v776_v19 = vshrl.u32 %v8610_v62, %v5810_v15 }
 0x185   :  { %vm549_vm3 = vcmp.lt.s32.totalorder %v5264_v16, 0  ;;  %v772_v20 = vshll.u32 %v8611_v60, %v769_v0  ;;  %v775_v2 = vshll.u32 %v8608_v34, %v769_v0  ;;  %v779_v25 = vshrl.u32 %v8606_v46, %v5810_v15 }
 0x186   :  { %v2111_v38 = vshrl.u32 %v2110_v21, 23  ;;  %v5831_v13 = vshrl.u32 %v767_v11, 5  ;;  %v778_v33 = vshll.u32 %v8610_v62, %v769_v0  ;;  %v781_v63 = vshll.u32 %v8606_v46, %v769_v0 }
 0x187   :  { %v782_v54 = vshrl.u32 %v8607_v56, %v5810_v15  ;;  %v717_v40 = vsub.s32 0, %v5815_v8  ;;  %vm2060_vm5 = vc.u32 %v5789_v36, %v5771_v6  ;;  %v774_v3 = vor.u32 %v773_v43, %v772_v20 }
 0x188   :  { %v777_v12 = vor.u32 %v776_v19, %v775_v2  ;;  %v780_v49 = vor.u32 %v779_v25, %v778_v33  ;;  %v784_v48 = vshll.u32 %v8607_v56, %v769_v0  ;;  %v785_v11 = vshrl.u32 %v8609_v37, %v5810_v15 }
 0x189   :  { %v783_v31 = vor.u32 %v782_v54, %v781_v63  ;;  %v627_v57 = vand.u32 2147483647, %v626_v27  ;;  %v629_v21 = vcvt.s32.f32 %v622_v55  ;;  %v2058_v47 = vmul.u32 %v5749_v61, %v2042_v44 }
 0x18a   :  { %v4001_v51 = vadd.s32 4294967169, %v2111_v38  ;;  %v1971_v35 = vsub.s32 32, %v5812_v39  ;;  %v2062_v9 = vsel %vm2060_vm5, %v2061_v22, %v5772_v17  ;;  %v786_v41 = vor.u32 %v785_v11, %v784_v48 }
 0x18b   :  { %vm790_vm6 = vcmp.lt.s32.totalorder %v5831_v13, 4  ;;  %v1975_v43 = vsub.s32 4294967266, %v5812_v39  ;;  %vm787_vm7 = vcmp.lt.s32.totalorder %v5831_v13, 1  ;;  %vm789_vm8 = vcmp.lt.s32.totalorder %v5831_v13, 3 }
 0x18c   :  { %v796_v0 = vsel %vm790_vm6, %v783_v31, 920167782  ;;  %v3946_v55 = vmin.u32 %v717_v40, %v5815_v8  ;;  %v763_v61 = vor.u32 8388608, %v762_v14  ;;  %v795_v27 = vsel %vm787_vm7, %v774_v3, %v777_v12 }
 0x18d   :  { %v797_v17 = vsel %vm789_vm8, %v780_v49, %v796_v0  ;;  %v5857_v44 = vadd.s32 %v2062_v9, %v2058_v47  ;;  %v799_v22 = vsel %vm787_vm7, %v777_v12, %v780_v49  ;;  %v800_v19 = vsel %vm790_vm6, %v786_v41, 1326507024 }
 0x18e   :  { %v2117_v20 = vadd.s32 1, %v4001_v51  ;;  %v5863_v2 = vmul.f32 %v629_v21, %v627_v57  ;;  %v5868_v14 = vsel %vm549_vm3, %v633_v50, %v5523_v26  ;;  %vm788_vm9 = vcmp.lt.s32.totalorder %v5831_v13, 2 }
 0x18f   :  { %v801_v9 = vsel %vm789_vm8, %v783_v31, %v800_v19  ;;  %v5876_v47 = vsel %vm5665_vm4, %v5103_v30, %v1880_v1  ;;  %v1972_v41 = vshll.u32 %v5646_v10, %v5812_v39  ;;  %v798_v25 = vsel %vm788_vm9, %v795_v27, %v797_v17 }
 0x190   :  { %v1973_v26 = vshrl.u32 %v1955_v24, %v1971_v35  ;;  %v1976_v50 = vadd.s32 127, %v1975_v43  ;;  %v802_v38 = vsel %vm788_vm9, %v799_v22, %v801_v9  ;;  %v5885_v33 = vshll.u32 %v763_v61, 8  ;;  %v5914_v61 = vpop.f32.mrb[16].mxu0 }
 0x191   :  { %v719_v63 = vclz %v3946_v55  ;;  %v2064_v18 = vadd.s32 536870912, %v5857_v44  ;;  %vm2118_vm4 = vcmp.gt.s32.totalorder %v2117_v20, 0  ;;  %v5890_v1 = vadd.f32 %v5673_v32, %v5256_v5  ;;  %8641 = vst [vmem:[#allocation46_spill] sm:$0xff] %v5914_v61  ;;  %v4215_v19 = vpop.f32.mrb[17].mxu0 }
 0x192   :  { %v631_v10 = vxor.u32 2147483648, %v5863_v2  ;;  %v5894_v39 = vmul.u32.u64.low %v5885_v33, %v798_v25  ;;  %v5895_v54 = vmul.u32.u64.high %v5885_v33, %v798_v25, %v5894_v39  ;;  %v2119_v35 = vsel %vm2118_vm4, %v2117_v20, 0 }
 0x193   :  { %8640 = vst [vmem:[#allocation45_spill] sm:$0xff] %v5890_v1  ;;  %v792_v24 = vsel %vm790_vm6, %v780_v49, 2102212464  ;;  %v5901_v40 = vmul.u32.u64.low %v5885_v33, %v802_v38  ;;  %v5902_v31 = vmul.u32.u64.high %v5885_v33, %v802_v38, %v5901_v40  ;;  %v2121_v48 = vand.u32 31, %v2119_v35 }
 0x194   :  { %v5904_v11 = vor.u32 %v1973_v26, %v1972_v41  ;;  %v1977_v5 = vshll.u32 %v1976_v50, 23  ;;  %v771_v57 = vshrl.u32 %v8611_v60, %v5810_v15  ;;  %v8508_v21 = vand.u32 2147483647, %v5781_v52 }
 0x195   :  { %v3947_v43 = vadd.s32 4294967294, %v719_v63  ;;  %v5909_v0 = vshrl.u32 %v2064_v18, 30  ;;  %v5911_v55 = vsub.s32 32, %v2121_v48  ;;  %v862_v49 = vand.u32 2139095040, %v5890_v1 }
 0x196   :  { %v791_v27 = vsel %vm787_vm7, %v771_v57, %v774_v3  ;;  %v793_v17 = vsel %vm789_vm8, %v777_v12, %v792_v24  ;;  %v5920_v22 = vshrl.u32 %v2119_v35, 5  ;;  %v2133_v15 = vshll.u32 %v8606_v46, %v2121_v48 }
 0x197   :  { %v2124_v20 = vshll.u32 %v8611_v60, %v2121_v48  ;;  %v2125_v9 = vshrl.u32 %v8608_v34, %v5911_v55  ;;  %v2127_v41 = vshll.u32 %v8608_v34, %v2121_v48  ;;  %v2130_v25 = vshll.u32 %v8610_v62, %v2121_v48 }
 0x198   :  { %vm1901_vm10 = vcmp.lt.s32.totalorder %v5299_v7, 0  ;;  %v2128_v3 = vshrl.u32 %v8610_v62, %v5911_v55  ;;  %v2131_v12 = vshrl.u32 %v8606_v46, %v5911_v55  ;;  %v2134_v26 = vshrl.u32 %v8607_v56, %v5911_v55 }
 0x199   :  { %v2136_v50 = vshll.u32 %v8607_v56, %v2121_v48  ;;  %v8642_v38 = vand.u32 2147483647, %v5264_v16  ;;  %v1978_v18 = vor.u32 4788187, %v1977_v5  ;;  %v2066_v35 = vshll.u32 %v5909_v0, 30 }
 0x19a   :  { %v2114_v24 = vand.u32 8388607, %v8508_v21  ;;  %v2137_v40 = vshrl.u32 %v8609_v37, %v5911_v55  ;;  %vm3948_vm12 = vcmp.lt.s32.totalorder %v3947_v43, 0  ;;  %v794_v57 = vsel %vm788_vm9, %v791_v27, %v793_v17 }
 0x19b   :  { %vm5938_vm11 = vcmp.le.f32.partialorder %v8642_v38, 0.7853982  ;;  %v813_v48 = vadd.s32 1, %v5895_v54  ;;  %v2135_v19 = vor.u32 %v2134_v26, %v2133_v15  ;;  %vm812_vm13 = vc.u32 %v5902_v31, %v5894_v39 }
 0x19c   :  { %v2126_v38 = vor.u32 %v2125_v9, %v2124_v20  ;;  %v2129_v5 = vor.u32 %v2128_v3, %v2127_v41  ;;  %v863_v51 = vshrl.u32 %v862_v49, 23  ;;  %v8645_v30 = vand.u32 2147483647, %v5299_v7 }
 0x19d   :  { %v2132_v61 = vor.u32 %v2131_v12, %v2130_v25  ;;  %v2138_v52 = vor.u32 %v2137_v40, %v2136_v50  ;;  %vm2139_vm15 = vcmp.lt.s32.totalorder %v5920_v22, 1  ;;  %vm2142_vm0 = vcmp.lt.s32.totalorder %v5920_v22, 4 }
 0x19e   :  { %vm5954_vm14 = vcmp.le.f32.partialorder %v8645_v30, 0.7853982  ;;  %v632_v13 = vsel %vm549_vm3, %v631_v10, %v5863_v2  ;;  %v5964_v27 = vsub.s32 %v5857_v44, %v2066_v35  ;;  %v2115_v49 = vor.u32 8388608, %v2114_v24 }
 0x19f   :  { %vm2141_vm5 = vcmp.lt.s32.totalorder %v5920_v22, 3  ;;  %v1979_v30 = vand.u32 2147483647, %v1978_v18  ;;  %v1981_v17 = vcvt.s32.f32 %v5904_v11  ;;  %v814_v15 = vsel %vm812_vm13, %v813_v48, %v5895_v54 }
 0x1a0   :  { %v2148_v20 = vsel %vm2142_vm0, %v2135_v19, 920167782  ;;  %v5972_v9 = vsel %vm3948_vm12, 0, %v3947_v43  ;;  %v810_v41 = vmul.u32 %v5885_v33, %v794_v57  ;;  %vm2140_vm3 = vcmp.lt.s32.totalorder %v5920_v22, 2 }
 0x1a1   :  { %v2147_v44 = vsel %vm2139_vm15, %v2126_v38, %v2129_v5  ;;  %v2149_v2 = vsel %vm2141_vm5, %v2132_v61, %v2148_v20  ;;  %v2151_v10 = vsel %vm2139_vm15, %v2129_v5, %v2132_v61  ;;  %v2152_v54 = vsel %vm2142_vm0, %v2138_v52, 1326507024 }
 0x1a2   :  { %v3953_v11 = vadd.s32 4294967169, %v863_v51  ;;  %v2069_v43 = vsub.s32 0, %v5964_v27  ;;  %v5985_v25 = vadd.s32 %v814_v15, %v810_v41  ;;  %v2153_v33 = vsel %vm2141_vm5, %v2135_v19, %v2152_v54 }
 0x1a3   :  { %v5989_v3 = vshll.u32 %v2115_v49, 8  ;;  %4627 = vcosq.f32 %v5876_v47  ;;  %v636_v26 = vsel %vm5938_vm11, 0, %v5868_v14  ;;  %vm653_vm6 = vcmp.lt.s32.totalorder %v5399_v45, 0 }
 0x1a4   :  { %v2150_v52 = vsel %vm2140_vm3, %v2147_v44, %v2149_v2  ;;  %4629 = vsinq.f32 %v5876_v47  ;;  %v635_v51 = vsel %vm5938_vm11, %v5264_v16, %v632_v13  ;;  %v8648_v50 = vsub.s32 4, %v5594_v58 }
 0x1a5   :  { %v2154_v14 = vsel %vm2140_vm3, %v2151_v10, %v2153_v33  ;;  %v1982_v35 = vmul.f32 %v1981_v17, %v1979_v30  ;;  %v727_v24 = vsub.s32 4294967266, %v5972_v9  ;;  %v869_v40 = vadd.s32 1, %v3953_v11 }
 0x1a6   :  { %v1986_v18 = vsel %vm1901_vm10, %v8648_v50, %v5594_v58  ;;  %v6014_v47 = vadd.f32 %v5673_v32, %v5334_v42  ;;  %v3998_v63 = vmin.u32 %v2069_v43, %v5964_v27  ;;  %v816_v57 = vadd.s32 536870912, %v5985_v25  ;;  %v6023_v58 = vpop.f32.mrb[16].mxu1 }
 0x1a7   :  { %v6019_v48 = vmul.u32.u64.low %v5989_v3, %v2150_v52  ;;  %v6020_v19 = vmul.u32.u64.high %v5989_v3, %v2150_v52, %v6019_v48  ;;  %v2123_v13 = vshrl.u32 %v8611_v60, %v5911_v55  ;;  %vm870_vm7 = vcmp.gt.s32.totalorder %v869_v40, 0  ;;  %v4254_v42 = vpop.f32.mrb[17].mxu1 }
 0x1a8   :  { %8649 = vst [vmem:[#allocation47_spill] sm:$0xff] %v6014_v47  ;;  %v6028_v49 = vmul.u32.u64.low %v5989_v3, %v2154_v14  ;;  %v6029_v30 = vmul.u32.u64.high %v5989_v3, %v2154_v14, %v6028_v49  ;;  %v1988_v17 = vsel %vm5954_vm14, 0, %v1986_v18  ;;  %v737_v15 = vsub.s32 4, %v5766_v4 }
 0x1a9   :  { %v2144_v20 = vsel %vm2142_vm0, %v2132_v61, 2102212464  ;;  %v871_v41 = vsel %vm870_vm7, %v869_v40, 0  ;;  %4631 = vcosq.f32 %v635_v51  ;;  %v1983_v44 = vxor.u32 2147483648, %v1982_v35 }
 0x1aa   :  { %v723_v2 = vsub.s32 32, %v5972_v9  ;;  %v873_v55 = vand.u32 31, %v871_v41  ;;  %v707_v10 = vadd.s32 %v5630_v53, %v5627_v59  ;;  %v728_v54 = vadd.s32 127, %v727_v24 }
 0x1ab   :  { %v2071_v11 = vclz %v3998_v63  ;;  %v6039_v43 = vshrl.u32 %v816_v57, 30  ;;  %v2143_v33 = vsel %vm2139_vm15, %v2123_v13, %v2126_v38  ;;  %v2145_v52 = vsel %vm2141_vm5, %v2129_v5, %v2144_v20 }
 0x1ac   :  { %v6045_v61 = vsub.s32 32, %v873_v55  ;;  %v2214_v50 = vand.u32 2139095040, %v6014_v47  ;;  %4633 = vsinq.f32 %v635_v51  ;;  %v6048_v18 = vadd.s32 3, %v636_v26 }
 0x1ad   :  { %v6050_v14 = vadd.s32 3, %v1988_v17  ;;  %v6055_v59 = vsel %vm653_vm6, %v737_v15, %v5766_v4  ;;  %v6057_v53 = vpop.eup %4627  ;;  %v1984_v38 = vsel %vm1901_vm10, %v1983_v44, %v1982_v35  ;;  %v724_v5 = vshll.u32 %v5815_v8, %v5972_v9 }
 0x1ae   :  { %8650 = vst [vmem:[#allocation48_spill] sm:$0xff] %v6048_v18  ;;  %8652 = vst [vmem:[#allocation50_spill] sm:$0xff] %v6057_v53  ;;  %v725_v24 = vshrl.u32 %v707_v10, %v723_v2  ;;  %v8513_v51 = vand.u32 2147483647, %v5890_v1  ;;  %v6064_v26 = vpop.eup %4629  ;;  %v729_v40 = vshll.u32 %v728_v54, 23  ;;  %v3999_v63 = vadd.s32 4294967294, %v2071_v11 }
 0x1af   :  { %8651 = vst [vmem:[#allocation49_spill] sm:$0xff] %v6050_v14  ;;  %8653 = vst [vmem:[#allocation51_spill] sm:$0xff] %v6064_v26  ;;  %v818_v57 = vshll.u32 %v6039_v43, 30  ;;  %v2146_v4 = vsel %vm2140_vm3, %v2143_v33, %v2145_v52  ;;  %vm2164_vm8 = vc.u32 %v6029_v30, %v6019_v48  ;;  %v2165_v35 = vadd.s32 1, %v6020_v19 }
 0x1b0   :  { %v886_v8 = vshrl.u32 %v8607_v56, %v6045_v61  ;;  %v2215_v9 = vshrl.u32 %v2214_v50, 23  ;;  %v877_v13 = vshrl.u32 %v8608_v34, %v6045_v61  ;;  %v880_v49 = vshrl.u32 %v8610_v62, %v6045_v61 }
 0x1b1   :  { %v883_v42 = vshrl.u32 %v8606_v46, %v6045_v61  ;;  %v885_v22 = vshll.u32 %v8606_v46, %v873_v55  ;;  %v2162_v17 = vmul.u32 %v5989_v3, %v2146_v4  ;;  %v6082_v15 = vshrl.u32 %v871_v41, 5 }
 0x1b2   :  { %v888_v20 = vshll.u32 %v8607_v56, %v873_v55  ;;  %v889_v44 = vshrl.u32 %v8609_v37, %v6045_v61  ;;  %v876_v2 = vshll.u32 %v8611_v60, %v873_v55  ;;  %v879_v10 = vshll.u32 %v8608_v34, %v873_v55 }
 0x1b3   :  { %v882_v54 = vshll.u32 %v8610_v62, %v873_v55  ;;  %v887_v11 = vor.u32 %v886_v8, %v885_v22  ;;  %v6090_v33 = vpop.eup %4631  ;;  %vm4000_vm9 = vcmp.lt.s32.totalorder %v3999_v63, 0  ;;  %v2166_v3 = vsel %vm2164_vm8, %v2165_v35, %v6020_v19 }
 0x1b4   :  { %8654 = vst [vmem:[#allocation52_spill] sm:$0xff] %v6090_v33  ;;  %v890_v41 = vor.u32 %v889_v44, %v888_v20  ;;  %v4005_v52 = vadd.s32 4294967169, %v2215_v9  ;;  %v866_v50 = vand.u32 8388607, %v8513_v51  ;;  %v6098_v4 = vor.u32 %v877_v13, %v876_v2  ;;  %v6213_v33 = vpop.f32.mrb[18].mxu0 }
 0x1b5   :  { %v6100_v12 = vor.u32 %v880_v49, %v879_v10  ;;  %v884_v53 = vor.u32 %v883_v42, %v882_v54  ;;  %v6105_v55 = vsel %vm5954_vm14, %v5299_v7, %v1984_v38  ;;  %v6107_v8 = vor.u32 %v725_v24, %v724_v5 }
 0x1b6   :  { %v2059_v19 = vadd.s32 %v5771_v6, %v5789_v36  ;;  %vm894_vm4 = vcmp.lt.s32.totalorder %v6082_v15, 4  ;;  %v6112_v35 = vpop.eup %4633  ;;  %v6114_v9 = vsel %vm4000_vm9, 0, %v3999_v63  ;;  %v6117_v13 = vsub.s32 %v5985_v25, %v818_v57 }
 0x1b7   :  { %8655 = vst [vmem:[#allocation53_spill] sm:$0xff] %v6112_v35  ;;  %v6119_v49 = vadd.s32 %v2166_v3, %v2162_v17  ;;  %v900_v21 = vsel %vm894_vm4, %v887_v11, 920167782  ;;  %vm891_vm10 = vcmp.lt.s32.totalorder %v6082_v15, 1  ;;  %vm893_vm11 = vcmp.lt.s32.totalorder %v6082_v15, 3  ;;  %v8656_v17 = vld [vmem:[#allocation33_spill] sm:$0xff] }
 0x1b8   :  { %v904_v6 = vsel %vm894_vm4, %v890_v41, 1326507024  ;;  %v2221_v36 = vadd.s32 1, %v4005_v52  ;;  %v6127_v38 = vor.u32 4788187, %v729_v40  ;;  %v867_v5 = vor.u32 8388608, %v866_v50 }
 0x1b9   :  { %v899_v25 = vsel %vm891_vm10, %v6098_v4, %v6100_v12  ;;  %v901_v24 = vsel %vm893_vm11, %v884_v53, %v900_v21  ;;  %v2075_v63 = vsub.s32 32, %v6114_v9  ;;  %v2079_v57 = vsub.s32 4294967266, %v6114_v9 }
 0x1ba   :  { %v903_v42 = vsel %vm891_vm10, %v6100_v12, %v884_v53  ;;  %v905_v40 = vsel %vm893_vm11, %v887_v11, %v904_v6  ;;  %v821_v22 = vsub.s32 0, %v6117_v13  ;;  %vm892_vm12 = vcmp.lt.s32.totalorder %v6082_v15, 2 }
 0x1bb   :  { %vm2222_vm13 = vcmp.gt.s32.totalorder %v2221_v36, 0  ;;  %v6146_v20 = vadd.f32 %v5673_v32, %v8656_v17  ;;  %v2168_v44 = vadd.s32 536870912, %v6119_v49  ;;  %v902_v2 = vsel %vm892_vm12, %v899_v25, %v901_v24 }
 0x1bc   :  { %v8512_v10 = vand.u32 2147483647, %v6014_v47  ;;  %v2223_v54 = vsel %vm2222_vm13, %v2221_v36, 0  ;;  %v733_v3 = vcvt.s32.f32 %v6107_v8  ;;  %v906_v11 = vsel %vm892_vm12, %v903_v42, %v905_v40 }
 0x1bd   :  { %8657 = vst [vmem:[#allocation33_spill] sm:$0xff] %v6146_v20  ;;  %v6155_v41 = vshll.u32 %v867_v5, 8  ;;  %v2225_v52 = vand.u32 31, %v2223_v54  ;;  %v731_v50 = vand.u32 2147483647, %v6127_v38  ;;  %v2076_v21 = vshll.u32 %v5964_v27, %v6114_v9 }
 0x1be   :  { %v2077_v6 = vshrl.u32 %v2059_v19, %v2075_v63  ;;  %v2080_v17 = vadd.s32 127, %v2079_v57  ;;  %v3950_v25 = vmin.u32 %v821_v22, %v6117_v13  ;;  %v6168_v42 = vshrl.u32 %v2168_v44, 30 }
 0x1bf   :  { %v6162_v24 = vmul.u32.u64.low %v6155_v41, %v902_v2  ;;  %v6163_v36 = vmul.u32.u64.high %v6155_v41, %v902_v2, %v6162_v24  ;;  %v6166_v8 = vsub.s32 32, %v2225_v52  ;;  %v2218_v27 = vand.u32 8388607, %v8512_v10 }
 0x1c0   :  { %v6171_v5 = vmul.u32.u64.low %v6155_v41, %v906_v11  ;;  %v6172_v40 = vmul.u32.u64.high %v6155_v41, %v906_v11, %v6171_v5  ;;  %v875_v19 = vshrl.u32 %v8611_v60, %v6045_v61  ;;  %v896_v9 = vsel %vm894_vm4, %v884_v53, 2102212464 }
 0x1c1   :  { %v2228_v38 = vshll.u32 %v8611_v60, %v2225_v52  ;;  %v2231_v63 = vshll.u32 %v8608_v34, %v2225_v52  ;;  %v6182_v57 = vshrl.u32 %v2223_v54, 5  ;;  %v2229_v22 = vshrl.u32 %v8608_v34, %v6166_v8 }
 0x1c2   :  { %v2232_v44 = vshrl.u32 %v8610_v62, %v6166_v8  ;;  %v2234_v2 = vshll.u32 %v8610_v62, %v2225_v52  ;;  %v2081_v11 = vshll.u32 %v2080_v17, 23  ;;  %v823_v5 = vclz %v3950_v25 }
 0x1c3   :  { %v2235_v61 = vshrl.u32 %v8606_v46, %v6166_v8  ;;  %v2237_v53 = vshll.u32 %v8606_v46, %v2225_v52  ;;  %v8658_v10 = vand.u32 2147483647, %v5399_v45  ;;  %vm2005_vm15 = vcmp.lt.s32.totalorder %v5506_v23, 0 }
 0x1c4   :  { %v2170_v51 = vshll.u32 %v6168_v42, 30  ;;  %v895_v17 = vsel %vm891_vm10, %v875_v19, %v6098_v4  ;;  %v2219_v25 = vor.u32 8388608, %v2218_v27  ;;  %v2238_v7 = vshrl.u32 %v8607_v56, %v6166_v8  ;;  %v4218_v27 = vpop.f32.mrb[19].mxu0 }
 0x1c5   :  { %vm6194_vm14 = vcmp.le.f32.partialorder %v8658_v10, 0.7853982  ;;  %v897_v26 = vsel %vm893_vm11, %v6100_v12, %v896_v9  ;;  %v6208_v10 = vor.u32 %v2229_v22, %v2228_v38  ;;  %v6210_v14 = vor.u32 %v2232_v44, %v2231_v63 }
 0x1c6   :  { %v2240_v16 = vshll.u32 %v8607_v56, %v2225_v52  ;;  %v2236_v35 = vor.u32 %v2235_v61, %v2234_v2  ;;  %v2239_v18 = vor.u32 %v2238_v7, %v2237_v53  ;;  %v2241_v4 = vshrl.u32 %v8609_v37, %v6166_v8 }
 0x1c7   :  { %vm2243_vm0 = vcmp.lt.s32.totalorder %v6182_v57, 1  ;;  %v3951_v19 = vadd.s32 4294967294, %v823_v5  ;;  %v917_v29 = vadd.s32 1, %v6163_v36  ;;  %vm2245_vm5 = vcmp.lt.s32.totalorder %v6182_v57, 3 }
 0x1c8   :  { %vm2246_vm3 = vcmp.lt.s32.totalorder %v6182_v57, 4  ;;  %v734_v12 = vmul.f32 %v733_v3, %v731_v50  ;;  %v2089_v52 = vsub.s32 4, %v5909_v0  ;;  %vm916_vm7 = vc.u32 %v6172_v40, %v6162_v24 }
 0x1c9   :  { %v2242_v7 = vor.u32 %v2241_v4, %v2240_v16  ;;  %v8661_v9 = vand.u32 2147483647, %v5506_v23  ;;  %v898_v63 = vsel %vm892_vm12, %v895_v17, %v897_v26  ;;  %vm2244_vm9 = vcmp.lt.s32.totalorder %v6182_v57, 2 }
 0x1ca   :  { %v2251_v3 = vsel %vm2243_vm0, %v6208_v10, %v6210_v14  ;;  %v2252_v50 = vsel %vm2246_vm3, %v2239_v18, 920167782  ;;  %v2078_v16 = vor.u32 %v2077_v6, %v2076_v21  ;;  %v2082_v22 = vor.u32 4788187, %v2081_v11 }
 0x1cb   :  { %vm6226_vm8 = vcmp.le.f32.partialorder %v8661_v9, 0.7853982  ;;  %v6240_v44 = vsub.s32 %v6119_v49, %v2170_v51  ;;  %v2253_v2 = vsel %vm2245_vm5, %v2236_v35, %v2252_v50  ;;  %vm3952_vm4 = vcmp.lt.s32.totalorder %v3951_v19, 0 }
 0x1cc   :  { %v918_v26 = vsel %vm916_vm7, %v917_v29, %v6163_v36  ;;  %v6245_v15 = vshll.u32 %v2219_v25, 8  ;;  %v966_v5 = vand.u32 2139095040, %v6146_v20  ;;  %v914_v61 = vmul.u32 %v6155_v41, %v898_v63 }
 0x1cd   :  { %v2254_v53 = vsel %vm2244_vm9, %v2251_v3, %v2253_v2  ;;  %v2255_v51 = vsel %vm2243_vm0, %v6210_v14, %v2236_v35  ;;  %v2256_v49 = vsel %vm2246_vm3, %v2242_v7, 1326507024  ;;  %4635 = vcosq.f32 %v6105_v55 }
 0x1ce   :  { %v735_v21 = vxor.u32 2147483648, %v734_v12  ;;  %v740_v29 = vsel %vm6194_vm14, 0, %v6055_v59  ;;  %v2257_v41 = vsel %vm2245_vm5, %v2239_v18, %v2256_v49  ;;  %v826_v6 = vsel %vm3952_vm4, 0, %v3951_v19 }
 0x1cf   :  { %v2173_v36 = vsub.s32 0, %v6240_v44  ;;  %v6263_v11 = vadd.s32 %v918_v26, %v914_v61  ;;  %v2258_v17 = vsel %vm2244_vm9, %v2255_v51, %v2257_v41  ;;  %v2090_v25 = vsel %vm2005_vm15, %v2089_v52, %v5909_v0 }
 0x1d0   :  { %v6271_v4 = vmul.u32.u64.low %v6245_v15, %v2254_v53  ;;  %v6272_v27 = vmul.u32.u64.high %v6245_v15, %v2254_v53, %v6271_v4  ;;  %v967_v59 = vshrl.u32 %v966_v5, 23  ;;  %v2083_v7 = vand.u32 2147483647, %v2082_v22 }
 0x1d1   :  { %v2085_v18 = vcvt.s32.f32 %v2078_v16  ;;  %v6276_v19 = vmul.u32.u64.low %v6245_v15, %v2258_v17  ;;  %v6277_v9 = vmul.u32.u64.high %v6245_v15, %v2258_v17, %v6276_v19  ;;  %v736_v63 = vsel %vm653_vm6, %v735_v21, %v734_v12 }
 0x1d2   :  { %v827_v3 = vsub.s32 32, %v826_v6  ;;  %v2227_v50 = vshrl.u32 %v8611_v60, %v6166_v8  ;;  %v3957_v0 = vadd.s32 4294967169, %v967_v59  ;;  %v831_v52 = vsub.s32 4294967266, %v826_v6  ;;  %v8666_v59 = vld [vmem:[#allocation35_spill] sm:$0xff] }
 0x1d3   :  { %v4002_v2 = vmin.u32 %v2173_v36, %v6240_v44  ;;  %v920_v26 = vadd.s32 536870912, %v6263_v11  ;;  %v2248_v16 = vsel %vm2246_vm3, %v2236_v35, 2102212464  ;;  %4637 = vsinq.f32 %v6105_v55 }
 0x1d4   :  { %v6288_v22 = vadd.s32 3, %v740_v29  ;;  %v811_v12 = vadd.s32 %v5894_v39, %v5902_v31  ;;  %v973_v5 = vadd.s32 1, %v3957_v0  ;;  %v739_v8 = vsel %vm6194_vm14, %v5399_v45, %v736_v63  ;;  %v6304_v31 = vpop.f32.mrb[18].mxu1 }
 0x1d5   :  { %v2086_v61 = vmul.f32 %v2085_v18, %v2083_v7  ;;  %v2092_v53 = vsel %vm6226_vm8, 0, %v2090_v25  ;;  %v8520_v51 = vand.u32 2147483647, %v6146_v20  ;;  %v2247_v55 = vsel %vm2243_vm0, %v2227_v50, %v6208_v10  ;;  %v4257_v41 = vpop.f32.mrb[19].mxu1 }
 0x1d6   :  { %8664 = vst [vmem:[#allocation54_spill] sm:$0xff] %v6288_v22  ;;  %v829_v49 = vshrl.u32 %v811_v12, %v827_v3  ;;  %v2249_v39 = vsel %vm2245_vm5, %v6210_v14, %v2248_v16  ;;  %vm974_vm6 = vcmp.gt.s32.totalorder %v973_v5, 0  ;;  %v832_v35 = vadd.s32 127, %v831_v52 }
 0x1d7   :  { %v2175_v54 = vclz %v4002_v2  ;;  %v6306_v21 = vshrl.u32 %v920_v26, 30  ;;  %v975_v29 = vsel %vm974_vm6, %v973_v5, 0  ;;  %v6308_v36 = vpop.eup %4635  ;;  %v828_v17 = vshll.u32 %v6117_v13, %v826_v6 }
 0x1d8   :  { %8665 = vst [vmem:[#allocation55_spill] sm:$0xff] %v6308_v36  ;;  %v2269_v25 = vadd.s32 1, %v6272_v27  ;;  %v977_v10 = vand.u32 31, %v975_v29  ;;  %v6314_v7 = vadd.f32 %v5673_v32, %v8666_v59  ;;  %4639 = vcosq.f32 %v739_v8 }
 0x1d9   :  { %v6316_v14 = vadd.s32 3, %v2092_v53  ;;  %v2250_v18 = vsel %vm2244_vm9, %v2247_v55, %v2249_v39  ;;  %vm2268_vm10 = vc.u32 %v6277_v9, %v6271_v4  ;;  %4641 = vsinq.f32 %v739_v8 }
 0x1da   :  { %8667 = vst [vmem:[#allocation35_spill] sm:$0xff] %v6314_v7  ;;  %v2087_v19 = vxor.u32 2147483648, %v2086_v61  ;;  %v6322_v63 = vor.u32 %v829_v49, %v828_v17  ;;  %v978_v13 = vsub.s32 32, %v977_v10  ;;  %v833_v6 = vshll.u32 %v832_v35, 23 }
 0x1db   :  { %8668 = vst [vmem:[#allocation56_spill] sm:$0xff] %v6316_v14  ;;  %v4003_v3 = vadd.s32 4294967294, %v2175_v54  ;;  %v922_v50 = vshll.u32 %v6306_v21, 30  ;;  %v970_v32 = vand.u32 8388607, %v8520_v51  ;;  %v2266_v0 = vmul.u32 %v6245_v15, %v2250_v18 }
 0x1dc   :  { %v2270_v57 = vsel %vm2268_vm10, %v2269_v25, %v6272_v27  ;;  %v981_v52 = vshrl.u32 %v8608_v34, %v978_v13  ;;  %v2318_v2 = vand.u32 2139095040, %v6314_v7  ;;  %v980_v26 = vshll.u32 %v8611_v60, %v977_v10 }
 0x1dd   :  { %v983_v16 = vshll.u32 %v8608_v34, %v977_v10  ;;  %v984_v12 = vshrl.u32 %v8610_v62, %v978_v13  ;;  %v987_v5 = vshrl.u32 %v8606_v46, %v978_v13  ;;  %v6335_v8 = vpop.eup %4637  ;;  %v6337_v53 = vshrl.u32 %v975_v29, 5 }
 0x1de   :  { %8669 = vst [vmem:[#allocation57_spill] sm:$0xff] %v6335_v8  ;;  %v986_v15 = vshll.u32 %v8610_v62, %v977_v10  ;;  %v989_v27 = vshll.u32 %v8606_v46, %v977_v10  ;;  %v990_v49 = vshrl.u32 %v8607_v56, %v978_v13  ;;  %vm4004_vm11 = vcmp.lt.s32.totalorder %v4003_v3, 0 }
 0x1df   :  { %v971_v55 = vor.u32 8388608, %v970_v32  ;;  %v982_v39 = vor.u32 %v981_v52, %v980_v26  ;;  %v985_v35 = vor.u32 %v984_v12, %v983_v16  ;;  %v2088_v54 = vsel %vm2005_vm15, %v2087_v19, %v2086_v61 }
 0x1e0   :  { %v6344_v41 = vadd.s32 %v2270_v57, %v2266_v0  ;;  %v988_v17 = vor.u32 %v987_v5, %v986_v15  ;;  %v991_v25 = vor.u32 %v990_v49, %v989_v27  ;;  %v834_v59 = vor.u32 4788187, %v833_v6 }
 0x1e1   :  { %v992_v29 = vshll.u32 %v8607_v56, %v977_v10  ;;  %v993_v18 = vshrl.u32 %v8609_v37, %v978_v13  ;;  %v2319_v51 = vshrl.u32 %v2318_v2, 23  ;;  %v837_v14 = vcvt.s32.f32 %v6322_v63  ;;  %v8672_v63 = vld [vmem:[#allocation38_spill] sm:$0xff] }
 0x1e2   :  { %v6349_v36 = vsel %vm4004_vm11, 0, %v4003_v3  ;;  %v6352_v32 = vsub.s32 %v6263_v11, %v922_v50  ;;  %vm995_vm12 = vcmp.lt.s32.totalorder %v6337_v53, 1  ;;  %v6355_v61 = vpop.eup %4639  ;;  %vm998_vm13 = vcmp.lt.s32.totalorder %v6337_v53, 4 }
 0x1e3   :  { %8670 = vst [vmem:[#allocation58_spill] sm:$0xff] %v6355_v61  ;;  %v994_v19 = vor.u32 %v993_v18, %v992_v29  ;;  %v1003_v10 = vsel %vm995_vm12, %v982_v39, %v985_v35  ;;  %v6360_v6 = vshll.u32 %v971_v55, 8  ;;  %v6362_v0 = vpop.eup %4641  ;;  %vm757_vm14 = vcmp.lt.s32.totalorder %v8672_v63, 0 }
 0x1e4   :  { %8671 = vst [vmem:[#allocation59_spill] sm:$0xff] %v6362_v0  ;;  %v2272_v3 = vadd.s32 536870912, %v6344_v41  ;;  %vm997_vm15 = vcmp.lt.s32.totalorder %v6337_v53, 3  ;;  %v1004_v11 = vsel %vm998_vm13, %v991_v25, 920167782  ;;  %v1007_v50 = vsel %vm995_vm12, %v985_v35, %v988_v17 }
 0x1e5   :  { %vm996_vm0 = vcmp.lt.s32.totalorder %v6337_v53, 2  ;;  %v1005_v57 = vsel %vm997_vm15, %v988_v17, %v1004_v11  ;;  %v1008_v52 = vsel %vm998_vm13, %v994_v19, 1326507024  ;;  %v4009_v2 = vadd.s32 4294967169, %v2319_v51 }
 0x1e6   :  { %v835_v26 = vand.u32 2147483647, %v834_v59  ;;  %v2183_v16 = vsub.s32 4294967266, %v6349_v36  ;;  %v1006_v12 = vsel %vm996_vm0, %v1003_v10, %v1005_v57  ;;  %v1009_v5 = vsel %vm997_vm15, %v991_v25, %v1008_v52 }
 0x1e7   :  { %v1000_v15 = vsel %vm998_vm13, %v988_v17, 2102212464  ;;  %v1010_v27 = vsel %vm996_vm0, %v1007_v50, %v1009_v5  ;;  %v6386_v49 = vmul.u32.u64.low %v6360_v6, %v1006_v12  ;;  %v6387_v55 = vmul.u32.u64.high %v6360_v6, %v1006_v12, %v6386_v49 }
 0x1e8   :  { %v925_v51 = vsub.s32 0, %v6352_v32  ;;  %v979_v59 = vshrl.u32 %v8611_v60, %v978_v13  ;;  %v6393_v29 = vmul.u32.u64.low %v6360_v6, %v1010_v27  ;;  %v6394_v18 = vmul.u32.u64.high %v6360_v6, %v1010_v27, %v6393_v29  ;;  %v6428_v27 = vpop.f32.mrb[20].mxu0 }
 0x1e9   :  { %v2091_v17 = vsel %vm6226_vm8, %v5506_v23, %v2088_v54  ;;  %v841_v25 = vsub.s32 4, %v6039_v43  ;;  %v6400_v19 = vshrl.u32 %v2272_v3, 30  ;;  %v2325_v10 = vadd.s32 1, %v4009_v2  ;;  %v6434_v29 = vld [vmem:[%s8447_s2] ss:$0 sm:$0xff] }
 0x1ea   :  { %v838_v11 = vmul.f32 %v837_v14, %v835_v26  ;;  %v999_v50 = vsel %vm995_vm12, %v979_v59, %v982_v39  ;;  %v1001_v13 = vsel %vm997_vm15, %v985_v35, %v1000_v15  ;;  %v8522_v57 = vand.u32 2147483647, %v6314_v7 }
 0x1eb   :  { %v2163_v52 = vadd.s32 %v6019_v48, %v6029_v30  ;;  %v2179_v38 = vsub.s32 32, %v6349_v36  ;;  %v1021_v54 = vadd.s32 1, %v6387_v55  ;;  %vm2326_vm5 = vcmp.gt.s32.totalorder %v2325_v10, 0 }
 0x1ec   :  { %4643 = vcosq.f32 %v2091_v17  ;;  %v2184_v3 = vadd.s32 127, %v2183_v16  ;;  %v3954_v14 = vmin.u32 %v925_v51, %v6352_v32  ;;  %vm1020_vm3 = vc.u32 %v6394_v18, %v6386_v49 }
 0x1ed   :  { %v6417_v39 = vsel %vm757_vm14, %v841_v25, %v6039_v43  ;;  %v2274_v35 = vshll.u32 %v6400_v19, 30  ;;  %v1002_v48 = vsel %vm996_vm0, %v999_v50, %v1001_v13  ;;  %v2327_v30 = vsel %vm2326_vm5, %v2325_v10, 0 }
 0x1ee   :  { %4645 = vsinq.f32 %v2091_v17  ;;  %v839_v2 = vxor.u32 2147483648, %v838_v11  ;;  %v2322_v16 = vand.u32 8388607, %v8522_v57  ;;  %v2180_v12 = vshll.u32 %v6240_v44, %v6349_v36  ;;  %v8673_v17 = vld [vmem:[#allocation37_spill] sm:$0xff]  ;;  %v4221_v44 = vpop.f32.mrb[21].mxu0 }
 0x1ef   :  { %v2181_v5 = vshrl.u32 %v2163_v52, %v2179_v38  ;;  %v1022_v43 = vsel %vm1020_vm3, %v1021_v54, %v6387_v55  ;;  %v2329_v15 = vand.u32 31, %v2327_v30  ;;  %v2185_v51 = vshll.u32 %v2184_v3, 23 }
 0x1f0   :  { %v927_v53 = vclz %v3954_v14  ;;  %v1018_v59 = vmul.u32 %v6360_v6, %v1002_v48  ;;  %v6438_v25 = vadd.f32 %v6434_v29, %v8673_v17  ;;  %v6441_v36 = vsub.s32 %v6344_v41, %v2274_v35 }
 0x1f1   :  { %v2330_v55 = vsub.s32 32, %v2329_v15  ;;  %v2332_v10 = vshll.u32 %v8611_v60, %v2329_v15  ;;  %v2335_v50 = vshll.u32 %v8608_v34, %v2329_v15  ;;  %v2323_v6 = vor.u32 8388608, %v2322_v16 }
 0x1f2   :  { %v6445_v13 = vadd.s32 %v1022_v43, %v1018_v59  ;;  %v6447_v52 = vshrl.u32 %v2327_v30, 5  ;;  %v2341_v38 = vshll.u32 %v8606_v46, %v2329_v15  ;;  %v2338_v14 = vshll.u32 %v8610_v62, %v2329_v15  ;;  %v8674_v30 = vld [vmem:[#allocation42_spill] sm:$0xff] }
 0x1f3   :  { %v2333_v54 = vshrl.u32 %v8608_v34, %v2330_v55  ;;  %v2336_v3 = vshrl.u32 %v8610_v62, %v2330_v55  ;;  %v2339_v41 = vshrl.u32 %v8606_v46, %v2330_v55  ;;  %v840_v35 = vsel %vm757_vm14, %v839_v2, %v838_v11 }
 0x1f4   :  { %v2182_v48 = vor.u32 %v2181_v5, %v2180_v12  ;;  %v2342_v43 = vshrl.u32 %v8607_v56, %v2330_v55  ;;  %v2344_v16 = vshll.u32 %v8607_v56, %v2329_v15  ;;  %vm2109_vm7 = vcmp.lt.s32.totalorder %v8674_v30, 0 }
 0x1f5   :  { %v2334_v59 = vor.u32 %v2333_v54, %v2332_v10  ;;  %v2337_v17 = vor.u32 %v2336_v3, %v2335_v50  ;;  %v2345_v44 = vshrl.u32 %v8609_v37, %v2330_v55  ;;  %v1070_v57 = vand.u32 2139095040, %v6438_v25 }
 0x1f6   :  { %v6461_v26 = vpop.eup %4643  ;;  %v2186_v23 = vor.u32 4788187, %v2185_v51  ;;  %v2277_v8 = vsub.s32 0, %v6441_v36  ;;  %v2343_v45 = vor.u32 %v2342_v43, %v2341_v38  ;;  %vm2347_vm8 = vcmp.lt.s32.totalorder %v6447_v52, 1 }
 0x1f7   :  { %8675 = vst [vmem:[#allocation37_spill] sm:$0xff] %v6461_v26  ;;  %v8676_v11 = vand.u32 2147483647, %v8672_v63  ;;  %v3955_v12 = vadd.s32 4294967294, %v927_v53  ;;  %v1024_v5 = vadd.s32 536870912, %v6445_v13  ;;  %v2340_v15 = vor.u32 %v2339_v41, %v2338_v14 }
 0x1f8   :  { %v6472_v10 = vshll.u32 %v2323_v6, 8  ;;  %v6474_v50 = vpop.eup %4645  ;;  %v2331_v51 = vshrl.u32 %v8611_v60, %v2330_v55  ;;  %v2346_v54 = vor.u32 %v2345_v44, %v2344_v16  ;;  %vm2349_vm4 = vcmp.lt.s32.totalorder %v6447_v52, 3 }
 0x1f9   :  { %vm6467_vm9 = vcmp.le.f32.partialorder %v8676_v11, 0.7853982  ;;  %8679 = vst [vmem:[#allocation60_spill] sm:$0xff] %v6474_v50  ;;  %vm2350_vm6 = vcmp.lt.s32.totalorder %v6447_v52, 4  ;;  %v8680_v38 = vand.u32 2147483647, %v8674_v30  ;;  %v2355_v6 = vsel %vm2347_vm8, %v2334_v59, %v2337_v17 }
 0x1fa   :  { %vm2348_vm11 = vcmp.lt.s32.totalorder %v6447_v52, 2  ;;  %v2352_v53 = vsel %vm2350_vm6, %v2340_v15, 2102212464  ;;  %v1071_v55 = vshrl.u32 %v1070_v57, 23  ;;  %v2187_v14 = vand.u32 2147483647, %v2186_v23 }
 0x1fb   :  { %vm6481_vm10 = vcmp.le.f32.partialorder %v8680_v38, 0.7853982  ;;  %v2189_v41 = vcvt.s32.f32 %v2182_v48  ;;  %v4006_v43 = vmin.u32 %v2277_v8, %v6441_v36  ;;  %v2356_v16 = vsel %vm2350_vm6, %v2343_v45, 920167782 }
 0x1fc   :  { %vm3956_vm12 = vcmp.lt.s32.totalorder %v3955_v12, 0  ;;  %v6493_v44 = vshrl.u32 %v1024_v5, 30  ;;  %v2357_v11 = vsel %vm2349_vm4, %v2340_v15, %v2356_v16  ;;  %v2359_v38 = vsel %vm2347_vm8, %v2337_v17, %v2340_v15 }
 0x1fd   :  { %vm861_vm13 = vcmp.lt.s32.totalorder %v5890_v1, 0  ;;  %v2351_v23 = vsel %vm2347_vm8, %v2331_v51, %v2334_v59  ;;  %v2353_v8 = vsel %vm2349_vm4, %v2337_v17, %v2352_v53  ;;  %v2358_v57 = vsel %vm2348_vm11, %v2355_v6, %v2357_v11 }
 0x1fe   :  { %v2360_v48 = vsel %vm2350_vm6, %v2346_v54, 1326507024  ;;  %v6511_v16 = vmul.u32.u64.low %v6472_v10, %v2358_v57  ;;  %v6512_v15 = vmul.u32.u64.high %v6472_v10, %v2358_v57, %v6511_v16  ;;  %v3961_v26 = vadd.s32 4294967169, %v1071_v55 }
 0x1ff   :  { %v2361_v5 = vsel %vm2349_vm4, %v2343_v45, %v2360_v48  ;;  %v2190_v50 = vmul.f32 %v2189_v41, %v2187_v14  ;;  %v6515_v59 = vsel %vm3956_vm12, 0, %v3955_v12  ;;  %v2279_v51 = vclz %v4006_v43 }
 0x200   :  { %v2362_v17 = vsel %vm2348_vm11, %v2359_v38, %v2361_v5  ;;  %v8528_v54 = vand.u32 2147483647, %v6438_v25  ;;  %v1077_v45 = vadd.s32 1, %v3961_v26  ;;  %v843_v11 = vsel %vm6467_vm9, %v8672_v63, %v840_v35  ;;  %v6542_v38 = vpop.f32.mrb[20].mxu1 }
 0x201   :  { %v6520_v53 = vmul.u32.u64.low %v6472_v10, %v2362_v17  ;;  %v6521_v6 = vmul.u32.u64.high %v6472_v10, %v2362_v17, %v6520_v53  ;;  %v844_v12 = vsel %vm6467_vm9, 0, %v6417_v39  ;;  %v8683_v55 = vsub.s32 4, %v6168_v42  ;;  %v4260_v5 = vpop.f32.mrb[21].mxu1 }
 0x202   :  { %v2354_v41 = vsel %vm2348_vm11, %v2351_v23, %v2353_v8  ;;  %v945_v26 = vsub.s32 4, %v6306_v21  ;;  %v1026_v43 = vshll.u32 %v6493_v44, 30  ;;  %v2373_v35 = vadd.s32 1, %v6512_v15  ;;  %v6806_v52 = vpop.f32.mrb[22].mxu1 }
 0x203   :  { %v6535_v14 = vsel %vm2109_vm7, %v8683_v55, %v6168_v42  ;;  %vm1078_vm14 = vcmp.gt.s32.totalorder %v1077_v45, 0  ;;  %v2191_v39 = vxor.u32 2147483648, %v2190_v50  ;;  %v935_v2 = vsub.s32 4294967266, %v6515_v59  ;;  %8698 = vst [vmem:[#allocation67_spill] sm:$0xff] %v6806_v52 }
 0x204   :  { %v4007_v57 = vadd.s32 4294967294, %v2279_v51  ;;  %v1079_v48 = vsel %vm1078_vm14, %v1077_v45, 0  ;;  %v8684_v42 = vand.u32 2147483647, %v5890_v1  ;;  %v2370_v23 = vmul.u32 %v6472_v10, %v2354_v41 }
 0x205   :  { %vm2372_vm0 = vc.u32 %v6521_v6, %v6511_v16  ;;  %v1074_v8 = vand.u32 8388607, %v8528_v54  ;;  %v1081_v17 = vand.u32 31, %v1079_v48  ;;  %4647 = vcosq.f32 %v843_v11 }
 0x206   :  { %vm6547_vm15 = vcmp.le.f32.partialorder %v8684_v42, 0.7853982  ;;  %v6556_v53 = vadd.s32 3, %v844_v12  ;;  %v2374_v45 = vsel %vm2372_vm0, %v2373_v35, %v6512_v15  ;;  %4649 = vsinq.f32 %v843_v11  ;;  %v8688_v42 = vld [vmem:[#allocation41_spill] sm:$0xff] }
 0x207   :  { %v6565_v10 = vsel %vm861_vm13, %v945_v26, %v6306_v21  ;;  %v6568_v55 = vsub.s32 %v6445_v13, %v1026_v43  ;;  %v6570_v41 = vsub.s32 32, %v1081_v17  ;;  %v2192_v12 = vsel %vm2109_vm7, %v2191_v39, %v2190_v50 }
 0x208   :  { %8687 = vst [vmem:[#allocation61_spill] sm:$0xff] %v6556_v53  ;;  %v936_v5 = vadd.s32 127, %v935_v2  ;;  %vm4008_vm5 = vcmp.lt.s32.totalorder %v4007_v57, 0  ;;  %v6576_v54 = vadd.f32 %v6434_v29, %v8688_v42  ;;  %v6578_v15 = vadd.s32 %v2374_v45, %v2370_v23 }
 0x209   :  { %v1075_v11 = vor.u32 8388608, %v1074_v8  ;;  %v1085_v21 = vshrl.u32 %v8608_v34, %v6570_v41  ;;  %v1088_v13 = vshrl.u32 %v8610_v62, %v6570_v41  ;;  %v1084_v26 = vshll.u32 %v8611_v60, %v1081_v17 }
 0x20a   :  { %8689 = vst [vmem:[#allocation41_spill] sm:$0xff] %v6576_v54  ;;  %v1087_v43 = vshll.u32 %v8608_v34, %v1081_v17  ;;  %v1091_v50 = vshrl.u32 %v8606_v46, %v6570_v41  ;;  %v1094_v35 = vshrl.u32 %v8607_v56, %v6570_v41  ;;  %v1029_v39 = vsub.s32 0, %v6568_v55 }
 0x20b   :  { %v6591_v2 = vshrl.u32 %v1079_v48, 5  ;;  %v1090_v23 = vshll.u32 %v8610_v62, %v1081_v17  ;;  %v1093_v8 = vshll.u32 %v8606_v46, %v1081_v17  ;;  %v6595_v45 = vor.u32 %v1085_v21, %v1084_v26 }
 0x20c   :  { %v6597_v42 = vor.u32 %v1088_v13, %v1087_v43  ;;  %v1096_v51 = vshll.u32 %v8607_v56, %v1081_v17  ;;  %v1097_v63 = vshrl.u32 %v8609_v37, %v6570_v41  ;;  %v915_v53 = vadd.s32 %v6162_v24, %v6172_v40 }
 0x20d   :  { %v2376_v61 = vadd.s32 536870912, %v6578_v15  ;;  %v1095_v48 = vor.u32 %v1094_v35, %v1093_v8  ;;  %v2422_v0 = vand.u32 2139095040, %v6576_v54  ;;  %v2195_v21 = vsel %vm6481_vm10, %v8674_v30, %v2192_v12 }
 0x20e   :  { %v948_v13 = vsel %vm6547_vm15, 0, %v6565_v10  ;;  %v1092_v17 = vor.u32 %v1091_v50, %v1090_v23  ;;  %v1098_v26 = vor.u32 %v1097_v63, %v1096_v51  ;;  %v931_v43 = vsub.s32 32, %v6515_v59 }
 0x20f   :  { %v937_v22 = vshll.u32 %v936_v5, 23  ;;  %v6614_v24 = vsel %vm4008_vm5, 0, %v4007_v57  ;;  %vm1099_vm3 = vcmp.lt.s32.totalorder %v6591_v2, 1  ;;  %v6617_v40 = vpop.eup %4647  ;;  %v3958_v35 = vmin.u32 %v1029_v39, %v6568_v55 }
 0x210   :  { %8690 = vst [vmem:[#allocation62_spill] sm:$0xff] %v6617_v40  ;;  %vm1102_vm7 = vcmp.lt.s32.totalorder %v6591_v2, 4  ;;  %v1107_v10 = vsel %vm1099_vm3, %v6595_v45, %v6597_v42  ;;  %v6625_v63 = vshll.u32 %v1075_v11, 8  ;;  %v6627_v51 = vpop.eup %4649  ;;  %v6629_v12 = vshrl.u32 %v2376_v61, 30 }
 0x211   :  { %8691 = vst [vmem:[#allocation63_spill] sm:$0xff] %v6627_v51  ;;  %vm1101_vm8 = vcmp.lt.s32.totalorder %v6591_v2, 3  ;;  %v1108_v57 = vsel %vm1102_vm7, %v1095_v48, 920167782  ;;  %v2423_v5 = vshrl.u32 %v2422_v0, 23  ;;  %vm1100_vm9 = vcmp.lt.s32.totalorder %v6591_v2, 2 }
 0x212   :  { %v1109_v50 = vsel %vm1101_vm8, %v1092_v17, %v1108_v57  ;;  %v1111_v11 = vsel %vm1099_vm3, %v6597_v42, %v1092_v17  ;;  %v1112_v39 = vsel %vm1102_vm7, %v1098_v26, 1326507024  ;;  %v933_v61 = vshrl.u32 %v915_v53, %v931_v43 }
 0x213   :  { %v2287_v23 = vsub.s32 4294967266, %v6614_v24  ;;  %v1110_v8 = vsel %vm1100_vm9, %v1107_v10, %v1109_v50  ;;  %v1113_v0 = vsel %vm1101_vm8, %v1095_v48, %v1112_v39  ;;  %v1031_v30 = vclz %v3958_v35 }
 0x214   :  { %v1114_v57 = vsel %vm1100_vm9, %v1111_v11, %v1113_v0  ;;  %v6650_v40 = vmul.u32.u64.low %v6625_v63, %v1110_v8  ;;  %v6651_v51 = vmul.u32.u64.high %v6625_v63, %v1110_v8, %v6650_v40  ;;  %v2267_v53 = vadd.s32 %v6271_v4, %v6277_v9 }
 0x215   :  { %v2378_v26 = vshll.u32 %v6629_v12, 30  ;;  %v6658_v43 = vmul.u32.u64.low %v6625_v63, %v1114_v57  ;;  %v6659_v10 = vmul.u32.u64.high %v6625_v63, %v1114_v57, %v6658_v43  ;;  %v932_v48 = vshll.u32 %v6352_v32, %v6515_v59  ;;  %v8695_v59 = vld [vmem:[#allocation46_spill] sm:$0xff] }
 0x216   :  { %v938_v35 = vor.u32 4788187, %v937_v22  ;;  %v2283_v50 = vsub.s32 32, %v6614_v24  ;;  %v4013_v11 = vadd.s32 4294967169, %v2423_v5  ;;  %4651 = vcosq.f32 %v2195_v21 }
 0x217   :  { %v8692_v39 = vsel %vm6481_vm10, 0, %v6535_v14  ;;  %v6670_v4 = vadd.s32 3, %v948_v13  ;;  %v2288_v9 = vadd.s32 127, %v2287_v23  ;;  %v934_v0 = vor.u32 %v933_v61, %v932_v48 }
 0x218   :  { %v6668_v8 = vadd.s32 3, %v8692_v39  ;;  %v3959_v57 = vadd.s32 4294967294, %v1031_v30  ;;  %v1104_v43 = vsel %vm1102_vm7, %v1092_v17, 2102212464  ;;  %v2429_v32 = vadd.s32 1, %v4013_v11 }
 0x219   :  { %8694 = vst [vmem:[#allocation65_spill] sm:$0xff] %v6670_v4  ;;  %4653 = vsinq.f32 %v2195_v21  ;;  %v6675_v22 = vsub.s32 %v6578_v15, %v2378_v26  ;;  %v1083_v3 = vshrl.u32 %v8611_v60, %v6570_v41  ;;  %v6681_v14 = vadd.f32 %v6434_v29, %v8695_v59  ;;  %v6711_v59 = vpop.f32.mrb[22].mxu0 }
 0x21a   :  { %8693 = vst [vmem:[#allocation64_spill] sm:$0xff] %v6668_v8  ;;  %v939_v13 = vand.u32 2147483647, %v938_v35  ;;  %v2284_v5 = vshll.u32 %v6441_v36, %v6614_v24  ;;  %v2285_v30 = vshrl.u32 %v2267_v53, %v2283_v50  ;;  %vm2430_vm4 = vcmp.gt.s32.totalorder %v2429_v32, 0 }
 0x21b   :  { %v2289_v61 = vshll.u32 %v2288_v9, 23  ;;  %v1103_v21 = vsel %vm1099_vm3, %v1083_v3, %v6595_v45  ;;  %v1105_v15 = vsel %vm1101_vm8, %v6597_v42, %v1104_v43  ;;  %v8535_v41 = vand.u32 2147483647, %v6576_v54 }
 0x21c   :  { %v941_v17 = vcvt.s32.f32 %v934_v0  ;;  %vm3960_vm6 = vcmp.lt.s32.totalorder %v3959_v57, 0  ;;  %v1125_v23 = vadd.s32 1, %v6651_v51  ;;  %v2431_v26 = vsel %vm2430_vm4, %v2429_v32, 0 }
 0x21d   :  { %v2381_v24 = vsub.s32 0, %v6675_v22  ;;  %vm1124_vm10 = vc.u32 %v6659_v10, %v6650_v40  ;;  %v1174_v45 = vand.u32 2139095040, %v6681_v14  ;;  %v1019_v42 = vadd.s32 %v6386_v49, %v6394_v18 }
 0x21e   :  { %v6698_v53 = vmul.f32 %v941_v17, %v939_v13  ;;  %v1106_v48 = vsel %vm1100_vm9, %v1103_v21, %v1105_v15  ;;  %v2433_v35 = vand.u32 31, %v2431_v26  ;;  %v2286_v50 = vor.u32 %v2285_v30, %v2284_v5  ;;  %v4224_v5 = vpop.f32.mrb[23].mxu0 }
 0x21f   :  { %v2290_v11 = vor.u32 4788187, %v2289_v61  ;;  %v6704_v39 = vsel %vm3960_vm6, 0, %v3959_v57  ;;  %v2426_v9 = vand.u32 8388607, %v8535_v41  ;;  %v1126_v0 = vsel %vm1124_vm10, %v1125_v23, %v6651_v51 }
 0x220   :  { %v2434_v43 = vsub.s32 32, %v2433_v35  ;;  %v2436_v32 = vshll.u32 %v8611_v60, %v2433_v35  ;;  %v2439_v3 = vshll.u32 %v8608_v34, %v2433_v35  ;;  %v6713_v49 = vpop.eup %4651  ;;  %v4010_v18 = vmin.u32 %v2381_v24, %v6675_v22 }
 0x221   :  { %8696 = vst [vmem:[#allocation46_spill] sm:$0xff] %v6713_v49  ;;  %v1122_v2 = vmul.u32 %v6625_v63, %v1106_v48  ;;  %v6717_v57 = vshrl.u32 %v2431_v26, 5  ;;  %v1175_v13 = vshrl.u32 %v1174_v45, 23  ;;  %v2442_v61 = vshll.u32 %v8610_v62, %v2433_v35 }
 0x222   :  { %v2437_v30 = vshrl.u32 %v8608_v34, %v2434_v43  ;;  %v2440_v51 = vshrl.u32 %v8610_v62, %v2434_v43  ;;  %v2443_v21 = vshrl.u32 %v8606_v46, %v2434_v43  ;;  %v2291_v17 = vand.u32 2147483647, %v2290_v11 }
 0x223   :  { %v6723_v15 = vpop.eup %4653  ;;  %v2293_v23 = vcvt.s32.f32 %v2286_v50  ;;  %v6725_v41 = vadd.s32 %v1126_v0, %v1122_v2  ;;  %v2445_v63 = vshll.u32 %v8606_v46, %v2433_v35  ;;  %v1035_v26 = vsub.s32 32, %v6704_v39 }
 0x224   :  { %8697 = vst [vmem:[#allocation66_spill] sm:$0xff] %v6723_v15  ;;  %v2427_v24 = vor.u32 8388608, %v2426_v9  ;;  %v2438_v45 = vor.u32 %v2437_v30, %v2436_v32  ;;  %v2441_v48 = vor.u32 %v2440_v51, %v2439_v3  ;;  %v1039_v5 = vsub.s32 4294967266, %v6704_v39 }
 0x225   :  { %v2446_v36 = vshrl.u32 %v8607_v56, %v2434_v43  ;;  %vm2451_vm11 = vcmp.lt.s32.totalorder %v6717_v57, 1  ;;  %v3965_v49 = vadd.s32 4294967169, %v1175_v13  ;;  %v2383_v8 = vclz %v4010_v18 }
 0x226   :  { %v2444_v15 = vor.u32 %v2443_v21, %v2442_v61  ;;  %v2448_v50 = vshll.u32 %v8607_v56, %v2433_v35  ;;  %v2449_v11 = vshrl.u32 %v8609_v37, %v2434_v43  ;;  %v1128_v0 = vadd.s32 536870912, %v6725_v41 }
 0x227   :  { %v2447_v2 = vor.u32 %v2446_v36, %v2445_v63  ;;  %vm2453_vm12 = vcmp.lt.s32.totalorder %v6717_v57, 3  ;;  %vm2454_vm14 = vcmp.lt.s32.totalorder %v6717_v57, 4  ;;  %vm2452_vm0 = vcmp.lt.s32.totalorder %v6717_v57, 2 }
 0x228   :  { %v2450_v9 = vor.u32 %v2449_v11, %v2448_v50  ;;  %v2459_v32 = vsel %vm2451_vm11, %v2438_v45, %v2441_v48  ;;  %v6740_v3 = vshll.u32 %v2427_v24, 8  ;;  %v943_v18 = vxor.u32 2147483648, %v6698_v53 }
 0x229   :  { %v6743_v35 = vmul.f32 %v2293_v23, %v2291_v17  ;;  %v2460_v13 = vsel %vm2454_vm14, %v2447_v2, 920167782  ;;  %v1181_v36 = vadd.s32 1, %v3965_v49  ;;  %v1037_v30 = vshrl.u32 %v1019_v42, %v1035_v26 }
 0x22a   :  { %v1040_v51 = vadd.s32 127, %v1039_v5  ;;  %v2461_v61 = vsel %vm2453_vm12, %v2444_v15, %v2460_v13  ;;  %v2463_v21 = vsel %vm2451_vm11, %v2441_v48, %v2444_v15  ;;  %v4011_v63 = vadd.s32 4294967294, %v2383_v8 }
 0x22b   :  { %v6751_v50 = vshrl.u32 %v1128_v0, 30  ;;  %v2462_v24 = vsel %vm2452_vm0, %v2459_v32, %v2461_v61  ;;  %v2464_v17 = vsel %vm2454_vm14, %v2450_v9, 1326507024  ;;  %v2435_v23 = vshrl.u32 %v8611_v60, %v2434_v43 }
 0x22c   :  { %v2465_v42 = vsel %vm2453_vm12, %v2447_v2, %v2464_v17  ;;  %v6761_v49 = vmul.u32.u64.low %v6740_v3, %v2462_v24  ;;  %v6762_v26 = vmul.u32.u64.high %v6740_v3, %v2462_v24, %v6761_v49  ;;  %v1036_v8 = vshll.u32 %v6568_v55, %v6704_v39 }
 0x22d   :  { %v2456_v5 = vsel %vm2454_vm14, %v2444_v15, 2102212464  ;;  %v2466_v11 = vsel %vm2452_vm0, %v2463_v21, %v2465_v42  ;;  %vm1182_vm5 = vcmp.gt.s32.totalorder %v1181_v36, 0  ;;  %v944_v43 = vsel %vm861_vm13, %v943_v18, %v6698_v53 }
 0x22e   :  { %v6775_v0 = vmul.u32.u64.low %v6740_v3, %v2466_v11  ;;  %v6776_v2 = vmul.u32.u64.high %v6740_v3, %v2466_v11, %v6775_v0  ;;  %v1183_v9 = vsel %vm1182_vm5, %v1181_v36, 0  ;;  %v6778_v32 = vor.u32 %v1037_v30, %v1036_v8 }
 0x22f   :  { %v1041_v13 = vshll.u32 %v1040_v51, 23  ;;  %vm4012_vm3 = vcmp.lt.s32.totalorder %v4011_v63, 0  ;;  %v8538_v55 = vand.u32 2147483647, %v6681_v14  ;;  %v1130_v39 = vshll.u32 %v6751_v50, 30 }
 0x230   :  { %v2455_v15 = vsel %vm2451_vm11, %v2435_v23, %v2438_v45  ;;  %v2457_v61 = vsel %vm2453_vm12, %v2441_v48, %v2456_v5  ;;  %v1185_v53 = vand.u32 31, %v1183_v9  ;;  %v6789_v18 = vsel %vm6547_vm15, %v5890_v1, %v944_v43 }
 0x231   :  { %v2295_v36 = vxor.u32 2147483648, %v6743_v35  ;;  %v1049_v30 = vsub.s32 4, %v6493_v44  ;;  %v6795_v51 = vadd.f32 %v6434_v29, %v6023_v58  ;;  %v6799_v45 = vadd.s32 %v6511_v16, %v6521_v6  ;;  %v4263_v58 = vpop.f32.mrb[23].mxu1 }
 0x232   :  { %v6801_v21 = vsel %vm4012_vm3, 0, %v4011_v63  ;;  %v2477_v48 = vadd.s32 1, %v6762_v26  ;;  %v6804_v24 = vsub.s32 32, %v1185_v53  ;;  %v1042_v17 = vor.u32 4788187, %v1041_v13 }
 0x233   :  { %v1045_v23 = vcvt.s32.f32 %v6778_v32  ;;  %v2458_v42 = vsel %vm2452_vm0, %v2455_v15, %v2457_v61  ;;  %vm2476_vm13 = vc.u32 %v6776_v2, %v6761_v49  ;;  %v6814_v16 = vsub.s32 %v6725_v41, %v1130_v39 }
 0x234   :  { %v1178_v6 = vand.u32 8388607, %v8538_v55  ;;  %v1189_v63 = vshrl.u32 %v8608_v34, %v6804_v24  ;;  %v1192_v8 = vshrl.u32 %v8610_v62, %v6804_v24  ;;  %vm2213_vm15 = vcmp.lt.s32.totalorder %v6014_v47, 0 }
 0x235   :  { %vm965_vm7 = vcmp.lt.s32.totalorder %v6146_v20, 0  ;;  %v2391_v57 = vsub.s32 4294967266, %v6801_v21  ;;  %v1188_v5 = vshll.u32 %v8611_v60, %v1185_v53  ;;  %v1191_v41 = vshll.u32 %v8608_v34, %v1185_v53 }
 0x236   :  { %v1195_v11 = vshrl.u32 %v8606_v46, %v6804_v24  ;;  %v2474_v43 = vmul.u32 %v6740_v3, %v2458_v42  ;;  %v2478_v0 = vsel %vm2476_vm13, %v2477_v48, %v6762_v26  ;;  %v6831_v32 = vshrl.u32 %v1183_v9, 5 }
 0x237   :  { %v1194_v13 = vshll.u32 %v8610_v62, %v1185_v53  ;;  %v1190_v39 = vor.u32 %v1189_v63, %v1188_v5  ;;  %v1193_v15 = vor.u32 %v1192_v8, %v1191_v41  ;;  %v1197_v61 = vshll.u32 %v8606_v46, %v1185_v53 }
 0x238   :  { %v1198_v58 = vshrl.u32 %v8607_v56, %v6804_v24  ;;  %v1133_v55 = vsub.s32 0, %v6814_v16  ;;  %v1200_v4 = vshll.u32 %v8607_v56, %v1185_v53  ;;  %v1201_v3 = vshrl.u32 %v8609_v37, %v6804_v24 }
 0x239   :  { %v1196_v1 = vor.u32 %v1195_v11, %v1194_v13  ;;  %v1043_v26 = vand.u32 2147483647, %v1042_v17  ;;  %v2387_v9 = vsub.s32 32, %v6801_v21  ;;  %v1179_v48 = vor.u32 8388608, %v1178_v6 }
 0x23a   :  { %v1199_v42 = vor.u32 %v1198_v58, %v1197_v61  ;;  %v8699_v63 = vand.u32 2147483647, %v6014_v47  ;;  %v8700_v8 = vmov 0  ;;  %v8703_v5 = vand.u32 2147483647, %v6146_v20 }
 0x23b   :  { %v6854_v53 = vadd.s32 %v2478_v0, %v2474_v43  ;;  %v1202_v11 = vor.u32 %v1201_v3, %v1200_v4  ;;  %vm1203_vm4 = vcmp.lt.s32.totalorder %v6831_v32, 1  ;;  %vm1206_vm6 = vcmp.lt.s32.totalorder %v6831_v32, 4 }
 0x23c   :  { %vm6844_vm8 = vcmp.le.f32.partialorder %v8699_v63, 0.7853982  ;;  %vm6850_vm9 = vcmp.le.f32.partialorder %v8703_v5, 0.7853982  ;;  %v2392_v17 = vadd.s32 127, %v2391_v57  ;;  %vm1205_vm10 = vcmp.lt.s32.totalorder %v6831_v32, 3 }
 0x23d   :  { %v8701_v8 = vsel %vm6844_vm8, 4294967295, %v8700_v8  ;;  %v1211_v6 = vsel %vm1203_vm4, %v1190_v39, %v1193_v15  ;;  %v1212_v13 = vsel %vm1206_vm6, %v1199_v42, 920167782  ;;  %v3962_v61 = vmin.u32 %v1133_v55, %v6814_v16 }
 0x23e   :  { %8702 = vst [vmem:[#allocation68_spill] sm:$0xff] %v8701_v8  ;;  %vm1204_vm11 = vcmp.lt.s32.totalorder %v6831_v32, 2  ;;  %v1213_v4 = vsel %vm1205_vm10, %v1196_v1, %v1212_v13  ;;  %v1215_v43 = vsel %vm1203_vm4, %v1193_v15, %v1196_v1  ;;  %v1216_v0 = vsel %vm1206_vm6, %v1202_v11, 1326507024 }
 0x23f   :  { %v1214_v57 = vsel %vm1204_vm11, %v1211_v6, %v1213_v4  ;;  %v6873_v58 = vshll.u32 %v1179_v48, 8  ;;  %v2526_v3 = vand.u32 2139095040, %v6795_v51  ;;  %v2296_v55 = vsel %vm2213_vm15, %v2295_v36, %v6743_v35 }
 0x240   :  { %v1050_v63 = vsel %vm965_vm7, %v1049_v30, %v6493_v44  ;;  %v2480_v5 = vadd.s32 536870912, %v6854_v53  ;;  %v1217_v6 = vsel %vm1205_vm10, %v1199_v42, %v1216_v0  ;;  %v1046_v13 = vmul.f32 %v1045_v23, %v1043_v26 }
 0x241   :  { %v1218_v48 = vsel %vm1204_vm11, %v1215_v43, %v1217_v6  ;;  %v6888_v11 = vmul.u32.u64.low %v6873_v58, %v1214_v57  ;;  %v6889_v4 = vmul.u32.u64.high %v6873_v58, %v1214_v57, %v6888_v11  ;;  %v2388_v35 = vshll.u32 %v6675_v22, %v6801_v21 }
 0x242   :  { %v1135_v36 = vclz %v3962_v61  ;;  %v6895_v44 = vmul.u32.u64.low %v6873_v58, %v1218_v48  ;;  %v6896_v30 = vmul.u32.u64.high %v6873_v58, %v1218_v48, %v6895_v44  ;;  %v2389_v28 = vshrl.u32 %v6799_v45, %v2387_v9 }
 0x243   :  { %v2393_v42 = vshll.u32 %v2392_v17, 23  ;;  %v1208_v23 = vsel %vm1206_vm6, %v1196_v1, 2102212464  ;;  %v2527_v26 = vshrl.u32 %v2526_v3, 23  ;;  %v8706_v43 = vsub.s32 4, %v6400_v19 }
 0x244   :  { %vm2317_vm12 = vcmp.lt.s32.totalorder %v6314_v7, 0  ;;  %v6909_v22 = vshrl.u32 %v2480_v5, 30  ;;  %v1187_v21 = vshrl.u32 %v8611_v60, %v6804_v24  ;;  %4655 = vcosq.f32 %v6789_v18 }
 0x245   :  { %v6906_v57 = vsel %vm2213_vm15, %v8706_v43, %v6400_v19  ;;  %v2299_v1 = vsel %vm6844_vm8, %v6014_v47, %v2296_v55  ;;  %v1052_v45 = vsel %vm6850_vm9, 0, %v1050_v63  ;;  %v4017_v9 = vadd.s32 4294967169, %v2527_v26  ;;  %v4605_v55 = vld [vmem:[%s8448_s4] sm:$0xff]  }
 0x246   :  { %8707 = vst [vmem:[#allocation69_spill] sm:$0xff] %v6906_v57  ;;  %v1047_v17 = vxor.u32 2147483648, %v1046_v13  ;;  %v3963_v19 = vadd.s32 4294967294, %v1135_v36  ;;  %v1207_v61 = vsel %vm1203_vm4, %v1187_v21, %v1190_v39  ;;  %v1209_v0 = vsel %vm1205_vm10, %v1193_v15, %v1208_v23  ;;  %4265 = vmatpush3.bf16.msra.mxu1 %v4605_v55  ;;  %v6952_v21 = vpop.f32.mrb[24].mxu0 }
 0x247   :  { %v2390_v3 = vor.u32 %v2389_v28, %v2388_v35  ;;  %v2394_v24 = vor.u32 4788187, %v2393_v42  ;;  %v1229_v5 = vadd.s32 1, %v6889_v4  ;;  %v2533_v6 = vadd.s32 1, %v4017_v9  ;;  %8711 = vst [vmem:[#allocation72_spill] sm:$0xff] %v6952_v21 }
 0x248   :  { %4657 = vsinq.f32 %v6789_v18  ;;  %v2482_v39 = vshll.u32 %v6909_v22, 30  ;;  %vm1228_vm14 = vc.u32 %v6896_v30, %v6888_v11  ;;  %v6934_v28 = vadd.s32 3, %v1052_v45  ;;  %v4227_v45 = vpop.f32.mrb[25].mxu0 }
 0x249   :  { %v2401_v15 = vsub.s32 4, %v6629_v12  ;;  %v1210_v48 = vsel %vm1204_vm11, %v1207_v61, %v1209_v0  ;;  %vm2534_vm0 = vcmp.gt.s32.totalorder %v2533_v6, 0  ;;  %4659 = vcosq.f32 %v2299_v1 }
 0x24a   :  { %8708 = vst [vmem:[#allocation70_spill] sm:$0xff] %v6934_v28  ;;  %v1048_v18 = vsel %vm965_vm7, %v1047_v17, %v1046_v13  ;;  %vm3964_vm5 = vcmp.lt.s32.totalorder %v3963_v19, 0  ;;  %v6943_v35 = vadd.f32 %v6434_v29, %v6213_v33  ;;  %v8710_v36 = vmov 0.0  }
 0x24b   :  { %4266 = vmatprep.subr.bf16.mxu1 %v8710_v36  ;;  %v2395_v44 = vand.u32 2147483647, %v2394_v24  ;;  %v2397_v42 = vcvt.s32.f32 %v2390_v3  ;;  %v1230_v23 = vsel %vm1228_vm14, %v1229_v5, %v6889_v4  ;;  %v2535_v26 = vsel %vm2534_vm0, %v2533_v6, 0 }
 0x24c   :  { %8709 = vst [vmem:[#allocation71_spill] sm:$0xff] %v6943_v35  ;;  %4661 = vsinq.f32 %v2299_v1  ;;  %v6948_v32 = vsub.s32 %v6854_v53, %v2482_v39  ;;  %v1226_v43 = vmul.u32 %v6873_v58, %v1210_v48  ;;  %v8541_v13 = vand.u32 2147483647, %v6795_v51 }
 0x24d   :  { %v6957_v33 = vsel %vm6850_vm9, %v6146_v20, %v1048_v18  ;;  %v6962_v4 = vsel %vm2317_vm12, %v2401_v15, %v6629_v12  ;;  %v6964_v1 = vsel %vm3964_vm5, 0, %v3963_v19  ;;  %v2537_v53 = vand.u32 31, %v2535_v26 }
 0x24e   :  { %8712 = vst [vmem:[#allocation73_spill] sm:$0xff] %v6962_v4  ;;  %v1123_v58 = vadd.s32 %v6650_v40, %v6659_v10  ;;  %v6969_v17 = vadd.s32 %v1230_v23, %v1226_v43  ;;  %v1278_v41 = vand.u32 2139095040, %v6943_v35  ;;  %v6972_v61 = vpop.eup %4655  ;;  %v6974_v0 = vmul.f32 %v2397_v42, %v2395_v44 }
 0x24f   :  { %8713 = vst [vmem:[#allocation74_spill] sm:$0xff] %v6972_v61  ;;  %v2538_v3 = vsub.s32 32, %v2537_v53  ;;  %v2540_v12 = vshll.u32 %v8611_v60, %v2537_v53  ;;  %v2543_v19 = vshll.u32 %v8608_v34, %v2537_v53  ;;  %v1139_v24 = vsub.s32 32, %v6964_v1 }
 0x250   :  { %v1143_v5 = vsub.s32 4294967266, %v6964_v1  ;;  %v2485_v40 = vsub.s32 0, %v6948_v32  ;;  %v2530_v10 = vand.u32 8388607, %v8541_v13  ;;  %v6983_v6 = vshrl.u32 %v2535_v26, 5 }
 0x251   :  { %v2541_v55 = vshrl.u32 %v8608_v34, %v2538_v3  ;;  %v2544_v39 = vshrl.u32 %v8610_v62, %v2538_v3  ;;  %v2546_v15 = vshll.u32 %v8610_v62, %v2537_v53  ;;  %v1140_v18 = vshll.u32 %v6814_v16, %v6964_v1 }
 0x252   :  { %v6988_v48 = vpop.eup %4657  ;;  %v1232_v44 = vadd.s32 536870912, %v6969_v17  ;;  %v2547_v42 = vshrl.u32 %v8606_v46, %v2538_v3  ;;  %v1279_v23 = vshrl.u32 %v1278_v41, 23  ;;  %v2549_v26 = vshll.u32 %v8606_v46, %v2537_v53 }
 0x253   :  { %8714 = vst [vmem:[#allocation75_spill] sm:$0xff] %v6988_v48  ;;  %v2542_v43 = vor.u32 %v2541_v55, %v2540_v12  ;;  %v2545_v45 = vor.u32 %v2544_v39, %v2543_v19  ;;  %v2550_v63 = vshrl.u32 %v8607_v56, %v2538_v3  ;;  %v6996_v13 = vpop.eup %4659  ;;  %v1144_v9 = vadd.s32 127, %v1143_v5 }
 0x254   :  { %8715 = vst [vmem:[#allocation76_spill] sm:$0xff] %v6996_v13  ;;  %v4014_v47 = vmin.u32 %v2485_v40, %v6948_v32  ;;  %v2531_v57 = vor.u32 8388608, %v2530_v10  ;;  %v2552_v8 = vshll.u32 %v8607_v56, %v2537_v53  ;;  %v8716_v16 = vand.u32 2147483647, %v6314_v7 }
 0x255   :  { %v8717_v1 = vmov 0  ;;  %vm1069_vm13 = vcmp.lt.s32.totalorder %v6438_v25, 0  ;;  %v2548_v41 = vor.u32 %v2547_v42, %v2546_v15  ;;  %v2551_v12 = vor.u32 %v2550_v63, %v2549_v26 }
 0x256   :  { %vm7002_vm3 = vcmp.le.f32.partialorder %v8716_v16, 0.7853982  ;;  %v2553_v19 = vshrl.u32 %v8609_v37, %v2538_v3  ;;  %vm2555_vm15 = vcmp.lt.s32.totalorder %v6983_v6, 1  ;;  %v7009_v5 = vpop.eup %4661  ;;  %v1141_v40 = vshrl.u32 %v1123_v58, %v1139_v24 }
 0x257   :  { %v8718_v1 = vsel %vm7002_vm3, 4294967295, %v8717_v1  ;;  %8720 = vst [vmem:[#allocation78_spill] sm:$0xff] %v7009_v5  ;;  %vm2557_vm7 = vcmp.lt.s32.totalorder %v6983_v6, 3  ;;  %vm2558_vm9 = vcmp.lt.s32.totalorder %v6983_v6, 4  ;;  %v3969_v53 = vadd.s32 4294967169, %v1279_v23 }
 0x258   :  { %8719 = vst [vmem:[#allocation77_spill] sm:$0xff] %v8718_v1  ;;  %v7013_v10 = vshrl.u32 %v1232_v44, 30  ;;  %v2554_v55 = vor.u32 %v2553_v19, %v2552_v8  ;;  %vm2556_vm4 = vcmp.lt.s32.totalorder %v6983_v6, 2  ;;  %v2563_v63 = vsel %vm2555_vm15, %v2542_v43, %v2545_v45 }
 0x259   :  { %v8721_v39 = vand.u32 2147483647, %v6438_v25  ;;  %v1145_v58 = vshll.u32 %v1144_v9, 23  ;;  %v2487_v24 = vclz %v4014_v47  ;;  %v2539_v42 = vshrl.u32 %v8611_v60, %v2538_v3 }
 0x25a   :  { %v2564_v44 = vsel %vm2558_vm9, %v2551_v12, 920167782  ;;  %v2560_v8 = vsel %vm2558_vm9, %v2548_v41, 2102212464  ;;  %v2567_v26 = vsel %vm2555_vm15, %v2545_v45, %v2548_v41  ;;  %v7033_v16 = vshll.u32 %v2531_v57, 8 }
 0x25b   :  { %vm7020_vm6 = vcmp.le.f32.partialorder %v8721_v39, 0.7853982  ;;  %v2565_v23 = vsel %vm2557_vm7, %v2548_v41, %v2564_v44  ;;  %v2568_v47 = vsel %vm2558_vm9, %v2554_v55, 1326507024  ;;  %v8547_v3 = vand.u32 2147483647, %v6943_v35 }
 0x25c   :  { %v2566_v9 = vsel %vm2556_vm4, %v2563_v63, %v2565_v23  ;;  %v1285_v19 = vadd.s32 1, %v3969_v53  ;;  %v2399_v39 = vxor.u32 2147483648, %v6974_v0  ;;  %v1142_v13 = vor.u32 %v1141_v40, %v1140_v18 }
 0x25d   :  { %v1234_v5 = vshll.u32 %v7013_v10, 30  ;;  %v2569_v44 = vsel %vm2557_vm7, %v2551_v12, %v2568_v47  ;;  %v1146_v41 = vor.u32 4788187, %v1145_v58  ;;  %v2559_v57 = vsel %vm2555_vm15, %v2539_v42, %v2542_v43 }
 0x25e   :  { %v2561_v63 = vsel %vm2557_vm7, %v2545_v45, %v2560_v8  ;;  %v2570_v55 = vsel %vm2556_vm4, %v2567_v26, %v2569_v44  ;;  %v7055_v18 = vmul.u32.u64.low %v7033_v16, %v2566_v9  ;;  %v7056_v40 = vmul.u32.u64.high %v7033_v16, %v2566_v9, %v7055_v18 }
 0x25f   :  { %v7051_v53 = vmul.u32.u64.low %v7033_v16, %v2570_v55  ;;  %v7052_v23 = vmul.u32.u64.high %v7033_v16, %v2570_v55, %v7051_v53  ;;  %v8724_v12 = vsub.s32 4, %v6751_v50  ;;  %v4015_v45 = vadd.s32 4294967294, %v2487_v24 }
 0x260   :  { %v1282_v58 = vand.u32 8388607, %v8547_v3  ;;  %vm1286_vm10 = vcmp.gt.s32.totalorder %v1285_v19, 0  ;;  %4663 = vcosq.f32 %v6957_v33  ;;  %v7070_v42 = vsub.s32 %v6969_v17, %v1234_v5 }
 0x261   :  { %v7064_v43 = vsel %vm1069_vm13, %v8724_v12, %v6751_v50  ;;  %v1287_v8 = vsel %vm1286_vm10, %v1285_v19, 0  ;;  %v7074_v26 = vadd.f32 %v6434_v29, %v6304_v31  ;;  %4665 = vsinq.f32 %v6957_v33 }
 0x262   :  { %v2562_v24 = vsel %vm2556_vm4, %v2559_v57, %v2561_v63  ;;  %v1289_v9 = vand.u32 31, %v1287_v8  ;;  %v2400_v17 = vsel %vm2317_vm12, %v2399_v39, %v6974_v0  ;;  %v1147_v5 = vand.u32 2147483647, %v1146_v41 }
 0x263   :  { %8725 = vst [vmem:[#allocation79_spill] sm:$0xff] %v7074_v26  ;;  %v1149_v47 = vcvt.s32.f32 %v1142_v13  ;;  %vm4016_vm11 = vcmp.lt.s32.totalorder %v4015_v45, 0  ;;  %v2581_v29 = vadd.s32 1, %v7056_v40  ;;  %v1283_v33 = vor.u32 8388608, %v1282_v58 }
 0x264   :  { %v1290_v19 = vsub.s32 32, %v1289_v9  ;;  %v1237_v44 = vsub.s32 0, %v7070_v42  ;;  %v2578_v6 = vmul.u32 %v7033_v16, %v2562_v24  ;;  %vm2580_vm14 = vc.u32 %v7052_v23, %v7055_v18 }
 0x265   :  { %v2630_v0 = vand.u32 2139095040, %v7074_v26  ;;  %v1292_v13 = vshll.u32 %v8611_v60, %v1289_v9  ;;  %v1295_v41 = vshll.u32 %v8608_v34, %v1289_v9  ;;  %v1298_v57 = vshll.u32 %v8610_v62, %v1289_v9 }
 0x266   :  { %v1293_v39 = vshrl.u32 %v8608_v34, %v1290_v19  ;;  %v1296_v63 = vshrl.u32 %v8610_v62, %v1290_v19  ;;  %v1299_v55 = vshrl.u32 %v8606_v46, %v1290_v19  ;;  %v1301_v53 = vshll.u32 %v8606_v46, %v1289_v9 }
 0x267   :  { %v1302_v16 = vshrl.u32 %v8607_v56, %v1290_v19  ;;  %v2582_v12 = vsel %vm2580_vm14, %v2581_v29, %v7056_v40  ;;  %v1288_v58 = vshrl.u32 %v1287_v8, 5  ;;  %v1304_v24 = vshll.u32 %v8607_v56, %v1289_v9 }
 0x268   :  { %v1305_v50 = vshrl.u32 %v8609_v37, %v1290_v19  ;;  %v1294_v3 = vor.u32 %v1293_v39, %v1292_v13  ;;  %v1297_v31 = vor.u32 %v1296_v63, %v1295_v41  ;;  %v1300_v4 = vor.u32 %v1299_v55, %v1298_v57 }
 0x269   :  { %v1303_v20 = vor.u32 %v1302_v16, %v1301_v53  ;;  %v7108_v28 = vsel %vm7002_vm3, %v6314_v7, %v2400_v17  ;;  %v1150_v61 = vmul.f32 %v1149_v47, %v1147_v5  ;;  %v2631_v48 = vshrl.u32 %v2630_v0, 23 }
 0x26a   :  { %vm3197_vm12 = vcmask 1040384   ;;  %v7110_v21 = vpop.eup %4663  ;;  %v7113_v40 = vsel %vm4016_vm11, 0, %v4015_v45  ;;  %v7115_v8 = vadd.s32 %v2582_v12, %v2578_v6  ;;  %v1306_v9 = vor.u32 %v1305_v50, %v1304_v24 }
 0x26b   :  { %8726 = vst [vmem:[#allocation80_spill] sm:$0xff] %v7110_v21  ;;  %vm3198_vm0 = vcmask 1041408   ;;  %v7117_v29 = vpop.eup %4665  ;;  %v3966_v13 = vmin.u32 %v1237_v44, %v7070_v42  ;;  %vm1307_vm5 = vcmp.lt.s32.totalorder %v1288_v58, 1  ;;  %vm1310_vm15 = vcmp.lt.s32.totalorder %v1288_v58, 4 }
 0x26c   :  { %8727 = vst [vmem:[#allocation81_spill] sm:$0xff] %v7117_v29  ;;  %v1323_v17 = vshll.u32 %v1283_v33, 8  ;;  %v1312_v39 = vsel %vm1310_vm15, %v1300_v4, 2102212464  ;;  %v1315_v5 = vsel %vm1307_vm5, %v1294_v3, %v1297_v31  ;;  %v1316_v47 = vsel %vm1310_vm15, %v1303_v20, 920167782 }
 0x26d   :  { %v1291_v0 = vshrl.u32 %v8611_v60, %v1290_v19  ;;  %vm1309_vm7 = vcmp.lt.s32.totalorder %v1288_v58, 3  ;;  %v1319_v41 = vsel %vm1307_vm5, %v1297_v31, %v1300_v4  ;;  %v4021_v45 = vadd.s32 4294967169, %v2631_v48 }
 0x26e   :  { %v2584_v6 = vadd.s32 536870912, %v7115_v8  ;;  %vm1308_vm9 = vcmp.lt.s32.totalorder %v1288_v58, 2  ;;  %v1317_v50 = vsel %vm1309_vm7, %v1300_v4, %v1316_v47  ;;  %v1320_v57 = vsel %vm1310_vm15, %v1306_v9, 1326507024 }
 0x26f   :  { %v1311_v63 = vsel %vm1307_vm5, %v1291_v0, %v1294_v3  ;;  %v1313_v55 = vsel %vm1309_vm7, %v1297_v31, %v1312_v39  ;;  %v1318_v44 = vsel %vm1308_vm9, %v1315_v5, %v1317_v50  ;;  %v1321_v53 = vsel %vm1309_vm7, %v1303_v20, %v1320_v57  ;;  %v2952_v3 = vld [vmem:[%s8449_s3] sm:$0x3] }
 0x270   :  { %v2495_v33 = vsub.s32 4294967266, %v7113_v40  ;;  %v1322_v16 = vsel %vm1308_vm9, %v1319_v41, %v1321_v53  ;;  %v7125_v12 = vmul.u32.u64.low %v1323_v17, %v1318_v44  ;;  %v7126_v24 = vmul.u32.u64.high %v1323_v17, %v1318_v44, %v7125_v12 }
 0x271   :  { %v2475_v48 = vadd.s32 %v6761_v49, %v6776_v2  ;;  %v1239_v19 = vclz %v3966_v13  ;;  %v7131_v7 = vmul.u32.u64.low %v1323_v17, %v1322_v16  ;;  %v7132_v4 = vmul.u32.u64.high %v1323_v17, %v1322_v16, %v7131_v7 }
 0x272   :  { %v1151_v20 = vxor.u32 2147483648, %v1150_v61  ;;  %v1314_v31 = vsel %vm1308_vm9, %v1311_v63, %v1313_v55  ;;  %v2637_v9 = vadd.s32 1, %v4021_v45  ;;  %v4726_v39 = vmov 65535  }
 0x273   :  { %v3199_v5 = vsel %vm3197_vm12, 4294967295, %v4726_v39  ;;  %v2491_v47 = vsub.s32 32, %v7113_v40  ;;  %v7140_v0 = vshrl.u32 %v2584_v6, 30  ;;  %v8553_v49 = vand.u32 2147483647, %v7074_v26 }
 0x274   :  { %v3200_v2 = vsel %vm3198_vm0, %v3199_v5, 0  ;;  %v2496_v7 = vadd.s32 127, %v2495_v33  ;;  %v1333_v13 = vadd.s32 1, %v7126_v24  ;;  %vm2638_vm4 = vcmp.gt.s32.totalorder %v2637_v9, 0 }
 0x275   :  { %v3202_v41 = vand.u32 %v3200_v2, %v2952_v3  ;;  %v3967_v50 = vadd.s32 4294967294, %v1239_v19  ;;  %v1330_v58 = vmul.u32 %v1323_v17, %v1314_v31  ;;  %vm1332_vm10 = vc.u32 %v7132_v4, %v7125_v12  ;;  %v7158_v17 = vld [vmem:[%s8447_s2] ss:$0 sm:$0xff] }
 0x276   :  { %v2639_v45 = vsel %vm2638_vm4, %v2637_v9, 0  ;;  %4667 = vcosq.f32 %v7108_v28  ;;  %v1334_v57 = vsel %vm1332_vm10, %v1333_v13, %v7126_v24  ;;  %v7152_v55 = vsel %vm1069_vm13, %v1151_v20, %v1150_v61  ;;  %v8728_v9 = vld [vmem:[#allocation4_spill] sm:$0xff] }
 0x277   :  { %v2641_v63 = vand.u32 31, %v2639_v45  ;;  %4321 = vmatpush3.bf16.msra.mxu0 %v3202_v41  ;;  %v2586_v44 = vshll.u32 %v7140_v0, 30  ;;  %v1335_v53 = vadd.s32 %v1334_v57, %v1330_v58  ;;  %v7162_v33 = vadd.f32 %v7158_v17, %v6428_v27  ;;  %v8729_v27 = vld [vmem:[#allocation2_spill] sm:$0xff] }
 0x278   :  { %4434 = vmatprep.subr.bf16.mxu0 %v8710_v36  ;;  %v2492_v16 = vshll.u32 %v6948_v32, %v7113_v40  ;;  %v2493_v24 = vshrl.u32 %v2475_v48, %v2491_v47  ;;  %v7169_v61 = vadd.s32 %v6888_v11, %v6896_v30  ;;  %v2497_v3 = vshll.u32 %v2496_v7, 23 }
 0x279   :  { %v2642_v19 = vsub.s32 32, %v2641_v63  ;;  %vm3968_vm13 = vcmp.lt.s32.totalorder %v3967_v50, 0  ;;  %v1336_v20 = vadd.s32 536870912, %v1335_v53  ;;  %v2634_v31 = vand.u32 8388607, %v8553_v49 }
 0x27a   :  { %v8730_v39 = vpack.c.bf16 %v8728_v9, %v8729_v27  ;;  %v2644_v5 = vshll.u32 %v8611_v60, %v2641_v63  ;;  %v2647_v40 = vshll.u32 %v8608_v34, %v2641_v63  ;;  %v7184_v30 = vsub.s32 %v7115_v8, %v2586_v44 }
 0x27b   :  { %v2645_v32 = vshrl.u32 %v8608_v34, %v2642_v19  ;;  %v2648_v11 = vshrl.u32 %v8610_v62, %v2642_v19  ;;  %v7186_v48 = vshrl.u32 %v1336_v20, 30  ;;  %v2640_v47 = vshrl.u32 %v2639_v45, 5 }
 0x27c   :  { %4323 = vmatmul.mubr.msk.bf16.vlgmr.msra.gmra.mrb[28].mxu0 %vm69_vm1, %v8730_v39  ;;  %v1382_v2 = vand.u32 2139095040, %v7162_v33  ;;  %v2650_v7 = vshll.u32 %v8610_v62, %v2641_v63  ;;  %v2651_v13 = vshrl.u32 %v8606_v46, %v2642_v19  ;;  %v2653_v41 = vshll.u32 %v8606_v46, %v2641_v63 }
 0x27d   :  { %4326 = vmatprep.mubr.msk.bf16.mxu0 %vm4719_vm2, %v8710_v36  ;;  %v2654_v58 = vshrl.u32 %v8607_v56, %v2642_v19  ;;  %v7193_v57 = vor.u32 %v2493_v24, %v2492_v16  ;;  %v7196_v9 = vsel %vm3968_vm13, 0, %v3967_v50  ;;  %v1338_v8 = vshll.u32 %v7186_v48, 30 }
 0x27e   :  { %v2635_v44 = vor.u32 8388608, %v2634_v31  ;;  %v2646_v20 = vor.u32 %v2645_v32, %v2644_v5  ;;  %v2649_v45 = vor.u32 %v2648_v11, %v2647_v40  ;;  %v2656_v27 = vshll.u32 %v8607_v56, %v2641_v63  ;;  %v8733_v32 = vld [vmem:[#allocation6_spill] sm:$0xff] }
 0x27f   :  { %v2657_v39 = vshrl.u32 %v8609_v37, %v2642_v19  ;;  %v7201_v49 = vor.u32 4788187, %v2497_v3  ;;  %v2589_v6 = vsub.s32 0, %v7184_v30  ;;  %v7204_v1 = vsub.s32 %v1335_v53, %v1338_v8  ;;  %v8732_v3 = vld [vmem:[#allocation8_spill] sm:$0xff] }
 0x280   :  { %v2655_v16 = vor.u32 %v2654_v58, %v2653_v41  ;;  %v7206_v24 = vpop.eup %4667  ;;  %v2652_v50 = vor.u32 %v2651_v13, %v2650_v7  ;;  %vm2659_vm11 = vcmp.lt.s32.totalorder %v2640_v47, 1  ;;  %v1383_v21 = vshrl.u32 %v1382_v2, 23 }
 0x281   :  { %8731 = vst [vmem:[#allocation4_spill] sm:$0xff] %v7206_v24  ;;  %v2658_v26 = vor.u32 %v2657_v39, %v2656_v27  ;;  %v1247_v31 = vsub.s32 4294967266, %v7196_v9  ;;  %v1341_v5 = vsub.s32 0, %v7204_v1  ;;  %v2643_v63 = vshrl.u32 %v8611_v60, %v2642_v19 }
 0x282   :  { %vm2661_vm14 = vcmp.lt.s32.totalorder %v2640_v47, 3  ;;  %v8734_v40 = vpack.c.bf16 %v8732_v3, %v8733_v32  ;;  %vm2421_vm12 = vcmp.lt.s32.totalorder %v6576_v54, 0  ;;  %vm2660_vm0 = vcmp.lt.s32.totalorder %v2640_v47, 2 }
 0x283   :  { %vm2662_vm5 = vcmp.lt.s32.totalorder %v2640_v47, 4  ;;  %v2667_v53 = vsel %vm2659_vm11, %v2646_v20, %v2649_v45  ;;  %v2675_v11 = vshll.u32 %v2635_v44, 8  ;;  %v4018_v2 = vmin.u32 %v2589_v6, %v7184_v30 }
 0x284   :  { %4327 = vmatmul.mubr.msk.bf16.gmra.mrb[32].mxu0 %vm69_vm1, %v8734_v40  ;;  %v3970_v19 = vmin.u32 %v1341_v5, %v7204_v1  ;;  %v2664_v7 = vsel %vm2662_vm5, %v2652_v50, 2102212464  ;;  %v2668_v13 = vsel %vm2662_vm5, %v2655_v16, 920167782  ;;  %v2671_v58 = vsel %vm2659_vm11, %v2649_v45, %v2652_v50 }
 0x285   :  { %4330 = vmatprep.mubr.msk.bf16.mxu0 %vm4719_vm2, %v8710_v36  ;;  %v2669_v41 = vsel %vm2661_vm14, %v2652_v50, %v2668_v13  ;;  %v2672_v8 = vsel %vm2662_vm5, %v2658_v26, 1326507024  ;;  %v3973_v27 = vadd.s32 4294967169, %v1383_v21  ;;  %v1243_v39 = vsub.s32 32, %v7196_v9 }
 0x286   :  { %v1343_v3 = vclz %v3970_v19  ;;  %v2663_v44 = vsel %vm2659_vm11, %v2643_v63, %v2646_v20  ;;  %v2670_v32 = vsel %vm2660_vm0, %v2667_v53, %v2669_v41  ;;  %v2665_v40 = vsel %vm2661_vm14, %v2649_v45, %v2664_v7  ;;  %v8735_v53 = vld [vmem:[#allocation12_spill] sm:$0xff] }
 0x287   :  { %v2673_v6 = vsel %vm2661_vm14, %v2655_v16, %v2672_v8  ;;  %v7228_v5 = vmul.u32.u64.low %v2675_v11, %v2670_v32  ;;  %v7229_v24 = vmul.u32.u64.high %v2675_v11, %v2670_v32, %v7228_v5  ;;  %v1248_v13 = vadd.s32 127, %v1247_v31 }
 0x288   :  { %v2591_v29 = vclz %v4018_v2  ;;  %v2674_v26 = vsel %vm2660_vm0, %v2671_v58, %v2673_v6  ;;  %v8560_v21 = vand.u32 2147483647, %v7162_v33  ;;  %v3971_v50 = vadd.s32 4294967294, %v1343_v3  ;;  %v8736_v2 = vld [vmem:[#allocation10_spill] sm:$0xff] }
 0x289   :  { %v7234_v19 = vmul.u32.u64.low %v2675_v11, %v2674_v26  ;;  %v7235_v52 = vmul.u32.u64.high %v2675_v11, %v2674_v26, %v7234_v19  ;;  %v1389_v20 = vadd.s32 1, %v3973_v27  ;;  %v1155_v45 = vsel %vm7020_vm6, %v6438_v25, %v7152_v55 }
 0x28a   :  { %v2499_v16 = vand.u32 2147483647, %v7201_v49  ;;  %v2501_v63 = vcvt.s32.f32 %v7193_v57  ;;  %v2666_v31 = vsel %vm2660_vm0, %v2663_v44, %v2665_v40  ;;  %v8737_v7 = vpack.c.bf16 %v8735_v53, %v8736_v2 }
 0x28b   :  { %v1244_v41 = vshll.u32 %v7070_v42, %v7196_v9  ;;  %v1245_v58 = vshrl.u32 %v7169_v61, %v1243_v39  ;;  %v2685_v8 = vadd.s32 1, %v7229_v24  ;;  %vm1390_vm15 = vcmp.gt.s32.totalorder %v1389_v20, 0 }
 0x28c   :  { %4331 = vmatmul.mubr.msk.bf16.gmra.mrb[36].mxu0 %vm69_vm1, %v8737_v7  ;;  %v1249_v49 = vshll.u32 %v1248_v13, 23  ;;  %v4019_v55 = vadd.s32 4294967294, %v2591_v29  ;;  %v1386_v47 = vand.u32 8388607, %v8560_v21  ;;  %v1391_v57 = vsel %vm1390_vm15, %v1389_v20, 0 }
 0x28d   :  { %4334 = vmatprep.mubr.msk.bf16.mxu0 %vm4719_vm2, %v8710_v36  ;;  %vm3972_vm7 = vcmp.lt.s32.totalorder %v3971_v50, 0  ;;  %v2682_v27 = vmul.u32 %v2675_v11, %v2666_v31  ;;  %vm2684_vm9 = vc.u32 %v7235_v52, %v7228_v5  ;;  %v1393_v42 = vand.u32 31, %v1391_v57 }
 0x28e   :  { %4669 = vsinq.f32 %v7108_v28  ;;  %v8738_v61 = vsel %vm7020_vm6, 0, %v7064_v43  ;;  %v8739_v29 = vsub.s32 4, %v6909_v22  ;;  %v2686_v11 = vsel %vm2684_vm9, %v2685_v8, %v7229_v24 }
 0x28f   :  { %v7263_v9 = vadd.s32 3, %v8738_v61  ;;  %4671 = vcosq.f32 %v1155_v45  ;;  %v7273_v3 = vmul.f32 %v2501_v63, %v2499_v16  ;;  %v7275_v44 = vor.u32 %v1245_v58, %v1244_v41  ;;  %v8741_v16 = vld [vmem:[#allocation16_spill] sm:$0xff] }
 0x290   :  { %v7270_v39 = vsel %vm2421_vm12, %v8739_v29, %v6909_v22  ;;  %v1394_v28 = vsub.s32 32, %v1393_v42  ;;  %v1250_v15 = vor.u32 4788187, %v1249_v49  ;;  %vm4020_vm4 = vcmp.lt.s32.totalorder %v4019_v55, 0 }
 0x291   :  { %8740 = vst [vmem:[#allocation2_spill] sm:$0xff] %v7270_v39  ;;  %v7277_v43 = vsel %vm3972_vm7, 0, %v3971_v50  ;;  %v1387_v32 = vor.u32 8388608, %v1386_v47  ;;  %v7279_v40 = vadd.s32 %v2686_v11, %v2682_v27  ;;  %v1396_v6 = vshll.u32 %v8611_v60, %v1393_v42  ;;  %v8742_v50 = vld [vmem:[#allocation14_spill] sm:$0xff] }
 0x292   :  { %v1397_v22 = vshrl.u32 %v8608_v34, %v1394_v28  ;;  %v1400_v13 = vshrl.u32 %v8610_v62, %v1394_v28  ;;  %v1399_v24 = vshll.u32 %v8608_v34, %v1393_v42  ;;  %v1402_v26 = vshll.u32 %v8610_v62, %v1393_v42 }
 0x293   :  { %v1403_v19 = vshrl.u32 %v8606_v46, %v1394_v28  ;;  %v1406_v20 = vshrl.u32 %v8607_v56, %v1394_v28  ;;  %v8743_v63 = vpack.c.bf16 %v8741_v16, %v8742_v50  ;;  %v1351_v31 = vsub.s32 4294967266, %v7277_v43 }
 0x294   :  { %v1392_v53 = vshrl.u32 %v1391_v57, 5  ;;  %v1398_v2 = vor.u32 %v1397_v22, %v1396_v6  ;;  %v1405_v7 = vshll.u32 %v8606_v46, %v1393_v42  ;;  %v1401_v41 = vor.u32 %v1400_v13, %v1399_v24 }
 0x295   :  { %4335 = vmatmul.mubr.msk.bf16.gmra.mrb[40].mxu0 %vm69_vm1, %v8743_v63  ;;  %v1404_v58 = vor.u32 %v1403_v19, %v1402_v26  ;;  %v1408_v8 = vshll.u32 %v8607_v56, %v1393_v42  ;;  %v1409_v49 = vshrl.u32 %v8609_v37, %v1394_v28  ;;  %4673 = vsinq.f32 %v1155_v45 }
 0x296   :  { %4338 = vmatprep.mubr.msk.bf16.mxu0 %vm4719_vm2, %v8710_v36  ;;  %v1257_v47 = vsub.s32 4, %v7013_v10  ;;  %v2688_v27 = vadd.s32 536870912, %v7279_v40  ;;  %v1407_v61 = vor.u32 %v1406_v20, %v1405_v7  ;;  %v2503_v57 = vxor.u32 2147483648, %v7273_v3  ;;  %v8754_v7 = vld [vmem:[#allocation20_spill] sm:$0xff] }
 0x297   :  { %vm1173_vm6 = vcmp.lt.s32.totalorder %v6681_v14, 0  ;;  %v1251_v29 = vand.u32 2147483647, %v1250_v15  ;;  %v1253_v11 = vcvt.s32.f32 %v7275_v44  ;;  %v1410_v6 = vor.u32 %v1409_v49, %v1408_v8  ;;  %v8755_v8 = vld [vmem:[#allocation18_spill] sm:$0xff] }
 0x298   :  { %v7304_v22 = vsel %vm4020_vm4, 0, %v4019_v55  ;;  %vm1411_vm10 = vcmp.lt.s32.totalorder %v1392_v53, 1  ;;  %vm1414_vm13 = vcmp.lt.s32.totalorder %v1392_v53, 4  ;;  %v7308_v45 = vadd.f32 %v7158_v17, %v6542_v38  ;;  %v7310_v42 = vpop.eup %4669 }
 0x299   :  { %8745 = vst [vmem:[#allocation6_spill] sm:$0xff] %v7310_v42  ;;  %v1352_v13 = vadd.s32 127, %v1351_v31  ;;  %v1416_v24 = vsel %vm1414_vm13, %v1404_v58, 2102212464  ;;  %v1419_v26 = vsel %vm1411_vm10, %v1398_v2, %v1401_v41  ;;  %v1427_v15 = vshll.u32 %v1387_v32, 8  ;;  %v7314_v19 = vpop.eup %4671 }
 0x29a   :  { %8744 = vst [vmem:[#allocation8_spill] sm:$0xff] %v7308_v45  ;;  %v7316_v44 = vshrl.u32 %v2688_v27, 30  ;;  %v1395_v55 = vshrl.u32 %v8611_v60, %v1394_v28  ;;  %vm1413_vm11 = vcmp.lt.s32.totalorder %v1392_v53, 3  ;;  %v1420_v20 = vsel %vm1414_vm13, %v1407_v61, 920167782 }
 0x29b   :  { %v8747_v38 = vand.u32 2147483647, %v6576_v54  ;;  %v8748_v16 = vmov 0  ;;  %v8751_v50 = vand.u32 2147483647, %v6681_v14  ;;  %vm1412_vm5 = vcmp.lt.s32.totalorder %v1392_v53, 2 }
 0x29c   :  { %8746 = vst [vmem:[#allocation12_spill] sm:$0xff] %v7316_v44  ;;  %v1421_v32 = vsel %vm1413_vm11, %v1404_v58, %v1420_v20  ;;  %v1423_v31 = vsel %vm1411_vm10, %v1401_v41, %v1404_v58  ;;  %v1424_v28 = vsel %vm1414_vm13, %v1410_v6, 1326507024  ;;  %v8756_v49 = vpack.c.bf16 %v8754_v7, %v8755_v8 }
 0x29d   :  { %vm7322_vm14 = vcmp.le.f32.partialorder %v8747_v38, 0.7853982  ;;  %vm7328_vm0 = vcmp.le.f32.partialorder %v8751_v50, 0.7853982  ;;  %v1415_v27 = vsel %vm1411_vm10, %v1395_v55, %v1398_v2  ;;  %v1417_v38 = vsel %vm1413_vm11, %v1401_v41, %v1416_v24 }
 0x29e   :  { %v8749_v16 = vsel %vm7322_vm14, 4294967295, %v8748_v16  ;;  %4339 = vmatmul.mubr.msk.bf16.gmra.mrb[44].mxu0 %vm69_vm1, %v8756_v49  ;;  %v1422_v21 = vsel %vm1412_vm5, %v1419_v26, %v1421_v32  ;;  %v1425_v50 = vsel %vm1413_vm11, %v1407_v61, %v1424_v28  ;;  %v1347_v20 = vsub.s32 32, %v7277_v43 }
 0x29f   :  { %8750 = vst [vmem:[#allocation10_spill] sm:$0xff] %v8749_v16  ;;  %4342 = vmatprep.mubr.msk.bf16.mxu0 %vm4719_vm2, %v8710_v36  ;;  %v1426_v58 = vsel %vm1412_vm5, %v1423_v31, %v1425_v50  ;;  %v7344_v42 = vmul.u32.u64.low %v1427_v15, %v1422_v21  ;;  %v7345_v6 = vmul.u32.u64.high %v1427_v15, %v1422_v21, %v7344_v42  ;;  %v1254_v7 = vmul.f32 %v1253_v11, %v1251_v29  ;;  %v7356_v55 = vpop.eup %4673 }
 0x2a0   :  { %v2599_v8 = vsub.s32 4294967266, %v7304_v22  ;;  %v7349_v49 = vmul.u32.u64.low %v1427_v15, %v1426_v58  ;;  %v7350_v2 = vmul.u32.u64.high %v1427_v15, %v1426_v58, %v7349_v49  ;;  %v1331_v41 = vadd.s32 %v7125_v12, %v7132_v4 }
 0x2a1   :  { %v1353_v61 = vshll.u32 %v1352_v13, 23  ;;  %v1418_v24 = vsel %vm1412_vm5, %v1415_v27, %v1417_v38  ;;  %v2734_v26 = vand.u32 2139095040, %v7308_v45  ;;  %v2504_v21 = vsel %vm2421_vm12, %v2503_v57, %v7273_v3  ;;  %v8758_v57 = vld [vmem:[#allocation22_spill] sm:$0xff] }
 0x2a2   :  { %v1258_v29 = vsel %vm1173_vm6, %v1257_v47, %v7013_v10  ;;  %v2579_v11 = vadd.s32 %v7055_v18, %v7052_v23  ;;  %v2690_v12 = vshll.u32 %v7316_v44, 30  ;;  %v2595_v4 = vsub.s32 32, %v7304_v22  ;;  %v8757_v47 = vld [vmem:[#allocation24_spill] sm:$0xff] }
 0x2a3   :  { %v1349_v53 = vshrl.u32 %v1331_v41, %v1347_v20  ;;  %v1437_v13 = vadd.s32 1, %v7345_v6  ;;  %v2735_v32 = vshrl.u32 %v2734_v26, 23  ;;  %v1255_v31 = vxor.u32 2147483648, %v1254_v7 }
 0x2a4   :  { %v2600_v28 = vadd.s32 127, %v2599_v8  ;;  %v1434_v27 = vmul.u32 %v1427_v15, %v1418_v24  ;;  %vm1436_vm12 = vc.u32 %v7350_v2, %v7344_v42  ;;  %v1348_v10 = vshll.u32 %v7204_v1, %v7277_v43 }
 0x2a5   :  { %v1354_v3 = vor.u32 4788187, %v1353_v61  ;;  %v1438_v23 = vsel %vm1436_vm12, %v1437_v13, %v7345_v6  ;;  %v4025_v18 = vadd.s32 4294967169, %v2735_v32  ;;  %v8759_v38 = vpack.c.bf16 %v8757_v47, %v8758_v57 }
 0x2a6   :  { %v7381_v50 = vsel %vm7322_vm14, %v6576_v54, %v2504_v21  ;;  %v1260_v15 = vsel %vm7328_vm0, 0, %v1258_v29  ;;  %v7386_v20 = vsub.s32 %v7279_v40, %v2690_v12  ;;  %v1439_v1 = vadd.s32 %v1438_v23, %v1434_v27  ;;  %v8769_v54 = vld [vmem:[#allocation5_spill] sm:$0xff] }
 0x2a7   :  { %4343 = vmatmul.mubr.msk.bf16.gmra.mrb[48].mxu0 %vm69_vm1, %v8759_v38  ;;  %8760 = vst [vmem:[#allocation16_spill] sm:$0xff] %v7381_v50  ;;  %v2596_v43 = vshll.u32 %v7184_v30, %v7304_v22  ;;  %v2597_v58 = vshrl.u32 %v2579_v11, %v2595_v4  ;;  %v1350_v6 = vor.u32 %v1349_v53, %v1348_v10  ;;  %v2741_v8 = vadd.s32 1, %v4025_v18  ;;  %v8761_v10 = vld [vmem:[#allocation3_spill] sm:$0xff] }
 0x2a8   :  { %4346 = vmatprep.mubr.msk.bf16.mxu0 %vm4719_vm2, %v8710_v36  ;;  %v1256_v49 = vsel %vm1173_vm6, %v1255_v31, %v1254_v7  ;;  %v2601_v41 = vshll.u32 %v2600_v28, 23  ;;  %v1440_v61 = vadd.s32 536870912, %v1439_v1  ;;  %v8562_v24 = vand.u32 2147483647, %v7308_v45 }
 0x2a9   :  { %4675 = vcosq.f32 %v7381_v50  ;;  %v7396_v40 = vadd.s32 3, %v1260_v15  ;;  %v1355_v26 = vand.u32 2147483647, %v1354_v3  ;;  %vm2742_vm15 = vcmp.gt.s32.totalorder %v2741_v8, 0  ;;  %v8762_v3 = vld [vmem:[#allocation25_spill] sm:$0xff] }
 0x2aa   :  { %v2693_v21 = vsub.s32 0, %v7386_v20  ;;  %v7399_v29 = vshrl.u32 %v1440_v61, 30  ;;  %v2743_v30 = vsel %vm2742_vm15, %v2741_v8, 0  ;;  %v7403_v22 = vadd.f32 %v7158_v17, %v6711_v59 }
 0x2ab   :  { %v7408_v7 = vsel %vm7328_vm0, %v6681_v14, %v1256_v49  ;;  %v2598_v11 = vor.u32 %v2597_v58, %v2596_v43  ;;  %v1357_v12 = vcvt.s32.f32 %v1350_v6  ;;  %v2745_v4 = vand.u32 31, %v2743_v30 }
 0x2ac   :  { %v2602_v53 = vor.u32 4788187, %v2601_v41  ;;  %v1361_v13 = vsub.s32 4, %v7186_v48  ;;  %v1442_v32 = vshll.u32 %v7399_v29, 30  ;;  %v2738_v31 = vand.u32 8388607, %v8562_v24 }
 0x2ad   :  { %vm1277_vm7 = vcmp.lt.s32.totalorder %v6943_v35, 0  ;;  %v1358_v59 = vmul.f32 %v1357_v12, %v1355_v26  ;;  %v2746_v28 = vsub.s32 32, %v2745_v4  ;;  %v2748_v27 = vshll.u32 %v8611_v60, %v2745_v4  ;;  %v8768_v24 = vld [vmem:[#allocation7_spill] sm:$0xff] }
 0x2ae   :  { %v2751_v63 = vshll.u32 %v8608_v34, %v2745_v4  ;;  %v8763_v23 = vpack.c.bf16 %v8761_v10, %v8762_v3  ;;  %v4022_v18 = vmin.u32 %v2693_v21, %v7386_v20  ;;  %v7422_v47 = vsub.s32 %v1439_v1, %v1442_v32 }
 0x2af   :  { %v2744_v57 = vshrl.u32 %v2743_v30, 5  ;;  %v1486_v38 = vand.u32 2139095040, %v7403_v22  ;;  %v2749_v15 = vshrl.u32 %v8608_v34, %v2746_v28  ;;  %v2752_v43 = vshrl.u32 %v8610_v62, %v2746_v28 }
 0x2b0   :  { %4347 = vmatmul.mubr.msk.bf16.gmra.mrb[52].mxu0 %vm69_vm1, %v8763_v23  ;;  %v2754_v58 = vshll.u32 %v8610_v62, %v2745_v4  ;;  %v2757_v6 = vshll.u32 %v8606_v46, %v2745_v4  ;;  %v2603_v8 = vand.u32 2147483647, %v2602_v53  ;;  %v2605_v49 = vcvt.s32.f32 %v2598_v11 }
 0x2b1   :  { %4350 = vmatprep.mubr.msk.bf16.mxu0 %vm4719_vm2, %v8710_v36  ;;  %v2739_v41 = vor.u32 8388608, %v2738_v31  ;;  %v2755_v1 = vshrl.u32 %v8606_v46, %v2746_v28  ;;  %v2750_v61 = vor.u32 %v2749_v15, %v2748_v27  ;;  %v2753_v26 = vor.u32 %v2752_v43, %v2751_v63 }
 0x2b2   :  { %v2758_v21 = vshrl.u32 %v8607_v56, %v2746_v28  ;;  %v2760_v30 = vshll.u32 %v8607_v56, %v2745_v4  ;;  %v1359_v12 = vxor.u32 2147483648, %v1358_v59  ;;  %v2695_v32 = vclz %v4022_v18 }
 0x2b3   :  { %v1445_v10 = vsub.s32 0, %v7422_v47  ;;  %v2761_v3 = vshrl.u32 %v8609_v37, %v2746_v28  ;;  %v7436_v23 = vpop.eup %4675  ;;  %v8765_v53 = vand.u32 2147483647, %v6943_v35  ;;  %v2756_v31 = vor.u32 %v2755_v1, %v2754_v58 }
 0x2b4   :  { %8764 = vst [vmem:[#allocation14_spill] sm:$0xff] %v7436_v23  ;;  %v2759_v27 = vor.u32 %v2758_v21, %v2757_v6  ;;  %vm2763_vm4 = vcmp.lt.s32.totalorder %v2744_v57, 1  ;;  %v1487_v63 = vshrl.u32 %v1486_v38, 23  ;;  %vm2525_vm6 = vcmp.lt.s32.totalorder %v6795_v51, 0 }
 0x2b5   :  { %vm7440_vm9 = vcmp.le.f32.partialorder %v8765_v53, 0.7853982  ;;  %v2747_v4 = vshrl.u32 %v8611_v60, %v2746_v28  ;;  %v2762_v18 = vor.u32 %v2761_v3, %v2760_v30  ;;  %vm2765_vm10 = vcmp.lt.s32.totalorder %v2744_v57, 3 }
 0x2b6   :  { %vm2766_vm13 = vcmp.lt.s32.totalorder %v2744_v57, 4  ;;  %vm2764_vm11 = vcmp.lt.s32.totalorder %v2744_v57, 2  ;;  %v2771_v43 = vsel %vm2763_vm4, %v2750_v61, %v2753_v26  ;;  %v2779_v53 = vshll.u32 %v2739_v41, 8  ;;  %v8771_v57 = vld [vmem:[#allocation67_spill] sm:$0xff] }
 0x2b7   :  { %v2768_v15 = vsel %vm2766_vm13, %v2756_v31, 2102212464  ;;  %v8770_v23 = vpack.c.bf16 %v8768_v24, %v8769_v54  ;;  %v1362_v38 = vsel %vm1277_vm7, %v1361_v13, %v7186_v48  ;;  %v4023_v58 = vadd.s32 4294967294, %v2695_v32 }
 0x2b8   :  { %v3974_v28 = vmin.u32 %v1445_v10, %v7422_v47  ;;  %v2772_v6 = vsel %vm2766_vm13, %v2759_v27, 920167782  ;;  %v2606_v1 = vmul.f32 %v2605_v49, %v2603_v8  ;;  %v2775_v21 = vsel %vm2763_vm4, %v2753_v26, %v2756_v31 }
 0x2b9   :  { %4351 = vmatmul.mubr.msk.bf16.gmra.mrb[56].mxu0 %vm69_vm1, %v8770_v23  ;;  %v2773_v41 = vsel %vm2765_vm10, %v2756_v31, %v2772_v6  ;;  %v3977_v54 = vadd.s32 4294967169, %v1487_v63  ;;  %v2767_v24 = vsel %vm2763_vm4, %v2747_v4, %v2750_v61  ;;  %v2769_v30 = vsel %vm2765_vm10, %v2753_v26, %v2768_v15  ;;  %v8774_v6 = vld [vmem:[#allocation9_spill] sm:$0xff] }
 0x2ba   :  { %4354 = vmatprep.mubr.msk.bf16.mxu0 %vm4719_vm2, %v8710_v36  ;;  %v2774_v48 = vsel %vm2764_vm11, %v2771_v43, %v2773_v41  ;;  %v2776_v13 = vsel %vm2766_vm13, %v2762_v18, 1326507024  ;;  %v1360_v32 = vsel %vm1277_vm7, %v1359_v12, %v1358_v59  ;;  %v2609_v49 = vsub.s32 4, %v7140_v0 }
 0x2bb   :  { %v2777_v10 = vsel %vm2765_vm10, %v2759_v27, %v2776_v13  ;;  %v7468_v3 = vmul.u32.u64.low %v2779_v53, %v2774_v48  ;;  %v7469_v8 = vmul.u32.u64.high %v2779_v53, %v2774_v48, %v7468_v3  ;;  %vm4024_vm0 = vcmp.lt.s32.totalorder %v4023_v58, 0 }
 0x2bc   :  { %v1447_v23 = vclz %v3974_v28  ;;  %v2778_v61 = vsel %vm2764_vm11, %v2775_v21, %v2777_v10  ;;  %v2770_v26 = vsel %vm2764_vm11, %v2767_v24, %v2769_v30  ;;  %v1493_v4 = vadd.s32 1, %v3977_v54  ;;  %v8773_v28 = vld [vmem:[#allocation11_spill] sm:$0xff] }
 0x2bd   :  { %v7475_v31 = vmul.u32.u64.low %v2779_v53, %v2778_v61  ;;  %v7476_v63 = vmul.u32.u64.high %v2779_v53, %v2778_v61, %v7475_v31  ;;  %4677 = vcosq.f32 %v7408_v7  ;;  %v2607_v59 = vxor.u32 2147483648, %v2606_v1 }
 0x2be   :  { %v1363_v12 = vsel %vm7440_vm9, %v6943_v35, %v1360_v32  ;;  %v1364_v27 = vsel %vm7440_vm9, 0, %v1362_v38  ;;  %v2789_v18 = vadd.s32 1, %v7469_v8  ;;  %v8565_v15 = vand.u32 2147483647, %v7403_v22 }
 0x2bf   :  { %vm1494_vm5 = vcmp.gt.s32.totalorder %v1493_v4, 0  ;;  %v7488_v43 = vadd.f32 %v7158_v17, %v8771_v57  ;;  %v8775_v41 = vpack.c.bf16 %v8773_v28, %v8774_v6  ;;  %v7495_v21 = vsel %vm4024_vm0, 0, %v4023_v58  ;;  %v8778_v28 = vld [vmem:[#allocation15_spill] sm:$0xff]  ;;  %v8779_v6 = vld [vmem:[#allocation13_spill] sm:$0xff] }
 0x2c0   :  { %v3975_v54 = vadd.s32 4294967294, %v1447_v23  ;;  %v2786_v11 = vmul.u32 %v2779_v53, %v2770_v26  ;;  %v1495_v38 = vsel %vm1494_vm5, %v1493_v4, 0  ;;  %4679 = vsinq.f32 %v7408_v7 }
 0x2c1   :  { %8772 = vst [vmem:[#allocation20_spill] sm:$0xff] %v7488_v43  ;;  %4355 = vmatmul.mubr.msk.bf16.gmra.mrb[60].mxu0 %vm69_vm1, %v8775_v41  ;;  %v7503_v24 = vsel %vm2525_vm6, %v2609_v49, %v7140_v0  ;;  %vm2788_vm12 = vc.u32 %v7476_v63, %v7468_v3  ;;  %v1497_v30 = vand.u32 31, %v1495_v38  ;;  %v7509_v58 = vsel %vm2525_vm6, %v2607_v59, %v2606_v1 }
 0x2c2   :  { %4358 = vmatprep.mubr.msk.bf16.mxu0 %vm4719_vm2, %v8710_v36  ;;  %8776 = vst [vmem:[#allocation18_spill] sm:$0xff] %v7503_v24  ;;  %8777 = vst [vmem:[#allocation24_spill] sm:$0xff] %v7509_v58  ;;  %v7511_v53 = vadd.s32 3, %v1364_v27  ;;  %v7515_v48 = vadd.s32 %v7228_v5, %v7235_v52  ;;  %v2790_v7 = vsel %vm2788_vm12, %v2789_v18, %v7469_v8  ;;  %4681 = vcosq.f32 %v1363_v12 }
 0x2c3   :  { %v2703_v0 = vsub.s32 4294967266, %v7495_v21  ;;  %v1498_v13 = vsub.s32 32, %v1497_v30  ;;  %v2838_v32 = vand.u32 2139095040, %v7488_v43  ;;  %vm3976_vm15 = vcmp.lt.s32.totalorder %v3975_v54, 0 }
 0x2c4   :  { %v7520_v10 = vadd.s32 %v2790_v7, %v2786_v11  ;;  %v1490_v1 = vand.u32 8388607, %v8565_v15  ;;  %v1500_v49 = vshll.u32 %v8611_v60, %v1497_v30  ;;  %v1503_v52 = vshll.u32 %v8608_v34, %v1497_v30 }
 0x2c5   :  { %v1501_v23 = vshrl.u32 %v8608_v34, %v1498_v13  ;;  %v1504_v5 = vshrl.u32 %v8610_v62, %v1498_v13  ;;  %v1506_v8 = vshll.u32 %v8610_v62, %v1497_v30  ;;  %v1507_v61 = vshrl.u32 %v8606_v46, %v1498_v13 }
 0x2c6   :  { %v1509_v26 = vshll.u32 %v8606_v46, %v1497_v30  ;;  %v1510_v31 = vshrl.u32 %v8607_v56, %v1498_v13  ;;  %v1513_v4 = vshrl.u32 %v8609_v37, %v1498_v13  ;;  %v7533_v59 = vsel %vm3976_vm15, 0, %v3975_v54 }
 0x2c7   :  { %v1496_v27 = vshrl.u32 %v1495_v38, 5  ;;  %v1512_v18 = vshll.u32 %v8607_v56, %v1497_v30  ;;  %v2839_v57 = vshrl.u32 %v2838_v32, 23  ;;  %v8780_v41 = vpack.c.bf16 %v8778_v28, %v8779_v6  ;;  %v7540_v11 = vpop.eup %4677 }
 0x2c8   :  { %v1502_v7 = vor.u32 %v1501_v23, %v1500_v49  ;;  %v1505_v15 = vor.u32 %v1504_v5, %v1503_v52  ;;  %v1508_v45 = vor.u32 %v1507_v61, %v1506_v8  ;;  %v1511_v44 = vor.u32 %v1510_v31, %v1509_v26 }
 0x2c9   :  { %4359 = vmatmul.mubr.msk.bf16.gmra.mrb[64].mxu0 %vm69_vm1, %v8780_v41  ;;  %4683 = vsinq.f32 %v1363_v12  ;;  %v2792_v54 = vadd.s32 536870912, %v7520_v10  ;;  %v1491_v38 = vor.u32 8388608, %v1490_v1  ;;  %vm3018_vm7 = vcmask 1043456  }
 0x2ca   :  { %4362 = vmatprep.mubr.msk.bf16.mxu0 %vm4719_vm2, %v8710_v36  ;;  %v2699_v30 = vsub.s32 32, %v7495_v21  ;;  %v2704_v32 = vadd.s32 127, %v2703_v0  ;;  %v1435_v28 = vadd.s32 %v7344_v42, %v7350_v2  ;;  %v1514_v6 = vor.u32 %v1513_v4, %v1512_v18  ;;  %v7548_v41 = vpop.eup %4679 }
 0x2cb   :  { %v1451_v49 = vsub.s32 32, %v7533_v59  ;;  %v1455_v23 = vsub.s32 4294967266, %v7533_v59  ;;  %vm1515_vm9 = vcmp.lt.s32.totalorder %v1496_v27, 1  ;;  %vm1518_vm4 = vcmp.lt.s32.totalorder %v1496_v27, 4 }
 0x2cc   :  { %vm1381_vm6 = vcmp.lt.s32.totalorder %v7162_v33, 0  ;;  %v1520_v12 = vsel %vm1518_vm4, %v1508_v45, 2102212464  ;;  %v1523_v1 = vsel %vm1515_vm9, %v1502_v7, %v1505_v15  ;;  %v1524_v52 = vsel %vm1518_vm4, %v1511_v44, 920167782  ;;  %v7554_v0 = vpop.eup %4681 }
 0x2cd   :  { %v4029_v5 = vadd.s32 4294967169, %v2839_v57  ;;  %v7556_v8 = vshrl.u32 %v2792_v54, 30  ;;  %v1499_v42 = vshrl.u32 %v8611_v60, %v1498_v13  ;;  %vm1517_vm10 = vcmp.lt.s32.totalorder %v1496_v27, 3  ;;  %v4606_v13 = vld [vmem:[%s8448_s4 + $0x8] ss:$0 sps:$4 sm:$0xff]  }
 0x2ce   :  { %v1531_v2 = vshll.u32 %v1491_v38, 8  ;;  %vm1516_vm13 = vcmp.lt.s32.totalorder %v1496_v27, 2  ;;  %v1525_v61 = vsel %vm1517_vm10, %v1508_v45, %v1524_v52  ;;  %v1527_v26 = vsel %vm1515_vm9, %v1505_v15, %v1508_v45  ;;  %v8785_v38 = vld [vmem:[#allocation19_spill] sm:$0xff]  ;;  %v8786_v52 = vld [vmem:[#allocation17_spill] sm:$0xff]  ;;  %v8788_v27 = vld [vmem:[#allocation72_spill] sm:$0xff] }
 0x2cf   :  { %8781 = vst [vmem:[#allocation22_spill] sm:$0xff] %v7556_v8  ;;  %v1528_v31 = vsel %vm1518_vm4, %v1514_v6, 1326507024  ;;  %v8782_v4 = vand.u32 2147483647, %v7162_v33  ;;  %v1519_v57 = vsel %vm1515_vm9, %v1499_v42, %v1502_v7  ;;  %v1521_v24 = vsel %vm1517_vm10, %v1505_v15, %v1520_v12 }
 0x2d0   :  { %v1526_v54 = vsel %vm1516_vm13, %v1523_v1, %v1525_v61  ;;  %v1529_v58 = vsel %vm1517_vm10, %v1511_v44, %v1528_v31  ;;  %v8787_v45 = vpack.c.bf16 %v8785_v38, %v8786_v52  ;;  %v2845_v7 = vadd.s32 1, %v4029_v5 }
 0x2d1   :  { %vm7562_vm11 = vcmp.le.f32.partialorder %v8782_v4, 0.7853982  ;;  %v1530_v6 = vsel %vm1516_vm13, %v1527_v26, %v1529_v58  ;;  %v7576_v4 = vmul.u32.u64.low %v1531_v2, %v1526_v54  ;;  %v7577_v50 = vmul.u32.u64.high %v1531_v2, %v1526_v54, %v7576_v4 }
 0x2d2   :  { %4363 = vmatmul.mubr.msk.bf16.gmra.mrb[68].mxu0 %vm69_vm1, %v8787_v45  ;;  %v2700_v44 = vshll.u32 %v7386_v20, %v7495_v21  ;;  %v1465_v15 = vsub.s32 4, %v7399_v29  ;;  %v7585_v12 = vmul.u32.u64.low %v1531_v2, %v1530_v6  ;;  %v7586_v1 = vmul.u32.u64.high %v1531_v2, %v1530_v6, %v7585_v12  ;;  %v8789_v6 = vld [vmem:[#allocation23_spill] sm:$0xff] }
 0x2d3   :  { %4366 = vmatprep.mubr.msk.bf16.mxu0 %vm4719_vm2, %v8710_v36  ;;  %v2701_v42 = vshrl.u32 %v7515_v48, %v2699_v30  ;;  %v2705_v61 = vshll.u32 %v2704_v32, 23  ;;  %v1522_v58 = vsel %vm1516_vm13, %v1519_v57, %v1521_v24  ;;  %vm2846_vm0 = vcmp.gt.s32.totalorder %v2845_v7, 0  ;;  %v7590_v26 = vpop.eup %4683 }
 0x2d4   :  { %v1456_v5 = vadd.s32 127, %v1455_v23  ;;  %v2794_v31 = vshll.u32 %v7556_v8, 30  ;;  %v2847_v54 = vsel %vm2846_vm0, %v2845_v7, 0  ;;  %v3020_v38 = vsel %vm3018_vm7, %v4606_v13, 0 }
 0x2d5   :  { %v1453_v20 = vshrl.u32 %v1435_v28, %v1451_v49  ;;  %v1541_v21 = vadd.s32 1, %v7577_v50  ;;  %v8571_v52 = vand.u32 2147483647, %v7488_v43  ;;  %v2849_v45 = vand.u32 31, %v2847_v54  ;;  %4267 = vmatpush3.bf16.msra.mxu1 %v3020_v38 }
 0x2d6   :  { %v7599_v24 = vsel %vm1381_vm6, %v1465_v15, %v7399_v29  ;;  %v1538_v48 = vmul.u32 %v1531_v2, %v1522_v58  ;;  %vm1540_vm5 = vc.u32 %v7586_v1, %v7576_v4  ;;  %v7605_v30 = vadd.f32 %v7158_v17, %v8788_v27  ;;  %4374 = vmatprep.subr.bf16.mxu1 %v8710_v36  ;;  %v8790_v17 = vld [vmem:[#allocation21_spill] sm:$0xff] }
 0x2d7   :  { %v7608_v32 = vor.u32 %v2701_v42, %v2700_v44  ;;  %v1452_v28 = vshll.u32 %v7422_v47, %v7533_v59  ;;  %v1542_v49 = vsel %vm1540_vm5, %v1541_v21, %v7577_v50  ;;  %v2850_v23 = vsub.s32 32, %v2849_v45 }
 0x2d8   :  { %v7613_v29 = vor.u32 4788187, %v2705_v61  ;;  %v1457_v2 = vshll.u32 %v1456_v5, 23  ;;  %v7616_v57 = vsub.s32 %v7520_v10, %v2794_v31  ;;  %v1543_v13 = vadd.s32 %v1542_v49, %v1538_v48 }
 0x2d9   :  { %v8791_v7 = vpack.c.bf16 %v8789_v6, %v8790_v17  ;;  %v1454_v44 = vor.u32 %v1453_v20, %v1452_v28  ;;  %v2842_v50 = vand.u32 8388607, %v8571_v52  ;;  %v2852_v59 = vshll.u32 %v8611_v60, %v2849_v45 }
 0x2da   :  { %v1544_v10 = vadd.s32 536870912, %v1543_v13  ;;  %v2853_v15 = vshrl.u32 %v8608_v34, %v2850_v23  ;;  %v2855_v12 = vshll.u32 %v8608_v34, %v2849_v45  ;;  %v2856_v42 = vshrl.u32 %v8610_v62, %v2850_v23 }
 0x2db   :  { %4367 = vmatmul.mubr.msk.bf16.gmra.mrb[72].mxu0 %vm69_vm1, %v8791_v7  ;;  %v2848_v61 = vshrl.u32 %v2847_v54, 5  ;;  %v2858_v58 = vshll.u32 %v8610_v62, %v2849_v45  ;;  %v2859_v5 = vshrl.u32 %v8606_v46, %v2850_v23  ;;  %v2861_v31 = vshll.u32 %v8606_v46, %v2849_v45 }
 0x2dc   :  { %4370 = vmatprep.mubr.msk.bf16.mxu0 %vm4719_vm2, %v8710_v36  ;;  %v1458_v38 = vor.u32 4788187, %v1457_v2  ;;  %v2797_v20 = vsub.s32 0, %v7616_v57  ;;  %v7637_v21 = vshrl.u32 %v1544_v10, 30  ;;  %v2862_v48 = vshrl.u32 %v8607_v56, %v2850_v23 }
 0x2dd   :  { %v2843_v27 = vor.u32 8388608, %v2842_v50  ;;  %v2864_v28 = vshll.u32 %v8607_v56, %v2849_v45  ;;  %v2865_v49 = vshrl.u32 %v8609_v37, %v2850_v23  ;;  %v1590_v54 = vand.u32 2139095040, %v7605_v30  ;;  %v8792_v45 = vld [vmem:[#allocation26_spill] sm:$0xff] }
 0x2de   :  { %v1546_v6 = vshll.u32 %v7637_v21, 30  ;;  %v2851_v17 = vshrl.u32 %v8611_v60, %v2850_v23  ;;  %v2854_v7 = vor.u32 %v2853_v15, %v2852_v59  ;;  %v2857_v52 = vor.u32 %v2856_v42, %v2855_v12 }
 0x2df   :  { %v2860_v2 = vor.u32 %v2859_v5, %v2858_v58  ;;  %v2863_v47 = vor.u32 %v2862_v48, %v2861_v31  ;;  %v2866_v8 = vor.u32 %v2865_v49, %v2864_v28  ;;  %vm2867_vm12 = vcmp.lt.s32.totalorder %v2848_v61, 1 }
 0x2e0   :  { %v1459_v10 = vand.u32 2147483647, %v1458_v38  ;;  %v1461_v43 = vcvt.s32.f32 %v1454_v44  ;;  %v7645_v16 = vsub.s32 %v1543_v13, %v1546_v6  ;;  %vm2870_vm15 = vcmp.lt.s32.totalorder %v2848_v61, 4 }
 0x2e1   :  { %v8793_v50 = vpack.c.bf16 %v8792_v45, %v8792_v45  ;;  %v4026_v39 = vmin.u32 %v2797_v20, %v7616_v57  ;;  %vm2869_vm7 = vcmp.lt.s32.totalorder %v2848_v61, 3  ;;  %v2872_v23 = vsel %vm2870_vm15, %v2860_v2, 2102212464 }
 0x2e2   :  { %v1591_v59 = vshrl.u32 %v1590_v54, 23  ;;  %v1549_v15 = vsub.s32 0, %v7645_v16  ;;  %vm2868_vm9 = vcmp.lt.s32.totalorder %v2848_v61, 2  ;;  %v2875_v13 = vsel %vm2867_vm12, %v2854_v7, %v2857_v52 }
 0x2e3   :  { %4371 = vmatmul.mubr.msk.bf16.gmra.mrb[76].mxu0 %vm69_vm1, %v8793_v50  ;;  %v2883_v44 = vshll.u32 %v2843_v27, 8  ;;  %v2871_v12 = vsel %vm2867_vm12, %v2851_v17, %v2854_v7  ;;  %v2876_v42 = vsel %vm2870_vm15, %v2863_v47, 920167782  ;;  %v2879_v58 = vsel %vm2867_vm12, %v2857_v52, %v2860_v2 }
 0x2e4   :  { %4442 = vmatprep.mubr.msk.bf16.mxu0 %vm4719_vm2, %v8710_v36  ;;  %v2880_v5 = vsel %vm2870_vm15, %v2866_v8, 1326507024  ;;  %v3978_v31 = vmin.u32 %v1549_v15, %v7645_v16  ;;  %v2873_v38 = vsel %vm2869_vm7, %v2857_v52, %v2872_v23  ;;  %v2877_v20 = vsel %vm2869_vm7, %v2860_v2, %v2876_v42  ;;  %v8796_v15 = vld [vmem:[#allocation31_spill] sm:$0xff] }
 0x2e5   :  { %v2881_v48 = vsel %vm2869_vm7, %v2863_v47, %v2880_v5  ;;  %v1462_v28 = vmul.f32 %v1461_v43, %v1459_v10  ;;  %v2878_v49 = vsel %vm2868_vm9, %v2875_v13, %v2877_v20  ;;  %v3981_v6 = vadd.s32 4294967169, %v1591_v59  ;;  %v8795_v59 = vld [vmem:[#allocation43_spill] sm:$0xff] }
 0x2e6   :  { %v2882_v54 = vsel %vm2868_vm9, %v2879_v58, %v2881_v48  ;;  %v2799_v45 = vclz %v4026_v39  ;;  %v1551_v50 = vclz %v3978_v31  ;;  %v2874_v17 = vsel %vm2868_vm9, %v2871_v12, %v2873_v38  ;;  %v4607_v38 = vld [vmem:[%s8450_s6] sm:$0xff]  }
 0x2e7   :  { %v7661_v27 = vmul.u32.u64.low %v2883_v44, %v2882_v54  ;;  %v7662_v35 = vmul.u32.u64.high %v2883_v44, %v2882_v54, %v7661_v27  ;;  %v7665_v7 = vmul.u32.u64.low %v2883_v44, %v2878_v49  ;;  %v7666_v8 = vmul.u32.u64.high %v2883_v44, %v2878_v49, %v7665_v7 }
 0x2e8   :  { %v1597_v52 = vadd.s32 1, %v3981_v6  ;;  %v2709_v47 = vcvt.s32.f32 %v7608_v32  ;;  %v3979_v43 = vadd.s32 4294967294, %v1551_v50  ;;  %v1587_v2 = vand.u32 2147483647, %v7605_v30  ;;  %v4608_v27 = vld [vmem:[%s8450_s6 + $0x8] sm:$0xff]  }
 0x2e9   :  { %vm2978_vm1 = vcmask 195584   ;;  %v2707_v10 = vand.u32 2147483647, %v7613_v29  ;;  %v1463_v39 = vxor.u32 2147483648, %v1462_v28  ;;  %v8794_v23 = vsel %vm7562_vm11, 0, %v7599_v24 }
 0x2ea   :  { %v7676_v61 = vadd.s32 3, %v8794_v23  ;;  %vm1598_vm4 = vcmp.gt.s32.totalorder %v1597_v52, 0  ;;  %v8797_v13 = vpack.c.bf16 %v8795_v59, %v8796_v15  ;;  %vm3980_vm10 = vcmp.lt.s32.totalorder %v3979_v43, 0 }
 0x2eb   :  { %v2890_v12 = vmul.u32 %v2883_v44, %v2874_v17  ;;  %vm2892_vm13 = vc.u32 %v7662_v35, %v7665_v7  ;;  %v1599_v42 = vsel %vm1598_vm4, %v1597_v52, 0  ;;  %v4027_v58 = vadd.s32 4294967294, %v2799_v45 }
 0x2ec   :  { %4269 = vmatmul.mubr.msk.bf16.vlgmr.msra.gmra.mrb[24].mxu1 %vm2978_vm1, %v8797_v13  ;;  %v1554_v5 = vsel %vm3980_vm10, 0, %v3979_v43  ;;  %v2893_v24 = vadd.s32 1, %v7666_v8  ;;  %v1601_v31 = vand.u32 31, %v1599_v42  ;;  %v1539_v20 = vadd.s32 %v7576_v4, %v7586_v1 }
 0x2ed   :  { %4272 = vmatprep.mubr.msk.bf16.mxu1 %vm4719_vm2, %v8710_v36  ;;  %v1555_v44 = vsub.s32 32, %v1554_v5  ;;  %v1559_v48 = vsub.s32 4294967266, %v1554_v5  ;;  %v1594_v49 = vand.u32 8388607, %v1587_v2  ;;  %v1464_v54 = vsel %vm1381_vm6, %v1463_v39, %v1462_v28  ;;  %4375 = vmatpush3.bf16.msra.mxu1 %v4607_v38 }
 0x2ee   :  { %v2894_v6 = vsel %vm2892_vm13, %v2893_v24, %v7666_v8  ;;  %v1602_v45 = vsub.s32 32, %v1601_v31  ;;  %v1604_v50 = vshll.u32 %v8611_v60, %v1601_v31  ;;  %v1607_v52 = vshll.u32 %v8608_v34, %v1601_v31  ;;  %4376 = vmatprep.subr.bf16.mxu1 %v8710_v36 }
 0x2ef   :  { %v1557_v17 = vshrl.u32 %v1539_v20, %v1555_v44  ;;  %v1560_v4 = vadd.s32 127, %v1559_v48  ;;  %v2895_v1 = vadd.s32 %v2894_v6, %v2890_v12  ;;  %v1610_v8 = vshll.u32 %v8610_v62, %v1601_v31 }
 0x2f0   :  { %v1605_v43 = vshrl.u32 %v8608_v34, %v1602_v45  ;;  %v1608_v28 = vshrl.u32 %v8610_v62, %v1602_v45  ;;  %v1611_v39 = vshrl.u32 %v8606_v46, %v1602_v45  ;;  %vm4028_vm6 = vcmp.lt.s32.totalorder %v4027_v58, 0  ;;  %v4609_v34 = vld [vmem:[%s8450_s6 + $0x10] sm:$0xff]  }
 0x2f1   :  { %v1561_v23 = vshll.u32 %v1560_v4, 23  ;;  %v2896_v59 = vadd.s32 536870912, %v2895_v1  ;;  %v1613_v15 = vshll.u32 %v8606_v46, %v1601_v31  ;;  %v1556_v13 = vshll.u32 %v7645_v16, %v1554_v5  ;;  %4377 = vmatpush3.bf16.msra.mxu1 %v4608_v27 }
 0x2f2   :  { %v1600_v12 = vshrl.u32 %v1599_v42, 5  ;;  %v1606_v24 = vor.u32 %v1605_v43, %v1604_v50  ;;  %v1614_v38 = vshrl.u32 %v8607_v56, %v1602_v45  ;;  %v1609_v44 = vor.u32 %v1608_v28, %v1607_v52  ;;  %4378 = vmatprep.subr.bf16.mxu1 %v8710_v36 }
 0x2f3   :  { %v1562_v20 = vor.u32 4788187, %v1561_v23  ;;  %v7713_v62 = vshrl.u32 %v2896_v59, 30  ;;  %v1616_v48 = vshll.u32 %v8607_v56, %v1601_v31  ;;  %v1558_v46 = vor.u32 %v1557_v17, %v1556_v13 }
 0x2f4   :  { %v1612_v6 = vor.u32 %v1611_v39, %v1610_v8  ;;  %v1615_v16 = vor.u32 %v1614_v38, %v1613_v15  ;;  %v1617_v42 = vshrl.u32 %v8609_v37, %v1602_v45  ;;  %v1467_v5 = vsel %vm7562_vm11, %v7162_v33, %v1464_v54  ;;  %v4610_v37 = vld [vmem:[%s8450_s6 + $0x18] sm:$0xff]  }
 0x2f5   :  { %v2787_v50 = vadd.s32 %v7468_v3, %v7476_v63  ;;  %v2898_v27 = vshll.u32 %v7713_v62, 30  ;;  %v1595_v4 = vor.u32 8388608, %v1594_v49  ;;  %v7725_v52 = vsel %vm4028_vm6, 0, %v4027_v58  ;;  %4379 = vmatpush3.bf16.msra.mxu1 %v4609_v34 }
 0x2f6   :  { %v1603_v56 = vshrl.u32 %v8611_v60, %v1602_v45  ;;  %v1618_v31 = vor.u32 %v1617_v42, %v1616_v48  ;;  %vm1619_vm0 = vcmp.lt.s32.totalorder %v1600_v12, 1  ;;  %v1563_v18 = vand.u32 2147483647, %v1562_v20  ;;  %4380 = vmatprep.subr.bf16.mxu1 %v8710_v36 }
 0x2f7   :  { %v7731_v54 = vsub.s32 %v2895_v1, %v2898_v27  ;;  %vm1622_vm11 = vcmp.lt.s32.totalorder %v1600_v12, 4  ;;  %v1627_v3 = vsel %vm1619_vm0, %v1606_v24, %v1609_v44  ;;  %v1565_v63 = vcvt.s32.f32 %v1558_v46  ;;  %v8801_v27 = vld [vmem:[#allocation48_spill] sm:$0xff] }
 0x2f8   :  { %vm1621_vm5 = vcmp.lt.s32.totalorder %v1600_v12, 3  ;;  %v1624_v58 = vsel %vm1622_vm11, %v1612_v6, 2102212464  ;;  %v1628_v49 = vsel %vm1622_vm11, %v1615_v16, 920167782  ;;  %vm1620_vm12 = vcmp.lt.s32.totalorder %v1600_v12, 2 }
 0x2f9   :  { %v2901_v60 = vsub.s32 0, %v7731_v54  ;;  %v1629_v45 = vsel %vm1621_vm5, %v1612_v6, %v1628_v49  ;;  %v1631_v17 = vsel %vm1619_vm0, %v1609_v44, %v1612_v6  ;;  %v2803_v43 = vsub.s32 32, %v7725_v52  ;;  %4381 = vmatpush3.bf16.msra.mxu1 %v4610_v37  ;;  %v8802_v37 = vld [vmem:[#allocation53_spill] sm:$0xff] }
 0x2fa   :  { %vm1485_vm15 = vcmp.lt.s32.totalorder %v7403_v22, 0  ;;  %v1630_v1 = vsel %vm1620_vm12, %v1627_v3, %v1629_v45  ;;  %v1632_v28 = vsel %vm1622_vm11, %v1618_v31, 1326507024  ;;  %v1635_v8 = vshll.u32 %v1595_v4, 8  ;;  %v8803_v3 = vld [vmem:[#allocation52_spill] sm:$0xff] }
 0x2fb   :  { %v1566_v39 = vmul.f32 %v1565_v63, %v1563_v18  ;;  %v1623_v23 = vsel %vm1619_vm0, %v1603_v56, %v1606_v24  ;;  %v1625_v59 = vsel %vm1621_vm5, %v1609_v44, %v1624_v58  ;;  %v1633_v15 = vsel %vm1621_vm5, %v1615_v16, %v1632_v28  ;;  %v8806_v28 = vld [vmem:[#allocation58_spill] sm:$0xff] }
 0x2fc   :  { %v4030_v13 = vmin.u32 %v2901_v60, %v7731_v54  ;;  %v1634_v38 = vsel %vm1620_vm12, %v1631_v17, %v1633_v15  ;;  %v7746_v34 = vmul.u32.u64.low %v1635_v8, %v1630_v1  ;;  %v7747_v20 = vmul.u32.u64.high %v1635_v8, %v1630_v1, %v7746_v34 }
 0x2fd   :  { %4685 = vcosq.f32 %v1467_v5  ;;  %v2807_v48 = vsub.s32 4294967266, %v7725_v52  ;;  %v8798_v46 = vand.u32 2147483647, %v7403_v22  ;;  %v2804_v16 = vshll.u32 %v7616_v57, %v7725_v52  ;;  %v8829_v52 = vld [vmem:[#allocation16_spill] sm:$0xff] }
 0x2fe   :  { %v7757_v24 = vmul.u32.u64.low %v1635_v8, %v1634_v38  ;;  %v7758_v44 = vmul.u32.u64.high %v1635_v8, %v1634_v38, %v7757_v24  ;;  %4687 = vsinq.f32 %v1467_v5  ;;  %v1626_v42 = vsel %vm1620_vm12, %v1623_v23, %v1625_v59  ;;  %v8804_v5 = vld [vmem:[#allocation54_spill] sm:$0xff] }
 0x2ff   :  { %vm7753_vm7 = vcmp.le.f32.partialorder %v8798_v46, 0.7853982  ;;  %v641_v4 = vand.u32 3, %v8801_v27  ;;  %v7764_v56 = vshrl.u32 %v2787_v50, %v2803_v43  ;;  %v1569_v31 = vsub.s32 4, %v7637_v21  ;;  %v8805_v50 = vld [vmem:[#allocation59_spill] sm:$0xff]  ;;  %v8807_v24 = vld [vmem:[#allocation61_spill] sm:$0xff] }
 0x300   :  { %v644_v18 = vxor.u32 2147483648, %v8802_v37  ;;  %v647_v63 = vxor.u32 2147483648, %v8803_v3  ;;  %v1567_v58 = vxor.u32 2147483648, %v1566_v39  ;;  %v2903_v49 = vclz %v4030_v13 }
 0x301   :  { %v1645_v60 = vadd.s32 1, %v7747_v20  ;;  %v745_v45 = vand.u32 3, %v8804_v5  ;;  %v7771_v17 = vadd.s32 127, %v2807_v48  ;;  %v1642_v12 = vmul.u32 %v1635_v8, %v1626_v42 }
 0x302   :  { %vm1644_vm9 = vc.u32 %v7758_v44, %v7746_v34  ;;  %v748_v43 = vxor.u32 2147483648, %v8805_v50  ;;  %vm643_vm4 = vcmp.eq.s32.totalorder %v641_v4, 0  ;;  %vm646_vm10 = vcmp.eq.s32.totalorder %v641_v4, 2 }
 0x303   :  { %v1646_v1 = vsel %vm1644_vm9, %v1645_v60, %v7747_v20  ;;  %v751_v23 = vxor.u32 2147483648, %v8806_v28  ;;  %v1570_v59 = vsel %vm1485_vm15, %v1569_v31, %v7637_v21  ;;  %v645_v13 = vsel %vm643_vm4, %v8803_v3, %v644_v18  ;;  %v8809_v3 = vld [vmem:[#allocation63_spill] sm:$0xff]  ;;  %v8810_v60 = vld [vmem:[#allocation29_spill] sm:$0xff] }
 0x304   :  { %v1647_v15 = vadd.s32 %v1646_v1, %v1642_v12  ;;  %v648_v8 = vsel %vm646_vm10, %v647_v63, %v8802_v37  ;;  %v1568_v38 = vsel %vm1485_vm15, %v1567_v58, %v1566_v39  ;;  %v4031_v48 = vadd.s32 4294967294, %v2903_v49  ;;  %v8808_v39 = vld [vmem:[#allocation32_spill] sm:$0xff] }
 0x305   :  { %vm642_vm13 = vcmp.lt.s32.totalorder %v641_v4, 2  ;;  %vm747_vm6 = vcmp.eq.s32.totalorder %v745_v45, 0  ;;  %vm750_vm0 = vcmp.eq.s32.totalorder %v745_v45, 2  ;;  %v849_v42 = vand.u32 3, %v8807_v24  ;;  %v8814_v24 = vld [vmem:[#allocation38_spill] sm:$0xff] }
 0x306   :  { %v1648_v20 = vadd.s32 536870912, %v1647_v15  ;;  %v749_v46 = vsel %vm747_vm6, %v8806_v28, %v748_v43  ;;  %v1572_v21 = vsel %vm7753_vm7, 0, %v1570_v59  ;;  %v649_v27 = vsel %vm642_vm13, %v645_v13, %v648_v8  ;;  %v8812_v28 = vld [vmem:[#allocation65_spill] sm:$0xff]  ;;  %v8813_v59 = vld [vmem:[#allocation75_spill] sm:$0xff] }
 0x307   :  { %vm746_vm11 = vcmp.lt.s32.totalorder %v745_v45, 2  ;;  %v752_v31 = vsel %vm750_vm0, %v751_v23, %v8805_v50  ;;  %v7790_v37 = vpop.eup %4685  ;;  %vm743_vm5 = vweird.f32 %v8808_v39  ;;  %v852_v63 = vxor.u32 2147483648, %v8809_v3  ;;  %v8811_v45 = vld [vmem:[#allocation62_spill] sm:$0xff] }
 0x308   :  { %v7792_v18 = vshrl.u32 %v1648_v20, 30  ;;  %v753_v4 = vsel %vm746_vm11, %v749_v46, %v752_v31  ;;  %v7796_v58 = vpop.eup %4687  ;;  %v1571_v49 = vsel %vm7753_vm7, %v7403_v22, %v1568_v38  ;;  %vm639_vm12 = vweird.f32 %v8810_v60  ;;  %v8815_v39 = vld [vmem:[#allocation74_spill] sm:$0xff]  ;;  %v8817_v60 = vld [vmem:[#allocation81_spill] sm:$0xff] }
 0x309   :  { %v754_v5 = vsel %vm743_vm5, nan, %v753_v4  ;;  %v855_v12 = vxor.u32 2147483648, %v8811_v45  ;;  %vm4032_vm15 = vcmp.lt.s32.totalorder %v4031_v48, 0  ;;  %v650_v43 = vsel %vm639_vm12, nan, %v649_v27 }
 0x30a   :  { %v1650_v50 = vshll.u32 %v7792_v18, 30  ;;  %vm851_vm9 = vcmp.eq.s32.totalorder %v849_v42, 0  ;;  %v2954_v1 = vpack.c.bf16 %v754_v5, %v650_v43  ;;  %vm854_vm4 = vcmp.eq.s32.totalorder %v849_v42, 2  ;;  %v8818_v5 = vld [vmem:[#allocation80_spill] sm:$0xff] }
 0x30b   :  { %v953_v23 = vand.u32 3, %v8812_v28  ;;  %v956_v13 = vxor.u32 2147483648, %v8813_v59  ;;  %4689 = vcosq.f32 %v1571_v49  ;;  %v853_v6 = vsel %vm851_vm9, %v8811_v45, %v852_v63 }
 0x30c   :  { %v7806_v8 = vsub.s32 %v1647_v15, %v1650_v50  ;;  %v856_v38 = vsel %vm854_vm4, %v855_v12, %v8809_v3  ;;  %v2809_v20 = vshll.u32 %v7771_v17, 23  ;;  %4691 = vsinq.f32 %v1571_v49  ;;  %4273 = vmatmul.mubr.msk.bf16.gmra.mrb[28].mxu1 %vm2978_vm1, %v2954_v1  ;;  %v8816_v3 = vld [vmem:[#allocation70_spill] sm:$0xff]  ;;  %v8819_v12 = vld [vmem:[#allocation45_spill] sm:$0xff]  ;;  %v8831_v17 = vld [vmem:[#allocation24_spill] sm:$0xff] }
 0x30d   :  { %v7811_v46 = vadd.s32 3, %v1572_v21  ;;  %vm847_vm7 = vweird.f32 %v8814_v24  ;;  %v7816_v27 = vsel %vm4032_vm15, 0, %v4031_v48  ;;  %4276 = vmatprep.mubr.msk.bf16.mxu1 %vm4719_vm2, %v8710_v36  ;;  %vm850_vm10 = vcmp.lt.s32.totalorder %v849_v42, 2 }
 0x30e   :  { %v1653_v31 = vsub.s32 0, %v7806_v8  ;;  %vm955_vm13 = vcmp.eq.s32.totalorder %v953_v23, 0  ;;  %v857_v15 = vsel %vm850_vm10, %v853_v6, %v856_v38  ;;  %v959_v21 = vxor.u32 2147483648, %v8815_v39 }
 0x30f   :  { %v957_v4 = vsel %vm955_vm13, %v8815_v39, %v956_v13  ;;  %v1057_v63 = vand.u32 3, %v8816_v3  ;;  %vm958_vm6 = vcmp.eq.s32.totalorder %v953_v23, 2  ;;  %v1060_v48 = vxor.u32 2147483648, %v8817_v60 }
 0x310   :  { %v3982_v49 = vmin.u32 %v1653_v31, %v7806_v8  ;;  %v1063_v45 = vxor.u32 2147483648, %v8818_v5  ;;  %vm951_vm0 = vweird.f32 %v8819_v12  ;;  %vm954_vm11 = vcmp.lt.s32.totalorder %v953_v23, 2 }
 0x311   :  { %v960_v42 = vsel %vm958_vm6, %v959_v21, %v8813_v59  ;;  %vm1059_vm5 = vcmp.eq.s32.totalorder %v1057_v63, 0  ;;  %vm1062_vm12 = vcmp.eq.s32.totalorder %v1057_v63, 2  ;;  %v858_v28 = vsel %vm847_vm7, nan, %v857_v15  ;;  %v8820_v15 = vld [vmem:[#allocation33_spill] sm:$0xff] }
 0x312   :  { %v1655_v50 = vclz %v3982_v49  ;;  %v961_v43 = vsel %vm954_vm11, %v957_v4, %v960_v42  ;;  %v1061_v1 = vsel %vm1059_vm5, %v8818_v5, %v1060_v48  ;;  %vm1058_vm15 = vcmp.lt.s32.totalorder %v1057_v63, 2 }
 0x313   :  { %v962_v13 = vsel %vm951_vm0, nan, %v961_v43  ;;  %v1064_v6 = vsel %vm1062_vm12, %v1063_v45, %v8817_v60  ;;  %v1643_v38 = vadd.s32 %v7746_v34, %v7758_v44  ;;  %v2911_v59 = vsub.s32 4294967266, %v7816_v27 }
 0x314   :  { %v3983_v31 = vadd.s32 4294967294, %v1655_v50  ;;  %v2955_v23 = vpack.c.bf16 %v962_v13, %v858_v28  ;;  %v1065_v39 = vsel %vm1058_vm15, %v1061_v1, %v1064_v6  ;;  %v1673_v4 = vsub.s32 4, %v7792_v18 }
 0x315   :  { %v1161_v21 = vand.u32 3, %v7263_v9  ;;  %v1164_v3 = vxor.u32 2147483648, %v7356_v55  ;;  %v7839_v24 = vpop.eup %4689  ;;  %vm1055_vm4 = vweird.f32 %v8820_v15  ;;  %v1167_v34 = vxor.u32 2147483648, %v7314_v19 }
 0x316   :  { %vm3984_vm9 = vcmp.lt.s32.totalorder %v3983_v31, 0  ;;  %4277 = vmatmul.mubr.msk.bf16.gmra.mrb[32].mxu1 %vm2978_vm1, %v2955_v23  ;;  %v1265_v44 = vand.u32 3, %v7396_v40  ;;  %v7845_v63 = vpop.eup %4691  ;;  %v1066_v9 = vsel %vm1055_vm4, nan, %v1065_v39  ;;  %vm1159_vm7 = vweird.f32 %v6438_v25 }
 0x317   :  { %v1658_v49 = vsel %vm3984_vm9, 0, %v3983_v31  ;;  %4280 = vmatprep.mubr.msk.bf16.mxu1 %vm4719_vm2, %v8710_v36  ;;  %vm1163_vm10 = vcmp.eq.s32.totalorder %v1161_v21, 0  ;;  %vm1166_vm13 = vcmp.eq.s32.totalorder %v1161_v21, 2  ;;  %vm1162_vm6 = vcmp.lt.s32.totalorder %v1161_v21, 2 }
 0x318   :  { %v1659_v60 = vsub.s32 32, %v1658_v49  ;;  %v1663_v48 = vsub.s32 4294967266, %v1658_v49  ;;  %v1165_v5 = vsel %vm1163_vm10, %v7314_v19, %v1164_v3  ;;  %v1660_v45 = vshll.u32 %v7806_v8, %v1658_v49  ;;  %v8826_v49 = vld [vmem:[#allocation71_spill] sm:$0xff] }
 0x319   :  { %v1168_v40 = vsel %vm1166_vm13, %v1167_v34, %v7356_v55  ;;  %v1268_v12 = vxor.u32 2147483648, %v7548_v41  ;;  %vm1267_vm0 = vcmp.eq.s32.totalorder %v1265_v44, 0  ;;  %vm1270_vm11 = vcmp.eq.s32.totalorder %v1265_v44, 2 }
 0x31a   :  { %v1661_v42 = vshrl.u32 %v1643_v38, %v1659_v60  ;;  %v1664_v50 = vadd.s32 127, %v1663_v48  ;;  %v1169_v43 = vsel %vm1162_vm6, %v1165_v5, %v1168_v40  ;;  %v1271_v28 = vxor.u32 2147483648, %v7540_v11 }
 0x31b   :  { %v1170_v1 = vsel %vm1159_vm7, nan, %v1169_v43  ;;  %v1269_v25 = vsel %vm1267_vm0, %v7540_v11, %v1268_v12  ;;  %vm1589_vm5 = vcmp.lt.s32.totalorder %v7605_v30, 0  ;;  %v1369_v6 = vand.u32 3, %v7511_v53 }
 0x31c   :  { %v1662_v19 = vor.u32 %v1661_v42, %v1660_v45  ;;  %v1665_v13 = vshll.u32 %v1664_v50, 23  ;;  %v2956_v8 = vpack.c.bf16 %v1170_v1, %v1066_v9  ;;  %vm1266_vm12 = vcmp.lt.s32.totalorder %v1265_v44, 2 }
 0x31d   :  { %v1272_v55 = vsel %vm1270_vm11, %v1271_v28, %v7548_v41  ;;  %v1372_v38 = vxor.u32 2147483648, %v7590_v26  ;;  %v1375_v31 = vxor.u32 2147483648, %v7554_v0  ;;  %vm7863_vm15 = vcmp.le.f32.partialorder %v1587_v2, 0.7853982  ;;  %v8827_v28 = vld [vmem:[#allocation2_spill] sm:$0xff] }
 0x31e   :  { %v1666_v11 = vor.u32 4788187, %v1665_v13  ;;  %v1669_v39 = vcvt.s32.f32 %v1662_v19  ;;  %4281 = vmatmul.mubr.msk.bf16.gmra.mrb[36].mxu1 %vm2978_vm1, %v2956_v8  ;;  %vm1263_vm9 = vweird.f32 %v6681_v14  ;;  %v1273_v53 = vsel %vm1266_vm12, %v1269_v25, %v1272_v55  ;;  %v8833_v13 = vld [vmem:[#allocation12_spill] sm:$0xff] }
 0x31f   :  { %4284 = vmatprep.mubr.msk.bf16.mxu1 %vm4719_vm2, %v8710_v36  ;;  %vm1370_vm4 = vcmp.lt.s32.totalorder %v1369_v6, 2  ;;  %vm1371_vm7 = vcmp.eq.s32.totalorder %v1369_v6, 0  ;;  %vm1374_vm10 = vcmp.eq.s32.totalorder %v1369_v6, 2  ;;  %v1473_v41 = vand.u32 3, %v7676_v61 }
 0x320   :  { %v1667_v21 = vand.u32 2147483647, %v1666_v11  ;;  %v1373_v2 = vsel %vm1371_vm7, %v7554_v0, %v1372_v38  ;;  %v1376_v3 = vsel %vm1374_vm10, %v1375_v31, %v7590_v26  ;;  %v1476_v15 = vxor.u32 2147483648, %v7796_v58  ;;  %v8834_v31 = vld [vmem:[#allocation36_spill] sm:$0xff] }
 0x321   :  { %v8823_v34 = vand.u32 2147483647, %v6795_v51  ;;  %v1274_v44 = vsel %vm1263_vm9, nan, %v1273_v53  ;;  %vm1367_vm6 = vweird.f32 %v8826_v49  ;;  %v1377_v9 = vsel %vm1370_vm4, %v1373_v2, %v1376_v3  ;;  %v8835_v53 = vld [vmem:[#allocation44_spill] sm:$0xff]  ;;  %v8841_v49 = vld [vmem:[#allocation73_spill] sm:$0xff] }
 0x322   :  { %vm1475_vm0 = vcmp.eq.s32.totalorder %v1473_v41, 0  ;;  %v1670_v60 = vmul.f32 %v1669_v39, %v1667_v21  ;;  %v1378_v61 = vsel %vm1367_vm6, nan, %v1377_v9  ;;  %v1479_v0 = vxor.u32 2147483648, %v7790_v37  ;;  %v8836_v21 = vld [vmem:[#allocation40_spill] sm:$0xff] }
 0x323   :  { %vm7877_vm13 = vcmp.le.f32.partialorder %v8823_v34, 0.7853982  ;;  %v1477_v48 = vsel %vm1475_vm0, %v7790_v37, %v1476_v15  ;;  %v2957_v26 = vpack.c.bf16 %v1378_v61, %v1274_v44  ;;  %vm1478_vm11 = vcmp.eq.s32.totalorder %v1473_v41, 2  ;;  %v8838_v15 = vld [vmem:[#allocation69_spill] sm:$0xff]  ;;  %v8859_v44 = vld [vmem:[#allocation46_spill] sm:$0xff] }
 0x324   :  { %v1577_v5 = vand.u32 3, %v7811_v46  ;;  %v1580_v45 = vxor.u32 2147483648, %v7845_v63  ;;  %v1671_v40 = vxor.u32 2147483648, %v1670_v60  ;;  %vm1474_vm12 = vcmp.lt.s32.totalorder %v1473_v41, 2 }
 0x325   :  { %v1480_v12 = vsel %vm1478_vm11, %v1479_v0, %v7796_v58  ;;  %v1583_v42 = vxor.u32 2147483648, %v7839_v24  ;;  %v1674_v50 = vsel %vm1589_vm5, %v1673_v4, %v7792_v18  ;;  %v2710_v1 = vmul.f32 %v2709_v47, %v2707_v10 }
 0x326   :  { %v1481_v43 = vsel %vm1474_vm12, %v1477_v48, %v1480_v12  ;;  %vm1579_vm9 = vcmp.eq.s32.totalorder %v1577_v5, 0  ;;  %vm1582_vm4 = vcmp.eq.s32.totalorder %v1577_v5, 2  ;;  %v1672_v37 = vsel %vm1589_vm5, %v1671_v40, %v1670_v60  ;;  %4285 = vmatmul.mubr.msk.bf16.gmra.mrb[40].mxu1 %vm2978_vm1, %v2957_v26 }
 0x327   :  { %vm1578_vm7 = vcmp.lt.s32.totalorder %v1577_v5, 2  ;;  %v1581_v46 = vsel %vm1579_vm9, %v7839_v24, %v1580_v45  ;;  %v1584_v58 = vsel %vm1582_vm4, %v1583_v42, %v7845_v63  ;;  %v1675_v18 = vsel %vm7863_vm15, %v7605_v30, %v1672_v37  ;;  %4288 = vmatprep.mubr.msk.bf16.mxu1 %vm4719_vm2, %v8710_v36 }
 0x328   :  { %vm1575_vm5 = vweird.f32 %v7403_v22  ;;  %v1585_v4 = vsel %vm1578_vm7, %v1581_v46, %v1584_v58  ;;  %v1676_v24 = vsel %vm7863_vm15, 0, %v1674_v50  ;;  %4693 = vcosq.f32 %v1675_v18  ;;  %v8846_v58 = vld [vmem:[#allocation49_spill] sm:$0xff] }
 0x329   :  { %vm1471_vm10 = vweird.f32 %v7162_v33  ;;  %v1586_v29 = vsel %vm1575_vm5, nan, %v1585_v4  ;;  %v2806_v32 = vor.u32 %v7764_v56, %v2804_v16  ;;  %v2810_v47 = vor.u32 4788187, %v2809_v20  ;;  %v8830_v16 = vld [vmem:[#allocation79_spill] sm:$0xff]  ;;  %v8847_v4 = vld [vmem:[#allocation57_spill] sm:$0xff] }
 0x32a   :  { %4695 = vsinq.f32 %v1675_v18  ;;  %v1482_v10 = vsel %vm1471_vm10, nan, %v1481_v43  ;;  %v2891_v22 = vadd.s32 %v7665_v7, %v7662_v35  ;;  %v2907_v63 = vsub.s32 32, %v7816_v27  ;;  %v8832_v7 = vld [vmem:[#allocation18_spill] sm:$0xff] }
 0x32b   :  { %v2912_v25 = vadd.s32 127, %v2911_v59  ;;  %v2958_v33 = vpack.c.bf16 %v1586_v29, %v1482_v10  ;;  %v2508_v57 = vsel %vm7322_vm14, 0, %v8827_v28  ;;  %4697 = vsinq.f32 %v8829_v52  ;;  %v8848_v29 = vld [vmem:[#allocation55_spill] sm:$0xff] }
 0x32c   :  { %vm2629_vm15 = vcmp.lt.s32.totalorder %v8830_v16, 0  ;;  %v1680_v56 = vadd.s32 3, %v1676_v24  ;;  %v2611_v35 = vsel %vm7877_vm13, %v6795_v51, %v8831_v17  ;;  %v2612_v20 = vsel %vm7877_vm13, 0, %v8832_v7  ;;  %v8850_v28 = vld [vmem:[#allocation51_spill] sm:$0xff] }
 0x32d   :  { %v2711_v59 = vxor.u32 2147483648, %v2710_v1  ;;  %v2713_v8 = vsub.s32 4, %v8833_v13  ;;  %v2811_v6 = vand.u32 2147483647, %v2810_v47  ;;  %v2813_v55 = vcvt.s32.f32 %v2806_v32  ;;  %v8852_v17 = vld [vmem:[#allocation27_spill] sm:$0xff] }
 0x32e   :  { %v2908_v38 = vshll.u32 %v7731_v54, %v7816_v27  ;;  %v1785_v23 = vand.u32 3, %v8834_v31  ;;  %v2909_v11 = vshrl.u32 %v2891_v22, %v2907_v63  ;;  %v2913_v39 = vshll.u32 %v2912_v25, 23  ;;  %4289 = vmatmul.mubr.msk.bf16.gmra.mrb[44].mxu1 %vm2978_vm1, %v2958_v33  ;;  %v8849_v63 = vld [vmem:[#allocation39_spill] sm:$0xff] }
 0x32f   :  { %v1788_v41 = vxor.u32 2147483648, %v8835_v53  ;;  %v1791_v2 = vxor.u32 2147483648, %v8836_v21  ;;  %v8839_v34 = vsel %vm6844_vm8, 0, %v8838_v15  ;;  %v8842_v54 = vsel %vm7002_vm3, 0, %v8841_v49  ;;  %4292 = vmatprep.mubr.msk.bf16.mxu1 %vm4719_vm2, %v8710_v36  ;;  %v8858_v15 = vld [vmem:[#allocation66_spill] sm:$0xff] }
 0x330   :  { %v7945_v14 = vadd.s32 3, %v8839_v34  ;;  %v7951_v27 = vadd.s32 3, %v8842_v54  ;;  %4699 = vcosq.f32 %v2611_v35  ;;  %v1681_v9 = vand.u32 3, %v1680_v56  ;;  %v8860_v54 = vld [vmem:[#allocation20_spill] sm:$0xff] }
 0x331   :  { %v7955_v60 = vadd.s32 3, %v2508_v57  ;;  %4701 = vsinq.f32 %v2611_v35  ;;  %v7957_v61 = vadd.s32 3, %v2612_v20  ;;  %v7962_v48 = vsel %vm2629_vm15, %v2713_v8, %v8833_v13  ;;  %v8851_v57 = vld [vmem:[#allocation50_spill] sm:$0xff]  ;;  %v8853_v8 = vld [vmem:[#allocation8_spill] sm:$0xff] }
 0x332   :  { %v8843_v0 = vand.u32 2147483647, %v8830_v16  ;;  %v2712_v5 = vsel %vm2629_vm15, %v2711_v59, %v2710_v1  ;;  %v7972_v45 = vmul.f32 %v2813_v55, %v2811_v6  ;;  %vm1787_vm3 = vcmp.eq.s32.totalorder %v1785_v23, 0  ;;  %v4694_v40 = vpop.eup %4693 }
 0x333   :  { %vm1790_vm14 = vcmp.eq.s32.totalorder %v1785_v23, 2  ;;  %v7974_v12 = vor.u32 %v2909_v11, %v2908_v38  ;;  %v7976_v42 = vor.u32 4788187, %v2913_v39  ;;  %v1789_v50 = vsel %vm1787_vm3, %v8836_v21, %v1788_v41  ;;  %v8857_v21 = vld [vmem:[#allocation64_spill] sm:$0xff] }
 0x334   :  { %vm7966_vm8 = vcmp.le.f32.partialorder %v8843_v0, 0.7853982  ;;  %v1792_v43 = vsel %vm1790_vm14, %v1791_v2, %v8835_v53  ;;  %v4696_v37 = vpop.eup %4695  ;;  %vm1679_vm13 = vweird.f32 %v7605_v30  ;;  %vm1686_vm6 = vcmp.eq.s32.totalorder %v1681_v9, 2  ;;  %v8861_v0 = vld [vmem:[#allocation30_spill] sm:$0xff] }
 0x335   :  { %v1687_v46 = vxor.u32 2147483648, %v4694_v40  ;;  %v1993_v1 = vand.u32 3, %v8846_v58  ;;  %v1684_v18 = vxor.u32 2147483648, %v4696_v37  ;;  %vm1786_vm0 = vcmp.lt.s32.totalorder %v1785_v23, 2  ;;  %v7984_v47 = vpop.eup %4697  ;;  %v8865_v58 = vld [vmem:[#allocation28_spill] sm:$0xff] }
 0x336   :  { %v1996_v24 = vxor.u32 2147483648, %v8847_v4  ;;  %v1999_v32 = vxor.u32 2147483648, %v8848_v29  ;;  %vm1683_vm11 = vcmp.eq.s32.totalorder %v1681_v9, 0  ;;  %v1793_v22 = vsel %vm1786_vm0, %v1789_v50, %v1792_v43  ;;  %v8863_v50 = vld [vmem:[#allocation60_spill] sm:$0xff] }
 0x337   :  { %v1688_v10 = vsel %vm1686_vm6, %v1687_v46, %v4696_v37  ;;  %v1889_v25 = vand.u32 3, %v8849_v63  ;;  %vm1682_vm12 = vcmp.lt.s32.totalorder %v1681_v9, 2  ;;  %v1685_v33 = vsel %vm1683_vm11, %v4694_v40, %v1684_v18 }
 0x338   :  { %v1892_v19 = vxor.u32 2147483648, %v8850_v28  ;;  %v1895_v52 = vxor.u32 2147483648, %v8851_v57  ;;  %v1689_v56 = vsel %vm1682_vm12, %v1685_v33, %v1688_v10  ;;  %vm1783_vm9 = vweird.f32 %v8852_v17  ;;  %v8871_v17 = vld [vmem:[#allocation4_spill] sm:$0xff]  ;;  %v8879_v33 = vld [vmem:[#allocation41_spill] sm:$0xff] }
 0x339   :  { %vm1995_vm4 = vcmp.eq.s32.totalorder %v1993_v1, 0  ;;  %vm1998_vm7 = vcmp.eq.s32.totalorder %v1993_v1, 2  ;;  %v1690_v35 = vsel %vm1679_vm13, nan, %v1689_v56  ;;  %v1794_v7 = vsel %vm1783_vm9, nan, %v1793_v22 }
 0x33a   :  { %v1997_v20 = vsel %vm1995_vm4, %v8848_v29, %v1996_v24  ;;  %v2000_v59 = vsel %vm1998_vm7, %v1999_v32, %v8847_v4  ;;  %v7994_v13 = vpop.eup %4699  ;;  %vm2733_vm5 = vcmp.lt.s32.totalorder %v8853_v8, 0  ;;  %v2959_v6 = vpack.c.bf16 %v1794_v7, %v1690_v35  ;;  %v8866_v29 = vld [vmem:[#allocation22_spill] sm:$0xff] }
 0x33b   :  { %vm1891_vm10 = vcmp.eq.s32.totalorder %v1889_v25, 0  ;;  %vm1894_vm15 = vcmp.eq.s32.totalorder %v1889_v25, 2  ;;  %v7997_v55 = vpop.eup %4701  ;;  %v2715_v38 = vsel %vm7966_vm8, %v8830_v16, %v2712_v5  ;;  %v8854_v30 = vand.u32 2147483647, %v8853_v8  ;;  %v8862_v5 = vld [vmem:[#allocation56_spill] sm:$0xff] }
 0x33c   :  { %v1893_v23 = vsel %vm1891_vm10, %v8851_v57, %v1892_v19  ;;  %v1896_v11 = vsel %vm1894_vm15, %v1895_v52, %v8850_v28  ;;  %vm1994_vm14 = vcmp.lt.s32.totalorder %v1993_v1, 2  ;;  %v2815_v39 = vxor.u32 2147483648, %v7972_v45  ;;  %4293 = vmatmul.mubr.msk.bf16.gmra.mrb[48].mxu1 %vm2978_vm1, %v2959_v6  ;;  %v8870_v52 = vld [vmem:[#allocation6_spill] sm:$0xff] }
 0x33d   :  { %vm8004_vm3 = vcmp.le.f32.partialorder %v8854_v30, 0.7853982  ;;  %v2917_v53 = vcvt.s32.f32 %v7974_v12  ;;  %v2001_v41 = vsel %vm1994_vm14, %v1997_v20, %v2000_v59  ;;  %v2201_v2 = vand.u32 3, %v8857_v21  ;;  %4296 = vmatprep.mubr.msk.bf16.mxu1 %vm4719_vm2, %v8710_v36  ;;  %v8872_v59 = vld [vmem:[#allocation42_spill] sm:$0xff] }
 0x33e   :  { %v2915_v3 = vand.u32 2147483647, %v7976_v42  ;;  %vm1890_vm13 = vcmp.lt.s32.totalorder %v1889_v25, 2  ;;  %v2204_v34 = vxor.u32 2147483648, %v8858_v15  ;;  %v2207_v49 = vxor.u32 2147483648, %v8859_v44  ;;  %v8864_v42 = vld [vmem:[#allocation37_spill] sm:$0xff] }
 0x33f   :  { %vm2837_vm6 = vcmp.lt.s32.totalorder %v8860_v54, 0  ;;  %v1897_v9 = vsel %vm1890_vm13, %v1893_v23, %v1896_v11  ;;  %vm1991_vm0 = vweird.f32 %v8861_v0  ;;  %v2097_v40 = vand.u32 3, %v8862_v5  ;;  %v8874_v23 = vld [vmem:[#allocation76_spill] sm:$0xff] }
 0x340   :  { %4703 = vcosq.f32 %v2715_v38  ;;  %v2002_v12 = vsel %vm1991_vm0, nan, %v2001_v41  ;;  %v2100_v43 = vxor.u32 2147483648, %v8863_v50  ;;  %v2103_v37 = vxor.u32 2147483648, %v8864_v42 }
 0x341   :  { %v2816_v46 = vsel %vm2733_vm5, %v2815_v39, %v7972_v45  ;;  %vm1887_vm11 = vweird.f32 %v8865_v58  ;;  %vm2203_vm12 = vcmp.eq.s32.totalorder %v2201_v2, 0  ;;  %vm2206_vm9 = vcmp.eq.s32.totalorder %v2201_v2, 2  ;;  %v8875_v39 = vld [vmem:[#allocation34_spill] sm:$0xff] }
 0x342   :  { %v2918_v1 = vmul.f32 %v2917_v53, %v2915_v3  ;;  %v1898_v18 = vsel %vm1887_vm11, nan, %v1897_v9  ;;  %v2205_v4 = vsel %vm2203_vm12, %v8859_v44, %v2204_v34  ;;  %v2208_v24 = vsel %vm2206_vm9, %v2207_v49, %v8858_v15 }
 0x343   :  { %v2817_v32 = vsub.s32 4, %v8866_v29  ;;  %v2960_v10 = vpack.c.bf16 %v2002_v12, %v1898_v18  ;;  %vm2099_vm4 = vcmp.eq.s32.totalorder %v2097_v40, 0  ;;  %vm2102_vm7 = vcmp.eq.s32.totalorder %v2097_v40, 2 }
 0x344   :  { %4705 = vsinq.f32 %v2715_v38  ;;  %v2101_v22 = vsel %vm2099_vm4, %v8864_v42, %v2100_v43  ;;  %v2104_v45 = vsel %vm2102_vm7, %v2103_v37, %v8863_v50  ;;  %vm2202_vm10 = vcmp.lt.s32.totalorder %v2201_v2, 2  ;;  %v8873_v38 = vld [vmem:[#allocation78_spill] sm:$0xff]  ;;  %v8876_v43 = vld [vmem:[#allocation35_spill] sm:$0xff] }
 0x345   :  { %v2819_v63 = vsel %vm8004_vm3, %v8853_v8, %v2816_v46  ;;  %v8867_v25 = vand.u32 2147483647, %v8860_v54  ;;  %4297 = vmatmul.mubr.msk.bf16.gmra.mrb[52].mxu1 %vm2978_vm1, %v2960_v10  ;;  %v2209_v28 = vsel %vm2202_vm10, %v2205_v4, %v2208_v24  ;;  %v2409_v19 = vand.u32 3, %v7951_v27  ;;  %v8877_v46 = vld [vmem:[#allocation14_spill] sm:$0xff] }
 0x346   :  { %v2919_v57 = vxor.u32 2147483648, %v2918_v1  ;;  %4300 = vmatprep.mubr.msk.bf16.mxu1 %vm4719_vm2, %v8710_v36  ;;  %vm2098_vm14 = vcmp.lt.s32.totalorder %v2097_v40, 2  ;;  %v2412_v56 = vxor.u32 2147483648, %v8870_v52  ;;  %v2415_v35 = vxor.u32 2147483648, %v8871_v17 }
 0x347   :  { %vm8038_vm15 = vcmp.le.f32.partialorder %v8867_v25, 0.7853982  ;;  %v2818_v7 = vsel %vm2733_vm5, %v2817_v32, %v8866_v29  ;;  %v2105_v20 = vsel %vm2098_vm14, %v2101_v22, %v2104_v45  ;;  %vm2199_vm13 = vweird.f32 %v8872_v59 }
 0x348   :  { %v2305_v6 = vand.u32 3, %v7945_v14  ;;  %4707 = vcosq.f32 %v2819_v63  ;;  %v2210_v27 = vsel %vm2199_vm13, nan, %v2209_v28  ;;  %v2308_v30 = vxor.u32 2147483648, %v8873_v38 }
 0x349   :  { %v2311_v11 = vxor.u32 2147483648, %v8874_v23  ;;  %4709 = vsinq.f32 %v2819_v63  ;;  %vm2095_vm0 = vweird.f32 %v8875_v39  ;;  %vm2411_vm11 = vcmp.eq.s32.totalorder %v2409_v19, 0 }
 0x34a   :  { %vm2414_vm12 = vcmp.eq.s32.totalorder %v2409_v19, 2  ;;  %v8056_v53 = vpop.eup %4703  ;;  %v2920_v41 = vsel %vm2837_vm6, %v2919_v57, %v2918_v1  ;;  %v2106_v21 = vsel %vm2095_vm0, nan, %v2105_v20  ;;  %v2413_v2 = vsel %vm2411_vm11, %v8871_v17, %v2412_v56  ;;  %v8878_v1 = vld [vmem:[#allocation47_spill] sm:$0xff] }
 0x34b   :  { %v2416_v14 = vsel %vm2414_vm12, %v2415_v35, %v8870_v52  ;;  %v2820_v3 = vsel %vm8004_vm3, 0, %v2818_v7  ;;  %v2961_v15 = vpack.c.bf16 %v2210_v27, %v2106_v21  ;;  %vm2307_vm5 = vcmp.eq.s32.totalorder %v2305_v6, 0 }
 0x34c   :  { %vm2310_vm9 = vcmp.eq.s32.totalorder %v2305_v6, 2  ;;  %v2309_v34 = vsel %vm2307_vm5, %v8874_v23, %v2308_v30  ;;  %vm2410_vm4 = vcmp.lt.s32.totalorder %v2409_v19, 2  ;;  %v2716_v49 = vsel %vm7966_vm8, 0, %v7962_v48 }
 0x34d   :  { %v2312_v44 = vsel %vm2310_vm9, %v2311_v11, %v8873_v38  ;;  %v2923_v9 = vsel %vm8038_vm15, %v8860_v54, %v2920_v41  ;;  %4301 = vmatmul.mubr.msk.bf16.gmra.mrb[56].mxu1 %vm2978_vm1, %v2961_v15  ;;  %v2417_v31 = vsel %vm2410_vm4, %v2413_v2, %v2416_v14  ;;  %v2617_v0 = vand.u32 3, %v7957_v61 }
 0x34e   :  { %v8074_v5 = vpop.eup %4705  ;;  %v2824_v40 = vadd.s32 3, %v2820_v3  ;;  %4304 = vmatprep.mubr.msk.bf16.mxu1 %vm4719_vm2, %v8710_v36  ;;  %vm2306_vm3 = vcmp.lt.s32.totalorder %v2305_v6, 2  ;;  %v2620_v12 = vxor.u32 2147483648, %v7997_v55  ;;  %v2623_v48 = vxor.u32 2147483648, %v7994_v13 }
 0x34f   :  { %v2921_v26 = vsub.s32 4, %v7713_v62  ;;  %v2313_v50 = vsel %vm2306_vm3, %v2309_v34, %v2312_v44  ;;  %vm2407_vm8 = vweird.f32 %v8876_v43  ;;  %v2513_v42 = vand.u32 3, %v7955_v60  ;;  %v8099_v52 = vpop.f32.mrb[28].mxu0 }
 0x350   :  { %4711 = vcosq.f32 %v2923_v9  ;;  %v2418_v61 = vsel %vm2407_vm8, nan, %v2417_v31  ;;  %v2516_v37 = vxor.u32 2147483648, %v7984_v47  ;;  %v2519_v58 = vxor.u32 2147483648, %v8877_v46  ;;  %v4324_v35 = vpop.f32.mrb[29].mxu0 }
 0x351   :  { %4713 = vsinq.f32 %v2923_v9  ;;  %vm2303_vm7 = vweird.f32 %v8878_v1  ;;  %vm2619_vm10 = vcmp.eq.s32.totalorder %v2617_v0, 0  ;;  %vm2622_vm14 = vcmp.eq.s32.totalorder %v2617_v0, 2  ;;  %v8104_v20 = vpop.f32.mrb[30].mxu0 }
 0x352   :  { %v4708_v18 = vpop.eup %4707  ;;  %v2720_v4 = vadd.s32 3, %v2716_v49  ;;  %v2314_v24 = vsel %vm2303_vm7, nan, %v2313_v50  ;;  %v2621_v29 = vsel %vm2619_vm10, %v7994_v13, %v2620_v12  ;;  %v2624_v32 = vsel %vm2622_vm14, %v2623_v48, %v7997_v55  ;;  %v4325_v38 = vpop.f32.mrb[31].mxu0 }
 0x353   :  { %v4710_v10 = vpop.eup %4709  ;;  %v2922_v60 = vsel %vm2837_vm6, %v2921_v26, %v7713_v62  ;;  %v2962_v22 = vpack.c.bf16 %v2418_v61, %v2314_v24  ;;  %vm2515_vm13 = vcmp.eq.s32.totalorder %v2513_v42, 0  ;;  %vm2518_vm0 = vcmp.eq.s32.totalorder %v2513_v42, 2 }
 0x354   :  { %v2517_v45 = vsel %vm2515_vm13, %v8877_v46, %v2516_v37  ;;  %v2520_v63 = vsel %vm2518_vm0, %v2519_v58, %v7984_v47  ;;  %vm2618_vm11 = vcmp.lt.s32.totalorder %v2617_v0, 2  ;;  %v2825_v28 = vand.u32 3, %v2824_v40 }
 0x355   :  { %4305 = vmatmul.mubr.msk.bf16.gmra.mrb[60].mxu1 %vm2978_vm1, %v2962_v22  ;;  %v2625_v25 = vsel %vm2618_vm11, %v2621_v29, %v2624_v32  ;;  %v2924_v13 = vsel %vm8038_vm15, 0, %v2922_v60  ;;  %vm2514_vm12 = vcmp.lt.s32.totalorder %v2513_v42, 2  ;;  %v2828_v62 = vxor.u32 2147483648, %v4710_v10 }
 0x356   :  { %4308 = vmatprep.mubr.msk.bf16.mxu1 %vm4719_vm2, %v8710_v36  ;;  %v2831_v55 = vxor.u32 2147483648, %v4708_v18  ;;  %v2521_v19 = vsel %vm2514_vm12, %v2517_v45, %v2520_v63  ;;  %vm2615_vm6 = vweird.f32 %v6795_v51  ;;  %v2721_v57 = vand.u32 3, %v2720_v4 }
 0x357   :  { %v2626_v47 = vsel %vm2615_vm6, nan, %v2625_v25  ;;  %v2724_v56 = vxor.u32 2147483648, %v8074_v5  ;;  %v2727_v17 = vxor.u32 2147483648, %v8056_v53  ;;  %vm2511_vm15 = vweird.f32 %v8879_v33  ;;  %v8112_v15 = vpop.f32.mrb[32].mxu0 }
 0x358   :  { %vm2827_vm5 = vcmp.eq.s32.totalorder %v2825_v28, 0  ;;  %vm2830_vm9 = vcmp.eq.s32.totalorder %v2825_v28, 2  ;;  %v2928_v7 = vadd.s32 3, %v2924_v13  ;;  %v2522_v6 = vsel %vm2511_vm15, nan, %v2521_v19 }
 0x359   :  { %v2829_v27 = vsel %vm2827_vm5, %v4708_v18, %v2828_v62  ;;  %v2832_v51 = vsel %vm2830_vm9, %v2831_v55, %v4710_v10  ;;  %v2963_v23 = vpack.c.bf16 %v2626_v47, %v2522_v6  ;;  %vm2723_vm4 = vcmp.eq.s32.totalorder %v2721_v57, 0 }
 0x35a   :  { %v4712_v59 = vpop.eup %4711  ;;  %vm2726_vm3 = vcmp.eq.s32.totalorder %v2721_v57, 2  ;;  %v2725_v11 = vsel %vm2723_vm4, %v8056_v53, %v2724_v56  ;;  %vm2826_vm8 = vcmp.lt.s32.totalorder %v2825_v28, 2  ;;  %v2929_v21 = vand.u32 3, %v2928_v7  ;;  %v4328_v53 = vpop.f32.mrb[33].mxu0 }
 0x35b   :  { %v4714_v30 = vpop.eup %4713  ;;  %v2728_v39 = vsel %vm2726_vm3, %v2727_v17, %v8074_v5  ;;  %v2833_v41 = vsel %vm2826_vm8, %v2829_v27, %v2832_v51  ;;  %vm2722_vm7 = vcmp.lt.s32.totalorder %v2721_v57, 2  ;;  %v2935_v14 = vxor.u32 2147483648, %v4712_v59  ;;  %v8115_v44 = vpop.f32.mrb[34].mxu0 }
 0x35c   :  { %v2932_v2 = vxor.u32 2147483648, %v4714_v30  ;;  %v2729_v3 = vsel %vm2722_vm7, %v2725_v11, %v2728_v39  ;;  %vm2823_vm10 = vweird.f32 %v8853_v8  ;;  %vm2719_vm14 = vweird.f32 %v8830_v16  ;;  %v4329_v0 = vpop.f32.mrb[35].mxu0 }
 0x35d   :  { %4309 = vmatmul.mubr.msk.bf16.gmra.mrb[64].mxu1 %vm2978_vm1, %v2963_v23  ;;  %v2834_v34 = vsel %vm2823_vm10, nan, %v2833_v41  ;;  %vm2931_vm13 = vcmp.eq.s32.totalorder %v2929_v21, 0  ;;  %vm2934_vm0 = vcmp.eq.s32.totalorder %v2929_v21, 2  ;;  %v2730_v49 = vsel %vm2719_vm14, nan, %v2729_v3  ;;  %v8167_v23 = vld [vmem:[%s8451_s5] ss:$0 sm:$0xff] }
 0x35e   :  { %4312 = vmatprep.mubr.msk.bf16.mxu1 %vm4719_vm2, %v8710_v36  ;;  %v2933_v9 = vsel %vm2931_vm13, %v4712_v59, %v2932_v2  ;;  %v2936_v31 = vsel %vm2934_vm0, %v2935_v14, %v4714_v30  ;;  %v2964_v5 = vpack.c.bf16 %v2834_v34, %v2730_v49  ;;  %vm2930_vm11 = vcmp.lt.s32.totalorder %v2929_v21, 2 }
 0x35f   :  { %v2937_v40 = vsel %vm2930_vm11, %v2933_v9, %v2936_v31  ;;  %vm2927_vm12 = vweird.f32 %v8860_v54  ;;  %v8121_v12 = vpop.f32.mrb[36].mxu0 }
 0x360   :  { %v2938_v8 = vsel %vm2927_vm12, nan, %v2937_v40  ;;  %v4332_v48 = vpop.f32.mrb[37].mxu0  ;;  %v4613_v40 = vld [vmem:[%s8452_s8 + $0x10] sm:$0xff]  }
 0x361   :  { %v2965_v16 = vpack.c.bf16 %v2938_v8, %v2938_v8  ;;  %v8124_v26 = vpop.f32.mrb[38].mxu0  ;;  %v4614_v8 = vld [vmem:[%s8452_s8 + $0x18] sm:$0xff]  }
 0x362   :  { %v4333_v50 = vpop.f32.mrb[39].mxu0 }
 0x365   :  { %4313 = vmatmul.mubr.msk.bf16.gmra.mrb[68].mxu1 %vm2978_vm1, %v2964_v5 }
 0x366   :  { %4316 = vmatprep.mubr.msk.bf16.mxu1 %vm4719_vm2, %v8710_v36 }
 0x368   :  { %v8128_v43 = vpop.f32.mrb[40].mxu0 }
 0x369   :  { %v4336_v42 = vpop.f32.mrb[41].mxu0 }
 0x36a   :  { %v8130_v61 = vpop.f32.mrb[42].mxu0 }
 0x36b   :  { %v4337_v37 = vpop.f32.mrb[43].mxu0 }
 0x36d   :  { %4317 = vmatmul.mubr.msk.bf16.gmra.mrb[72].mxu1 %vm2978_vm1, %v2965_v16  ;;  %vm3449_vm1 = vcmask 523264  }
 0x36e   :  { %4382 = vmatprep.mubr.msk.bf16.mxu1 %vm4719_vm2, %v8710_v36 }
 0x371   :  { %v8132_v54 = vpop.f32.mrb[44].mxu0 }
 0x372   :  { %v4340_v46 = vpop.f32.mrb[45].mxu0 }
 0x373   :  { %v8134_v58 = vpop.f32.mrb[46].mxu0 }
 0x374   :  { %v4341_v1 = vpop.f32.mrb[47].mxu0 }
 0x37a   :  { %v8136_v18 = vpop.f32.mrb[48].mxu0 }
 0x37b   :  { %v4344_v4 = vpop.f32.mrb[49].mxu0 }
 0x37c   :  { %v8138_v24 = vpop.f32.mrb[50].mxu0 }
 0x37d   :  { %v4345_v29 = vpop.f32.mrb[51].mxu0 }
 0x383   :  { %v8140_v32 = vpop.f32.mrb[52].mxu0 }
 0x384   :  { %v4348_v10 = vpop.f32.mrb[53].mxu0 }
 0x385   :  { %v8142_v60 = vpop.f32.mrb[54].mxu0 }
 0x386   :  { %v4349_v22 = vpop.f32.mrb[55].mxu0 }
 0x38c   :  { %v8144_v45 = vpop.f32.mrb[56].mxu0 }
 0x38d   :  { %v4352_v63 = vpop.f32.mrb[57].mxu0 }
 0x38e   :  { %v8146_v25 = vpop.f32.mrb[58].mxu0 }
 0x38f   :  { %v4353_v28 = vpop.f32.mrb[59].mxu0 }
 0x394   :  { %v8148_v13 = vpop.f32.mrb[60].mxu0 }
 0x395   :  { %v4356_v62 = vpop.f32.mrb[61].mxu0 }
 0x396   :  { %v8150_v55 = vpop.f32.mrb[62].mxu0 }
 0x397   :  { %v4357_v19 = vpop.f32.mrb[63].mxu0 }
 0x39c   :  { %v8152_v57 = vpop.f32.mrb[64].mxu0 }
 0x39d   :  { %v4360_v47 = vpop.f32.mrb[65].mxu0 }
 0x39e   :  { %v8154_v56 = vpop.f32.mrb[66].mxu0 }
 0x39f   :  { %v4361_v17 = vpop.f32.mrb[67].mxu0 }
 0x3a5   :  { %v8156_v35 = vpop.f32.mrb[68].mxu0 }
 0x3a6   :  { %v4364_v33 = vpop.f32.mrb[69].mxu0 }
 0x3a7   :  { %v8158_v7 = vpop.f32.mrb[70].mxu0 }
 0x3a8   :  { %v4365_v59 = vpop.f32.mrb[71].mxu0 }
 0x3ae   :  { %v8160_v6 = vpop.f32.mrb[72].mxu0 }
 0x3af   :  { %v4368_v27 = vpop.f32.mrb[73].mxu0 }
 0x3b0   :  { %v8162_v51 = vpop.f32.mrb[74].mxu0 }
 0x3b1   :  { %v4369_v38 = vpop.f32.mrb[75].mxu0 }
 0x3b6   :  { %v8170_v41 = vpop.f32.mrb[76].mxu0 }
 0x3b7   :  { %v4372_v2 = vpop.f32.mrb[77].mxu0 }
 0x3b8   :  { %v3337_v53 = vpop.f32.mrb[78].mxu0 }
 0x3b9   :  { %v4373_v49 = vpop.f32.mrb[79].mxu0 }
 0x3bf   :  { %v3056_v30 = vpop.f32.mrb[24].mxu1 }
 0x3c0   :  { %v3239_v11 = vadd.f32 %v8099_v52, %v3056_v30  ;;  %v4270_v39 = vpop.f32.mrb[25].mxu1  ;;  %v4611_v52 = vld [vmem:[%s8452_s8] sm:$0xff]  }
 0x3c1   :  { %v3059_v21 = vpop.f32.mrb[26].mxu1  ;;  %4435 = vmatpush3.bf16.msra.mxu0 %v4611_v52 }
 0x3c2   :  { %v3347_v14 = vadd.f32 %v8167_v23, %v3239_v11  ;;  %v3242_v3 = vadd.f32 %v8104_v20, %v3059_v21  ;;  %v4271_v34 = vpop.f32.mrb[27].mxu1  ;;  %v4612_v20 = vld [vmem:[%s8452_s8 + $0x8] sm:$0xff]   ;;  %4436 = vmatprep.subr.bf16.mxu0 %v8710_v36 }
 0x3c4   :  { %v3348_v9 = vadd.f32 %v8167_v23, %v3242_v3  ;;  %v3372_v31 = vmax.f32 %v3347_v14, 0.0 }
 0x3c5   :  { %4437 = vmatpush3.bf16.msra.mxu0 %v4612_v20 }
 0x3c6   :  { %v3373_v0 = vmax.f32 %v3348_v9, 0.0  ;;  %4438 = vmatprep.subr.bf16.mxu0 %v8710_v36 }
 0x3c8   :  { %v3397_v5 = vpack.c.bf16 %v3373_v0, %v3372_v31 }
 0x3c9   :  { %4439 = vmatpush3.bf16.msra.mxu0 %v4613_v40 }
 0x3ca   :  { %4383 = vmatmul.mubr.msk.bf16.vlgmr.msra.gmra.mrb[76].mxu1 %vm3449_vm1, %v3397_v5  ;;  %4440 = vmatprep.subr.bf16.mxu0 %v8710_v36 }
 0x3cb   :  { %4386 = vmatprep.mubr.msk.bf16.mxu1 %vm4719_vm2, %v8710_v36 }
 0x3cd   :  { %4441 = vmatpush3.bf16.msra.mxu0 %v4614_v8 }
 0x3df   :  { %v3064_v16 = vpop.f32.mrb[28].mxu1 }
 0x3e0   :  { %v3247_v48 = vadd.f32 %v8112_v15, %v3064_v16  ;;  %v4274_v50 = vpop.f32.mrb[29].mxu1 }
 0x3e1   :  { %v3067_v42 = vpop.f32.mrb[30].mxu1 }
 0x3e2   :  { %v3349_v37 = vadd.f32 %v8167_v23, %v3247_v48  ;;  %v3250_v46 = vadd.f32 %v8115_v44, %v3067_v42  ;;  %v4275_v1 = vpop.f32.mrb[31].mxu1 }
 0x3e4   :  { %v3350_v4 = vadd.f32 %v8167_v23, %v3250_v46  ;;  %v3374_v29 = vmax.f32 %v3349_v37, 0.0 }
 0x3e6   :  { %v3375_v10 = vmax.f32 %v3350_v4, 0.0 }
 0x3e8   :  { %v3398_v22 = vpack.c.bf16 %v3375_v10, %v3374_v29 }
 0x3e9   :  { %v3072_v63 = vpop.f32.mrb[32].mxu1 }
 0x3ea   :  { %v3255_v28 = vadd.f32 %v8121_v12, %v3072_v63  ;;  %v4278_v62 = vpop.f32.mrb[33].mxu1  ;;  %4387 = vmatmul.mubr.msk.bf16.gmra.mrb[80].mxu1 %vm3449_vm1, %v3398_v22 }
 0x3eb   :  { %v3075_v19 = vpop.f32.mrb[34].mxu1  ;;  %4390 = vmatprep.mubr.msk.bf16.mxu1 %vm4719_vm2, %v8710_v36 }
 0x3ec   :  { %v3351_v15 = vadd.f32 %v8167_v23, %v3255_v28  ;;  %v3258_v47 = vadd.f32 %v8124_v26, %v3075_v19  ;;  %v4279_v17 = vpop.f32.mrb[35].mxu1 }
 0x3ee   :  { %v3352_v44 = vadd.f32 %v8167_v23, %v3258_v47  ;;  %v3376_v33 = vmax.f32 %v3351_v15, 0.0 }
 0x3f0   :  { %v3377_v59 = vmax.f32 %v3352_v44, 0.0 }
 0x3f1   :  { %v3080_v27 = vpop.f32.mrb[36].mxu1 }
 0x3f2   :  { %v3399_v38 = vpack.c.bf16 %v3377_v59, %v3376_v33  ;;  %v3263_v12 = vadd.f32 %v8128_v43, %v3080_v27  ;;  %v4282_v30 = vpop.f32.mrb[37].mxu1 }
 0x3f3   :  { %v3083_v11 = vpop.f32.mrb[38].mxu1 }
 0x3f4   :  { %v3353_v39 = vadd.f32 %v8167_v23, %v3263_v12  ;;  %v3266_v21 = vadd.f32 %v8130_v61, %v3083_v11  ;;  %v4283_v2 = vpop.f32.mrb[39].mxu1  ;;  %4391 = vmatmul.mubr.msk.bf16.gmra.mrb[84].mxu1 %vm3449_vm1, %v3399_v38 }
 0x3f5   :  { %4394 = vmatprep.mubr.msk.bf16.mxu1 %vm4719_vm2, %v8710_v36 }
 0x3f6   :  { %v3354_v26 = vadd.f32 %v8167_v23, %v3266_v21  ;;  %v3378_v14 = vmax.f32 %v3353_v39, 0.0 }
 0x3f8   :  { %v3379_v3 = vmax.f32 %v3354_v26, 0.0 }
 0x3f9   :  { %v3088_v34 = vpop.f32.mrb[40].mxu1 }
 0x3fa   :  { %v3400_v53 = vpack.c.bf16 %v3379_v3, %v3378_v14  ;;  %v3271_v43 = vadd.f32 %v8132_v54, %v3088_v34  ;;  %v4286_v49 = vpop.f32.mrb[41].mxu1 }
 0x3fb   :  { %v3091_v9 = vpop.f32.mrb[42].mxu1 }
 0x3fc   :  { %v3355_v31 = vadd.f32 %v8167_v23, %v3271_v43  ;;  %v3274_v61 = vadd.f32 %v8134_v58, %v3091_v9  ;;  %v4287_v0 = vpop.f32.mrb[43].mxu1  ;;  %4395 = vmatmul.mubr.msk.bf16.gmra.mrb[88].mxu1 %vm3449_vm1, %v3400_v53 }
 0x3fd   :  { %4398 = vmatprep.mubr.msk.bf16.mxu1 %vm4719_vm2, %v8710_v36 }
 0x3fe   :  { %v3356_v5 = vadd.f32 %v8167_v23, %v3274_v61  ;;  %v3380_v52 = vmax.f32 %v3355_v31, 0.0 }
 0x400   :  { %v3381_v20 = vmax.f32 %v3356_v5, 0.0 }
 0x401   :  { %v3096_v40 = vpop.f32.mrb[44].mxu1 }
 0x402   :  { %v3401_v8 = vpack.c.bf16 %v3381_v20, %v3380_v52  ;;  %v3279_v54 = vadd.f32 %v8136_v18, %v3096_v40  ;;  %v4290_v16 = vpop.f32.mrb[45].mxu1 }
 0x403   :  { %v3099_v48 = vpop.f32.mrb[46].mxu1 }
 0x404   :  { %v3357_v50 = vadd.f32 %v8167_v23, %v3279_v54  ;;  %v3282_v58 = vadd.f32 %v8138_v24, %v3099_v48  ;;  %v4291_v42 = vpop.f32.mrb[47].mxu1  ;;  %4399 = vmatmul.mubr.msk.bf16.gmra.mrb[92].mxu1 %vm3449_vm1, %v3401_v8 }
 0x405   :  { %4402 = vmatprep.mubr.msk.bf16.mxu1 %vm4719_vm2, %v8710_v36 }
 0x406   :  { %v3358_v37 = vadd.f32 %v8167_v23, %v3282_v58  ;;  %v3382_v46 = vmax.f32 %v3357_v50, 0.0 }
 0x408   :  { %v3383_v1 = vmax.f32 %v3358_v37, 0.0 }
 0x40a   :  { %v3402_v4 = vpack.c.bf16 %v3383_v1, %v3382_v46 }
 0x40c   :  { %4403 = vmatmul.mubr.msk.bf16.gmra.mrb[96].mxu1 %vm3449_vm1, %v3402_v4 }
 0x40d   :  { %4406 = vmatprep.mubr.msk.bf16.mxu1 %vm4719_vm2, %v8710_v36 }
 0x40f   :  { %v3104_v18 = vpop.f32.mrb[48].mxu1 }
 0x410   :  { %v3287_v29 = vadd.f32 %v8140_v32, %v3104_v18  ;;  %v4294_v24 = vpop.f32.mrb[49].mxu1 }
 0x411   :  { %v3107_v10 = vpop.f32.mrb[50].mxu1 }
 0x412   :  { %v3359_v22 = vadd.f32 %v8167_v23, %v3287_v29  ;;  %v3290_v63 = vadd.f32 %v8142_v60, %v3107_v10  ;;  %v4295_v28 = vpop.f32.mrb[51].mxu1 }
 0x414   :  { %v3360_v62 = vadd.f32 %v8167_v23, %v3290_v63  ;;  %v3384_v19 = vmax.f32 %v3359_v22, 0.0 }
 0x416   :  { %v3385_v15 = vmax.f32 %v3360_v62, 0.0 }
 0x418   :  { %v3112_v47 = vpop.f32.mrb[52].mxu1  ;;  %v3403_v17 = vpack.c.bf16 %v3385_v15, %v3384_v19 }
 0x419   :  { %v3295_v44 = vadd.f32 %v8144_v45, %v3112_v47  ;;  %v4298_v33 = vpop.f32.mrb[53].mxu1 }
 0x41a   :  { %v3115_v59 = vpop.f32.mrb[54].mxu1  ;;  %4407 = vmatmul.mubr.msk.bf16.gmra.mrb[100].mxu1 %vm3449_vm1, %v3403_v17  ;;  %v8276_v33 = vld [vmem:[%s8453_s7] ss:$0 sm:$0xff] }
 0x41b   :  { %v3361_v27 = vadd.f32 %v8167_v23, %v3295_v44  ;;  %v3298_v32 = vadd.f32 %v8146_v25, %v3115_v59  ;;  %v4299_v38 = vpop.f32.mrb[55].mxu1  ;;  %4410 = vmatprep.mubr.msk.bf16.mxu1 %vm4719_vm2, %v8710_v36 }
 0x41d   :  { %v3362_v60 = vadd.f32 %v8167_v23, %v3298_v32  ;;  %v3386_v12 = vmax.f32 %v3361_v27, 0.0 }
 0x41f   :  { %v3387_v30 = vmax.f32 %v3362_v60, 0.0 }
 0x420   :  { %v3120_v11 = vpop.f32.mrb[56].mxu1 }
 0x421   :  { %v3404_v39 = vpack.c.bf16 %v3387_v30, %v3386_v12  ;;  %v3303_v45 = vadd.f32 %v8148_v13, %v3120_v11  ;;  %v4302_v21 = vpop.f32.mrb[57].mxu1 }
 0x422   :  { %v3123_v2 = vpop.f32.mrb[58].mxu1 }
 0x423   :  { %v3363_v26 = vadd.f32 %v8167_v23, %v3303_v45  ;;  %v3306_v25 = vadd.f32 %v8150_v55, %v3123_v2  ;;  %v4303_v14 = vpop.f32.mrb[59].mxu1  ;;  %4411 = vmatmul.mubr.msk.bf16.gmra.mrb[104].mxu1 %vm3449_vm1, %v3404_v39 }
 0x424   :  { %4414 = vmatprep.mubr.msk.bf16.mxu1 %vm4719_vm2, %v8710_v36 }
 0x425   :  { %v3364_v3 = vadd.f32 %v8167_v23, %v3306_v25  ;;  %v3388_v34 = vmax.f32 %v3363_v26, 0.0 }
 0x427   :  { %v3389_v53 = vmax.f32 %v3364_v3, 0.0 }
 0x428   :  { %v3128_v43 = vpop.f32.mrb[60].mxu1 }
 0x429   :  { %v3405_v49 = vpack.c.bf16 %v3389_v53, %v3388_v34  ;;  %v3311_v13 = vadd.f32 %v8152_v57, %v3128_v43  ;;  %v4306_v9 = vpop.f32.mrb[61].mxu1 }
 0x42a   :  { %v3131_v31 = vpop.f32.mrb[62].mxu1 }
 0x42b   :  { %v3365_v61 = vadd.f32 %v8167_v23, %v3311_v13  ;;  %v3314_v55 = vadd.f32 %v8154_v56, %v3131_v31  ;;  %v4307_v0 = vpop.f32.mrb[63].mxu1  ;;  %4415 = vmatmul.mubr.msk.bf16.gmra.mrb[108].mxu1 %vm3449_vm1, %v3405_v49 }
 0x42c   :  { %4418 = vmatprep.mubr.msk.bf16.mxu1 %vm4719_vm2, %v8710_v36 }
 0x42d   :  { %v3366_v5 = vadd.f32 %v8167_v23, %v3314_v55  ;;  %v3390_v52 = vmax.f32 %v3365_v61, 0.0 }
 0x42f   :  { %v3391_v20 = vmax.f32 %v3366_v5, 0.0 }
 0x430   :  { %v3136_v40 = vpop.f32.mrb[64].mxu1 }
 0x431   :  { %v3406_v8 = vpack.c.bf16 %v3391_v20, %v3390_v52  ;;  %v3319_v57 = vadd.f32 %v8156_v35, %v3136_v40  ;;  %v4310_v54 = vpop.f32.mrb[65].mxu1 }
 0x432   :  { %v3139_v16 = vpop.f32.mrb[66].mxu1 }
 0x433   :  { %v3367_v48 = vadd.f32 %v8167_v23, %v3319_v57  ;;  %v3322_v56 = vadd.f32 %v8158_v7, %v3139_v16  ;;  %v4311_v50 = vpop.f32.mrb[67].mxu1  ;;  %4419 = vmatmul.mubr.msk.bf16.gmra.mrb[112].mxu1 %vm3449_vm1, %v3406_v8 }
 0x434   :  { %4422 = vmatprep.mubr.msk.bf16.mxu1 %vm4719_vm2, %v8710_v36 }
 0x435   :  { %v3368_v58 = vadd.f32 %v8167_v23, %v3322_v56  ;;  %v3392_v42 = vmax.f32 %v3367_v48, 0.0 }
 0x437   :  { %v3393_v37 = vmax.f32 %v3368_v58, 0.0 }
 0x438   :  { %v3144_v46 = vpop.f32.mrb[68].mxu1 }
 0x439   :  { %v3407_v1 = vpack.c.bf16 %v3393_v37, %v3392_v42  ;;  %v3327_v35 = vadd.f32 %v8160_v6, %v3144_v46  ;;  %v4314_v4 = vpop.f32.mrb[69].mxu1 }
 0x43a   :  { %v3147_v18 = vpop.f32.mrb[70].mxu1 }
 0x43b   :  { %v3369_v29 = vadd.f32 %v8167_v23, %v3327_v35  ;;  %v3330_v7 = vadd.f32 %v8162_v51, %v3147_v18  ;;  %v4315_v24 = vpop.f32.mrb[71].mxu1  ;;  %4423 = vmatmul.mubr.msk.bf16.gmra.mrb[116].mxu1 %vm3449_vm1, %v3407_v1 }
 0x43c   :  { %4426 = vmatprep.mubr.msk.bf16.mxu1 %vm4719_vm2, %v8710_v36 }
 0x43d   :  { %v3370_v10 = vadd.f32 %v8167_v23, %v3330_v7  ;;  %v3394_v22 = vmax.f32 %v3369_v29, 0.0 }
 0x43f   :  { %v3395_v63 = vmax.f32 %v3370_v10, 0.0 }
 0x440   :  { %v3152_v28 = vpop.f32.mrb[72].mxu1 }
 0x441   :  { %v3408_v62 = vpack.c.bf16 %v3395_v63, %v3394_v22  ;;  %v3335_v6 = vadd.f32 %v8170_v41, %v3152_v28  ;;  %v4318_v19 = vpop.f32.mrb[73].mxu1 }
 0x442   :  { %v3155_v15 = vpop.f32.mrb[74].mxu1 }
 0x443   :  { %v3371_v47 = vadd.f32 %v8167_v23, %v3335_v6  ;;  %v4319_v17 = vpop.f32.mrb[75].mxu1  ;;  %4427 = vmatmul.mubr.msk.bf16.gmra.mrb[120].mxu1 %vm3449_vm1, %v3408_v62 }
 0x444   :  { %4430 = vmatprep.mubr.msk.bf16.mxu1 %vm4719_vm2, %v8710_v36 }
 0x445   :  { %v3396_v51 = vmax.f32 %v3371_v47, 0.0 }
 0x447   :  { %v3409_v44 = vpack.c.bf16 %v3396_v51, %v3396_v51 }
 0x44b   :  { %4431 = vmatmul.mubr.msk.bf16.gmra.mrb[124].mxu1 %vm3449_vm1, %v3409_v44 }
 0x49d   :  { %v3523_v41 = vpop.f32.mrb[76].mxu1 }
 0x49e   :  { %v3524_v59 = vadd.f32 %v8276_v33, %v3523_v41  ;;  %v4384_v27 = vpop.f32.mrb[77].mxu1 }
 0x49f   :  { %v3526_v23 = vpop.f32.mrb[78].mxu1 }
 0x4a0   :  { %v3527_v32 = vadd.f32 %v8276_v33, %v3526_v23  ;;  %v4385_v38 = vpop.f32.mrb[79].mxu1  ;;  %v3625_v60 = vmax.f32 %v3524_v59, 0.0 }
 0x4a2   :  { %v3626_v12 = vmax.f32 %v3527_v32, 0.0 }
 0x4a4   :  { %v3650_v30 = vpack.c.bf16 %v3626_v12, %v3625_v60 }
 0x4a6   :  { %4443 = vmatmul.mubr.msk.bf16.vlgmr.msra.gmra.mrb[80].mxu0 %vm3449_vm1, %v3650_v30 }
 0x4a7   :  { %4446 = vmatprep.mubr.msk.bf16.mxu0 %vm4719_vm2, %v8710_v36 }
 0x4bd   :  { %v3531_v11 = vpop.f32.mrb[80].mxu1 }
 0x4be   :  { %v3532_v39 = vadd.f32 %v8276_v33, %v3531_v11  ;;  %v4388_v45 = vpop.f32.mrb[81].mxu1 }
 0x4bf   :  { %v3534_v21 = vpop.f32.mrb[82].mxu1 }
 0x4c0   :  { %v3535_v2 = vadd.f32 %v8276_v33, %v3534_v21  ;;  %v4389_v26 = vpop.f32.mrb[83].mxu1  ;;  %v3627_v25 = vmax.f32 %v3532_v39, 0.0 }
 0x4c2   :  { %v3628_v14 = vmax.f32 %v3535_v2, 0.0 }
 0x4c4   :  { %v3651_v3 = vpack.c.bf16 %v3628_v14, %v3627_v25 }
 0x4c6   :  { %4447 = vmatmul.mubr.msk.bf16.gmra.mrb[84].mxu0 %vm3449_vm1, %v3651_v3 }
 0x4c7   :  { %v3539_v34 = vpop.f32.mrb[84].mxu1  ;;  %4450 = vmatprep.mubr.msk.bf16.mxu0 %vm4719_vm2, %v8710_v36 }
 0x4c8   :  { %v3540_v53 = vadd.f32 %v8276_v33, %v3539_v34  ;;  %v4392_v43 = vpop.f32.mrb[85].mxu1 }
 0x4c9   :  { %v3542_v49 = vpop.f32.mrb[86].mxu1 }
 0x4ca   :  { %v3543_v13 = vadd.f32 %v8276_v33, %v3542_v49  ;;  %v4393_v9 = vpop.f32.mrb[87].mxu1  ;;  %v3629_v31 = vmax.f32 %v3540_v53, 0.0 }
 0x4cc   :  { %v3630_v61 = vmax.f32 %v3543_v13, 0.0 }
 0x4ce   :  { %v3652_v55 = vpack.c.bf16 %v3630_v61, %v3629_v31 }
 0x4cf   :  { %v3547_v0 = vpop.f32.mrb[88].mxu1 }
 0x4d0   :  { %v3548_v5 = vadd.f32 %v8276_v33, %v3547_v0  ;;  %v4396_v52 = vpop.f32.mrb[89].mxu1  ;;  %4451 = vmatmul.mubr.msk.bf16.gmra.mrb[88].mxu0 %vm3449_vm1, %v3652_v55 }
 0x4d1   :  { %v3550_v20 = vpop.f32.mrb[90].mxu1  ;;  %4454 = vmatprep.mubr.msk.bf16.mxu0 %vm4719_vm2, %v8710_v36 }
 0x4d2   :  { %v3551_v40 = vadd.f32 %v8276_v33, %v3550_v20  ;;  %v4397_v8 = vpop.f32.mrb[91].mxu1  ;;  %v3631_v57 = vmax.f32 %v3548_v5, 0.0 }
 0x4d4   :  { %v3632_v54 = vmax.f32 %v3551_v40, 0.0 }
 0x4d6   :  { %v3653_v16 = vpack.c.bf16 %v3632_v54, %v3631_v57 }
 0x4d7   :  { %v3555_v48 = vpop.f32.mrb[92].mxu1 }
 0x4d8   :  { %v3556_v56 = vadd.f32 %v8276_v33, %v3555_v48  ;;  %v4400_v50 = vpop.f32.mrb[93].mxu1  ;;  %4455 = vmatmul.mubr.msk.bf16.gmra.mrb[92].mxu0 %vm3449_vm1, %v3653_v16 }
 0x4d9   :  { %v3558_v58 = vpop.f32.mrb[94].mxu1  ;;  %4458 = vmatprep.mubr.msk.bf16.mxu0 %vm4719_vm2, %v8710_v36 }
 0x4da   :  { %v3559_v42 = vadd.f32 %v8276_v33, %v3558_v58  ;;  %v4401_v37 = vpop.f32.mrb[95].mxu1  ;;  %v3633_v46 = vmax.f32 %v3556_v56, 0.0 }
 0x4dc   :  { %v3634_v1 = vmax.f32 %v3559_v42, 0.0 }
 0x4de   :  { %v3654_v35 = vpack.c.bf16 %v3634_v1, %v3633_v46 }
 0x4df   :  { %v3563_v4 = vpop.f32.mrb[96].mxu1 }
 0x4e0   :  { %v3564_v18 = vadd.f32 %v8276_v33, %v3563_v4  ;;  %v4404_v29 = vpop.f32.mrb[97].mxu1  ;;  %4459 = vmatmul.mubr.msk.bf16.gmra.mrb[96].mxu0 %vm3449_vm1, %v3654_v35 }
 0x4e1   :  { %v3566_v7 = vpop.f32.mrb[98].mxu1  ;;  %4462 = vmatprep.mubr.msk.bf16.mxu0 %vm4719_vm2, %v8710_v36 }
 0x4e2   :  { %v3567_v24 = vadd.f32 %v8276_v33, %v3566_v7  ;;  %v4405_v10 = vpop.f32.mrb[99].mxu1  ;;  %v3635_v22 = vmax.f32 %v3564_v18, 0.0 }
 0x4e4   :  { %v3636_v63 = vmax.f32 %v3567_v24, 0.0 }
 0x4e6   :  { %v3655_v28 = vpack.c.bf16 %v3636_v63, %v3635_v22 }
 0x4e8   :  { %4463 = vmatmul.mubr.msk.bf16.gmra.mrb[100].mxu0 %vm3449_vm1, %v3655_v28  ;;  %v8343_v28 = vld [vmem:[%s8454_s9] ss:$0 sm:$0xff] }
 0x4e9   :  { %4466 = vmatprep.mubr.msk.bf16.mxu0 %vm4719_vm2, %v8710_v36 }
 0x4ed   :  { %v3571_v62 = vpop.f32.mrb[100].mxu1 }
 0x4ee   :  { %v3572_v6 = vadd.f32 %v8276_v33, %v3571_v62  ;;  %v4408_v19 = vpop.f32.mrb[101].mxu1 }
 0x4ef   :  { %v3574_v15 = vpop.f32.mrb[102].mxu1 }
 0x4f0   :  { %v3575_v47 = vadd.f32 %v8276_v33, %v3574_v15  ;;  %v4409_v17 = vpop.f32.mrb[103].mxu1  ;;  %v3637_v51 = vmax.f32 %v3572_v6, 0.0 }
 0x4f2   :  { %v3638_v44 = vmax.f32 %v3575_v47, 0.0 }
 0x4f4   :  { %v3656_v41 = vpack.c.bf16 %v3638_v44, %v3637_v51 }
 0x4f6   :  { %v3579_v59 = vpop.f32.mrb[104].mxu1  ;;  %4467 = vmatmul.mubr.msk.bf16.gmra.mrb[104].mxu0 %vm3449_vm1, %v3656_v41 }
 0x4f7   :  { %v3580_v27 = vadd.f32 %v8276_v33, %v3579_v59  ;;  %v4412_v23 = vpop.f32.mrb[105].mxu1  ;;  %4470 = vmatprep.mubr.msk.bf16.mxu0 %vm4719_vm2, %v8710_v36 }
 0x4f8   :  { %v3582_v32 = vpop.f32.mrb[106].mxu1 }
 0x4f9   :  { %v3583_v38 = vadd.f32 %v8276_v33, %v3582_v32  ;;  %v4413_v60 = vpop.f32.mrb[107].mxu1  ;;  %v3639_v12 = vmax.f32 %v3580_v27, 0.0 }
 0x4fb   :  { %v3640_v30 = vmax.f32 %v3583_v38, 0.0 }
 0x4fd   :  { %v3657_v11 = vpack.c.bf16 %v3640_v30, %v3639_v12 }
 0x4fe   :  { %v3587_v39 = vpop.f32.mrb[108].mxu1 }
 0x4ff   :  { %v3588_v45 = vadd.f32 %v8276_v33, %v3587_v39  ;;  %v4416_v21 = vpop.f32.mrb[109].mxu1  ;;  %4471 = vmatmul.mubr.msk.bf16.gmra.mrb[108].mxu0 %vm3449_vm1, %v3657_v11 }
 0x500   :  { %v3590_v2 = vpop.f32.mrb[110].mxu1  ;;  %4474 = vmatprep.mubr.msk.bf16.mxu0 %vm4719_vm2, %v8710_v36 }
 0x501   :  { %v3591_v26 = vadd.f32 %v8276_v33, %v3590_v2  ;;  %v4417_v25 = vpop.f32.mrb[111].mxu1  ;;  %v3641_v14 = vmax.f32 %v3588_v45, 0.0 }
 0x503   :  { %v3642_v3 = vmax.f32 %v3591_v26, 0.0 }
 0x505   :  { %v3658_v34 = vpack.c.bf16 %v3642_v3, %v3641_v14 }
 0x506   :  { %v3595_v53 = vpop.f32.mrb[112].mxu1 }
 0x507   :  { %v3596_v43 = vadd.f32 %v8276_v33, %v3595_v53  ;;  %v4420_v49 = vpop.f32.mrb[113].mxu1  ;;  %4475 = vmatmul.mubr.msk.bf16.gmra.mrb[112].mxu0 %vm3449_vm1, %v3658_v34 }
 0x508   :  { %v3598_v13 = vpop.f32.mrb[114].mxu1  ;;  %4478 = vmatprep.mubr.msk.bf16.mxu0 %vm4719_vm2, %v8710_v36 }
 0x509   :  { %v3599_v9 = vadd.f32 %v8276_v33, %v3598_v13  ;;  %v4421_v31 = vpop.f32.mrb[115].mxu1  ;;  %v3643_v61 = vmax.f32 %v3596_v43, 0.0 }
 0x50b   :  { %v3644_v55 = vmax.f32 %v3599_v9, 0.0 }
 0x50d   :  { %v3659_v0 = vpack.c.bf16 %v3644_v55, %v3643_v61 }
 0x50e   :  { %v3603_v5 = vpop.f32.mrb[116].mxu1 }
 0x50f   :  { %v3604_v52 = vadd.f32 %v8276_v33, %v3603_v5  ;;  %v4424_v20 = vpop.f32.mrb[117].mxu1  ;;  %4479 = vmatmul.mubr.msk.bf16.gmra.mrb[116].mxu0 %vm3449_vm1, %v3659_v0 }
 0x510   :  { %v3606_v40 = vpop.f32.mrb[118].mxu1  ;;  %4482 = vmatprep.mubr.msk.bf16.mxu0 %vm4719_vm2, %v8710_v36 }
 0x511   :  { %v3607_v8 = vadd.f32 %v8276_v33, %v3606_v40  ;;  %v4425_v57 = vpop.f32.mrb[119].mxu1  ;;  %v3645_v54 = vmax.f32 %v3604_v52, 0.0 }
 0x513   :  { %v3646_v16 = vmax.f32 %v3607_v8, 0.0 }
 0x515   :  { %v3660_v48 = vpack.c.bf16 %v3646_v16, %v3645_v54 }
 0x516   :  { %v3611_v56 = vpop.f32.mrb[120].mxu1 }
 0x517   :  { %v3612_v50 = vadd.f32 %v8276_v33, %v3611_v56  ;;  %v4428_v58 = vpop.f32.mrb[121].mxu1  ;;  %4483 = vmatmul.mubr.msk.bf16.gmra.mrb[120].mxu0 %vm3449_vm1, %v3660_v48 }
 0x518   :  { %v3614_v42 = vpop.f32.mrb[122].mxu1  ;;  %4486 = vmatprep.mubr.msk.bf16.mxu0 %vm4719_vm2, %v8710_v36 }
 0x519   :  { %v3615_v37 = vadd.f32 %v8276_v33, %v3614_v42  ;;  %v4429_v46 = vpop.f32.mrb[123].mxu1  ;;  %v3647_v1 = vmax.f32 %v3612_v50, 0.0 }
 0x51b   :  { %v3648_v35 = vmax.f32 %v3615_v37, 0.0 }
 0x51d   :  { %v3661_v4 = vpack.c.bf16 %v3648_v35, %v3647_v1 }
 0x51e   :  { %v3619_v18 = vpop.f32.mrb[124].mxu1 }
 0x51f   :  { %v3620_v29 = vadd.f32 %v8276_v33, %v3619_v18  ;;  %v4432_v7 = vpop.f32.mrb[125].mxu1  ;;  %4487 = vmatmul.mubr.msk.bf16.gmra.mrb[124].mxu0 %vm3449_vm1, %v3661_v4 }
 0x520   :  { %v3622_v24 = vpop.f32.mrb[126].mxu1  ;;  %4490 = vmatprep.mubr.msk.bf16.mxu0 %vm4719_vm2, %v8710_v36 }
 0x521   :  { %v3649_v10 = vmax.f32 %v3620_v29, 0.0  ;;  %v4433_v22 = vpop.f32.mrb[127].mxu1 }
 0x523   :  { %v3662_v63 = vpack.c.bf16 %v3649_v10, %v3649_v10 }
 0x527   :  { %4491 = vmatmul.mubr.msk.bf16.gmra.mrb[128].mxu0 %vm3449_vm1, %v3662_v63 }
 0x579   :  { %v3775_v62 = vpop.f32.mrb[80].mxu0 }
 0x57a   :  { %v3776_v33 = vadd.f32 %v8343_v28, %v3775_v62  ;;  %v4444_v6 = vpop.f32.mrb[81].mxu0 }
 0x57b   :  { %v3778_v19 = vpop.f32.mrb[82].mxu0 }
 0x57c   :  { %3877 = vst [vmem:[%s8455_s10] sm:$0xff] %v3776_v33  ;;  %v3779_v36 = vadd.f32 %v8343_v28, %v3778_v19  ;;  %v4445_v15 = vpop.f32.mrb[83].mxu0 }
 0x57e   :  { %3878 = vst [vmem:[%s8455_s10 + $0x8] sm:$0xff] %v3779_v36 }
 0x599   :  { %v3783_v47 = vpop.f32.mrb[84].mxu0 }
 0x59a   :  { %v3784_v17 = vadd.f32 %v8343_v28, %v3783_v47  ;;  %v4448_v51 = vpop.f32.mrb[85].mxu0 }
 0x59b   :  { %v3786_v44 = vpop.f32.mrb[86].mxu0 }
 0x59c   :  { %3879 = vst [vmem:[%s8455_s10 + $0x10] sm:$0xff] %v3784_v17  ;;  %v3787_v41 = vadd.f32 %v8343_v28, %v3786_v44  ;;  %v4449_v59 = vpop.f32.mrb[87].mxu0 }
 0x59e   :  { %3880 = vst [vmem:[%s8455_s10 + $0x18] sm:$0xff] %v3787_v41 }
 0x5a3   :  { %v3791_v27 = vpop.f32.mrb[88].mxu0 }
 0x5a4   :  { %v3792_v23 = vadd.f32 %v8343_v28, %v3791_v27  ;;  %v4452_v32 = vpop.f32.mrb[89].mxu0 }
 0x5a5   :  { %v3794_v38 = vpop.f32.mrb[90].mxu0 }
 0x5a6   :  { %3881 = vst [vmem:[%s8455_s10 + $0x20] sm:$0xff] %v3792_v23  ;;  %v3795_v60 = vadd.f32 %v8343_v28, %v3794_v38  ;;  %v4453_v12 = vpop.f32.mrb[91].mxu0 }
 0x5a8   :  { %3882 = vst [vmem:[%s8455_s10 + $0x28] sm:$0xff] %v3795_v60 }
 0x5ab   :  { %v3799_v30 = vpop.f32.mrb[92].mxu0 }
 0x5ac   :  { %v3800_v11 = vadd.f32 %v8343_v28, %v3799_v30  ;;  %v4456_v39 = vpop.f32.mrb[93].mxu0 }
 0x5ad   :  { %v3802_v45 = vpop.f32.mrb[94].mxu0 }
 0x5ae   :  { %3883 = vst [vmem:[%s8455_s10 + $0x30] sm:$0xff] %v3800_v11  ;;  %v3803_v21 = vadd.f32 %v8343_v28, %v3802_v45  ;;  %v4457_v2 = vpop.f32.mrb[95].mxu0 }
 0x5b0   :  { %3884 = vst [vmem:[%s8455_s10 + $0x38] sm:$0xff] %v3803_v21 }
 0x5b3   :  { %v3807_v26 = vpop.f32.mrb[96].mxu0 }
 0x5b4   :  { %v3808_v25 = vadd.f32 %v8343_v28, %v3807_v26  ;;  %v4460_v14 = vpop.f32.mrb[97].mxu0 }
 0x5b5   :  { %v3810_v3 = vpop.f32.mrb[98].mxu0 }
 0x5b6   :  { %3885 = vst [vmem:[%s8455_s10 + $0x40] sm:$0xff] %v3808_v25  ;;  %v3811_v34 = vadd.f32 %v8343_v28, %v3810_v3  ;;  %v4461_v53 = vpop.f32.mrb[99].mxu0 }
 0x5b8   :  { %3886 = vst [vmem:[%s8455_s10 + $0x48] sm:$0xff] %v3811_v34 }
 0x5bb   :  { %v3815_v43 = vpop.f32.mrb[100].mxu0 }
 0x5bc   :  { %v3816_v49 = vadd.f32 %v8343_v28, %v3815_v43  ;;  %v4464_v13 = vpop.f32.mrb[101].mxu0 }
 0x5bd   :  { %v3818_v9 = vpop.f32.mrb[102].mxu0 }
 0x5be   :  { %3887 = vst [vmem:[%s8455_s10 + $0x50] sm:$0xff] %v3816_v49  ;;  %v3819_v31 = vadd.f32 %v8343_v28, %v3818_v9  ;;  %v4465_v61 = vpop.f32.mrb[103].mxu0 }
 0x5c0   :  { %3888 = vst [vmem:[%s8455_s10 + $0x58] sm:$0xff] %v3819_v31 }
 0x5c9   :  { %v3823_v55 = vpop.f32.mrb[104].mxu0 }
 0x5ca   :  { %v3824_v0 = vadd.f32 %v8343_v28, %v3823_v55  ;;  %v4468_v5 = vpop.f32.mrb[105].mxu0 }
 0x5cb   :  { %v3826_v52 = vpop.f32.mrb[106].mxu0 }
 0x5cc   :  { %3889 = vst [vmem:[%s8455_s10 + $0x60] sm:$0xff] %v3824_v0  ;;  %v3827_v20 = vadd.f32 %v8343_v28, %v3826_v52  ;;  %v4469_v40 = vpop.f32.mrb[107].mxu0 }
 0x5ce   :  { %3890 = vst [vmem:[%s8455_s10 + $0x68] sm:$0xff] %v3827_v20 }
 0x5d2   :  { %v3831_v8 = vpop.f32.mrb[108].mxu0 }
 0x5d3   :  { %v3832_v57 = vadd.f32 %v8343_v28, %v3831_v8  ;;  %v4472_v54 = vpop.f32.mrb[109].mxu0 }
 0x5d4   :  { %v3834_v16 = vpop.f32.mrb[110].mxu0 }
 0x5d5   :  { %3891 = vst [vmem:[%s8455_s10 + $0x70] sm:$0xff] %v3832_v57  ;;  %v3835_v48 = vadd.f32 %v8343_v28, %v3834_v16  ;;  %v4473_v56 = vpop.f32.mrb[111].mxu0 }
 0x5d7   :  { %3892 = vst [vmem:[%s8455_s10 + $0x78] sm:$0xff] %v3835_v48 }
 0x5da   :  { %v3839_v50 = vpop.f32.mrb[112].mxu0 }
 0x5db   :  { %v3840_v58 = vadd.f32 %v8343_v28, %v3839_v50  ;;  %v4476_v42 = vpop.f32.mrb[113].mxu0 }
 0x5dc   :  { %v3842_v37 = vpop.f32.mrb[114].mxu0 }
 0x5dd   :  { %3893 = vst [vmem:[%s8455_s10 + $0x80] sm:$0xff] %v3840_v58  ;;  %v3843_v46 = vadd.f32 %v8343_v28, %v3842_v37  ;;  %v4477_v1 = vpop.f32.mrb[115].mxu0 }
 0x5df   :  { %3894 = vst [vmem:[%s8455_s10 + $0x88] sm:$0xff] %v3843_v46 }
 0x5e2   :  { %v3847_v35 = vpop.f32.mrb[116].mxu0 }
 0x5e3   :  { %v3848_v4 = vadd.f32 %v8343_v28, %v3847_v35  ;;  %v4480_v18 = vpop.f32.mrb[117].mxu0 }
 0x5e4   :  { %v3850_v29 = vpop.f32.mrb[118].mxu0 }
 0x5e5   :  { %3895 = vst [vmem:[%s8455_s10 + $0x90] sm:$0xff] %v3848_v4  ;;  %v3851_v7 = vadd.f32 %v8343_v28, %v3850_v29  ;;  %v4481_v24 = vpop.f32.mrb[119].mxu0 }
 0x5e7   :  { %3896 = vst [vmem:[%s8455_s10 + $0x98] sm:$0xff] %v3851_v7 }
 0x5ea   :  { %v3855_v10 = vpop.f32.mrb[120].mxu0 }
 0x5eb   :  { %v3856_v22 = vadd.f32 %v8343_v28, %v3855_v10  ;;  %v4484_v63 = vpop.f32.mrb[121].mxu0 }
 0x5ec   :  { %v3858_v62 = vpop.f32.mrb[122].mxu0 }
 0x5ed   :  { %3897 = vst [vmem:[%s8455_s10 + $0xa0] sm:$0xff] %v3856_v22  ;;  %v3859_v33 = vadd.f32 %v8343_v28, %v3858_v62  ;;  %v4485_v6 = vpop.f32.mrb[123].mxu0 }
 0x5ef   :  { %3898 = vst [vmem:[%s8455_s10 + $0xa8] sm:$0xff] %v3859_v33 }
 0x5f2   :  { %v3863_v19 = vpop.f32.mrb[124].mxu0 }
 0x5f3   :  { %v3864_v36 = vadd.f32 %v8343_v28, %v3863_v19  ;;  %v4488_v15 = vpop.f32.mrb[125].mxu0 }
 0x5f4   :  { %v3866_v47 = vpop.f32.mrb[126].mxu0 }
 0x5f5   :  { %3899 = vst [vmem:[%s8455_s10 + $0xb0] sm:$0xff] %v3864_v36  ;;  %v3867_v17 = vadd.f32 %v8343_v28, %v3866_v47  ;;  %v4489_v51 = vpop.f32.mrb[127].mxu0 }
 0x5f7   :  { %3900 = vst [vmem:[%s8455_s10 + $0xb8] sm:$0xff] %v3867_v17 }
 0x5fa   :  { %v3871_v44 = vpop.f32.mrb[128].mxu0 }
 0x5fb   :  { %v3872_v41 = vadd.f32 %v8343_v28, %v3871_v44  ;;  %v4492_v59 = vpop.f32.mrb[129].mxu0 }
 0x5fc   :  { %v3874_v27 = vpop.f32.mrb[130].mxu0 }
 0x5fd   :  { %3901 = vst [vmem:[%s8455_s10 + $0xc0] sm:$0xff] %v3872_v41  ;;  %v4493_v23 = vpop.f32.mrb[131].mxu0 }

</bundles_post_ra>
